<compile_context>
chip_gen: v5e
topology: v5e:2x2
jax: 0.10.0
libtpu: 0.0.40
codegen_flags: <defaults>
</compile_context>

<pallas_src>
import functools
import math

import jax
import jax.numpy as jnp
from jax import lax
from jax.experimental import pallas as pl
from jax.experimental.pallas import tpu as pltpu

_LN_EPS = 1e-5


# --------------------------------------------------------------------------------------
# In-kernel helpers (operate on values, not refs)
# --------------------------------------------------------------------------------------
def _layer_norm(x, g, b, eps=_LN_EPS):
    mu = jnp.mean(x, axis=-1, keepdims=True)
    xc = x - mu
    var = jnp.mean(xc * xc, axis=-1, keepdims=True)
    return xc * lax.rsqrt(var + eps) * g + b


def _mha(x3, wqkv, bqkv, wo, nhead):
    """Head-batched multi-head self-attention over the middle axis of x3.

    x3   : (n, s, d) f32  -- n independent sequences of length s
    wqkv : (d, 3d) bf16 fused Q/K/V weights (1/sqrt(head_dim) folded into the Q columns)
    bqkv : (1, 3d) f32
    wo   : (d, d)  bf16 output-projection weight
    returns (n*s, d) f32 attention output (out-projection bias NOT added).
    """
    n, s, d = x3.shape
    hd = d // nhead
    xf = x3.reshape(n * s, d)

    # Fused QKV projection: one wide bf16 MXU matmul, f32 accumulation; downcast immediately
    # (everything downstream consumes qkv only as MXU operands).
    qkv = jnp.dot(xf.astype(jnp.bfloat16), wqkv,
                  preferred_element_type=jnp.float32) + bqkv            # (n*s, 3d) f32
    qkv = qkv.astype(jnp.bfloat16)

    def heads(base):
        # (nhead*n, s, hd): static lane slices stacked along a new leading (batch) axis.
        parts = [qkv[:, base + h * hd: base + (h + 1) * hd].reshape(1, n, s, hd)
                 for h in range(nhead)]
        return jnp.concatenate(parts, axis=0).reshape(nhead * n, s, hd)

    q = heads(0)
    k = heads(d)
    v = heads(2 * d)

    # Scores: contract head_dim of both operands (no K transpose), batch over (head, seq).
    scores = lax.dot_general(q, k, (((2,), (2,)), ((0,), (0,))),
                             preferred_element_type=jnp.float32)        # (nhead*n, s, s)
    m = jnp.max(scores, axis=-1, keepdims=True)
    p = jnp.exp(scores - m)
    p = p * pl.reciprocal(jnp.sum(p, axis=-1, keepdims=True), approx=True)
    ctx = lax.dot_general(p.astype(jnp.bfloat16), v, (((2,), (1,)), ((0,), (0,))),
                          preferred_element_type=jnp.float32)           # (nhead*n, s, hd)

    # Out-projection: per-head partial products through the matching rows of wo,
    # accumulated in vregs (no concatenation, no VMEM round trip).
    out = None
    for h in range(nhead):
        ctx_h = ctx[h * n:(h + 1) * n].reshape(n * s, hd).astype(jnp.bfloat16)
        part = jnp.dot(ctx_h, wo[h * hd:(h + 1) * hd, :],
                       preferred_element_type=jnp.float32)              # (n*s, d)
        out = part if out is None else out + part
    return out


# --------------------------------------------------------------------------------------
# Fused kernel: stage-1 attention + norm11 + T<->C swap + stage-2 attention + norm21
#               + FFN + norm22, all on one (batch_block, T, C, D) slab.
# --------------------------------------------------------------------------------------
def _fusion_layer_kernel(x_ref,
                         wqkv1_ref, bqkv1_ref, wo1_ref, bo1_ref, g11_ref, be11_ref,
                         wqkv2_ref, bqkv2_ref, wo2_ref, bo2_ref, g21_ref, be21_ref,
                         w1_ref, b1_ref, w2_ref, b2_ref, g22_ref, be22_ref,
                         o_ref, swap_ref, *, nhead):
    rb, t, c, d = x_ref.shape
    x = x_ref[...]                                            # (rb, T, C, D) f32

    # ---- stage 1: attention over T per (b, c) row + residual + norm11 ------------------
    # (rb, T, C, D) -> (C*rb, T, D): static per-channel slices stacked along a new leading
    # axis (minor dim stays D -> cheap, well-supported layout op).
    x1 = jnp.concatenate(
        [x[:, :, ci, :].reshape(1, rb, t, d) for ci in range(c)], axis=0)
    x1 = x1.reshape(c * rb, t, d)
    attn1 = _mha(x1, wqkv1_ref[...], bqkv1_ref[...], wo1_ref[...], nhead)
    y1 = _layer_norm(x1.reshape(c * rb * t, d) + attn1 + bo1_ref[...],
                     g11_ref[...], be11_ref[...])             # (C*rb*T, D), rows (c, b, t)

    # ---- T <-> C layout swap entirely in VMEM (scatter along the C axis of a scratch) ----
    y1 = y1.reshape(c, rb * t, d)
    for ci in range(c):
        swap_ref[:, ci, :] = y1[ci]
    x2 = swap_ref[...]                                        # (rb*T, C, D), rows (b, t)

    # ---- stage 2: attention over C per (b, t) row + residual + norm21 -------------------
    attn2 = _mha(x2, wqkv2_ref[...], bqkv2_ref[...], wo2_ref[...], nhead)
    y2 = _layer_norm(x2.reshape(rb * t * c, d) + attn2 + bo2_ref[...],
                     g21_ref[...], be21_ref[...])             # (rb*T*C, D), rows (b, t, c)

    # ---- feed-forward + residual + norm22 ------------------------------------------------
    ff = jnp.dot(y2.astype(jnp.bfloat16), w1_ref[...],
                 preferred_element_type=jnp.float32) + b1_ref[...]
    ff = jnp.maximum(ff, 0.0)
    ff = jnp.dot(ff.astype(jnp.bfloat16), w2_ref[...],
                 preferred_element_type=jnp.float32) + b2_ref[...]
    y3 = _layer_norm(y2 + ff, g22_ref[...], be22_ref[...])

    o_ref[...] = y3.reshape(rb, t, c, d)


# --------------------------------------------------------------------------------------
# pallas_call wrapper
# --------------------------------------------------------------------------------------
def _full_spec(a):
    return pl.BlockSpec(a.shape, lambda i, _nd=a.ndim: (0,) * _nd)


def _pick_batch_block(batch, per_batch_act_bytes, *, max_act_bytes=4 << 20, min_steps=4):
    """Largest batch block that keeps >= min_steps grid steps (both v7x TensorCores busy and
    input/output DMAs overlapped) and keeps the per-step activation slab under budget."""
    rb = 1
    for cand in range(1, batch + 1):
        if batch % cand:
            continue
        if batch // cand < min(min_steps, batch):
            continue
        if cand * per_batch_act_bytes > max_act_bytes:
            continue
        rb = cand
    return rb


def _vmem_limit_bytes(rb, t, c, d, dff, nhead):
    act = rb * t * c * d * 4
    io = 2 * 2 * act                                          # in + out blocks, double-buffered
    scratch = act                                             # swap scratch
    weights = 2 * 2 * (2 * d * 3 * d + 2 * d * d + 2 * d * dff)   # bf16, double-buffered
    scores = 4 * nhead * rb * max(c * t * t, t * c * c)       # f32 score tiles
    live = 10 * act + 4 * rb * t * c * dff                    # rough bound on other temps
    need = io + scratch + weights + scores + live
    # 32 MiB fits the physical VMEM of every current generation (v7x has 64 MiB).
    return int(min(max(32 * 1024 * 1024, need + (4 << 20)), 60 * 1024 * 1024))


def fusion_layer_forward(src, p1, p2, pff, *, nhead, batch_block=None):
    b, t, c, d = src.shape
    rb = batch_block or _pick_batch_block(b, t * c * d * 4)
    assert b % rb == 0
    dff = pff["w1"].shape[1]
    weights = [p1["wqkv"], p1["bqkv"], p1["wo"], p1["bo"], p1["g"], p1["beta"],
               p2["wqkv"], p2["bqkv"], p2["wo"], p2["bo"], p2["g"], p2["beta"],
               pff["w1"], pff["b1"], pff["w2"], pff["b2"], pff["g"], pff["beta"]]
    return pl.pallas_call(
        functools.partial(_fusion_layer_kernel, nhead=nhead),
        out_shape=jax.ShapeDtypeStruct((b, t, c, d), jnp.float32),
        grid_spec=pltpu.PrefetchScalarGridSpec(
            num_scalar_prefetch=0,
            grid=(b // rb,),
            in_specs=[pl.BlockSpec((rb, t, c, d), lambda i: (i, 0, 0, 0))]
                     + [_full_spec(w) for w in weights],
            out_specs=pl.BlockSpec((rb, t, c, d), lambda i: (i, 0, 0, 0)),
            scratch_shapes=[pltpu.VMEM((rb * t, c, d), jnp.float32)],
        ),
        compiler_params=pltpu.CompilerParams(
            dimension_semantics=("parallel",),
            vmem_limit_bytes=_vmem_limit_bytes(rb, t, c, d, dff, nhead),
        ),
    )(src, *weights)


# --------------------------------------------------------------------------------------
# Parameters
# --------------------------------------------------------------------------------------
def _init_attn_params(key, d_model, nhead):
    hd = d_model // nhead
    q_scale = 1.0 / math.sqrt(hd)
    kw, kb, kow, kob = jax.random.split(key, 4)
    wqkv = jax.random.normal(kw, (d_model, 3 * d_model), jnp.float32) * 0.1
    bqkv = jax.random.normal(kb, (1, 3 * d_model), jnp.float32) * 0.1
    # Fold 1/sqrt(head_dim) into the Q projection (semantics-preserving).
    wqkv = wqkv.at[:, :d_model].multiply(q_scale)
    bqkv = bqkv.at[:, :d_model].multiply(q_scale)
    return dict(
        wqkv=wqkv.astype(jnp.bfloat16),
        bqkv=bqkv,
        wo=(jax.random.normal(kow, (d_model, d_model), jnp.float32) * 0.1).astype(jnp.bfloat16),
        bo=jax.random.normal(kob, (1, d_model), jnp.float32) * 0.1,
        g=jnp.ones((1, d_model), jnp.float32),
        beta=jnp.zeros((1, d_model), jnp.float32),
    )


def _init_ffn_params(key, d_model, dim_feedforward):
    k1, k2, k3, k4 = jax.random.split(key, 4)
    return dict(
        w1=(jax.random.normal(k1, (d_model, dim_feedforward), jnp.float32) * 0.1).astype(jnp.bfloat16),
        b1=jax.random.normal(k2, (1, dim_feedforward), jnp.float32) * 0.1,
        w2=(jax.random.normal(k3, (dim_feedforward, d_model), jnp.float32) * 0.1).astype(jnp.bfloat16),
        b2=jax.random.normal(k4, (1, d_model), jnp.float32) * 0.1,
        g=jnp.ones((1, d_model), jnp.float32),
        beta=jnp.zeros((1, d_model), jnp.float32),
    )


# --------------------------------------------------------------------------------------
# Pure-JAX reference (f32 everywhere, same stored weights)
# --------------------------------------------------------------------------------------
def _ref_mha(x3, p, nhead):
    n, s, d = x3.shape
    hd = d // nhead
    qkv = x3 @ p["wqkv"].astype(jnp.float32) + p["bqkv"]
    q = qkv[..., :d].reshape(n, s, nhead, hd)
    k = qkv[..., d:2 * d].reshape(n, s, nhead, hd)
    v = qkv[..., 2 * d:].reshape(n, s, nhead, hd)
    scores = jnp.einsum("bqhd,bkhd->bhqk", q, k)   # 1/sqrt(hd) already folded into Q weights
    a = jax.nn.softmax(scores, axis=-1)
    o = jnp.einsum("bhqk,bkhd->bqhd", a, v).reshape(n, s, d)
    return o @ p["wo"].astype(jnp.float32) + p["bo"]


def _ref_layer_norm(x, g, b, eps=_LN_EPS):
    mu = jnp.mean(x, axis=-1, keepdims=True)
    var = jnp.mean((x - mu) ** 2, axis=-1, keepdims=True)
    return (x - mu) * lax.rsqrt(var + eps) * g + b


class TransformerEncoderFusionLayerPallas:
    """Pallas TPU implementation of TransformerEncoderFusionLayer (eval, norm_first=False, relu)."""

    def __init__(self, d_model, nhead, dim_feedforward=2048, *, key):
        assert d_model % nhead == 0
        self.d_model = d_model
        self.nhead = nhead
        k1, k2, k3 = jax.random.split(key, 3)
        self.p1 = _init_attn_params(k1, d_model, nhead)              # self_attn1 + norm11
        self.p2 = _init_attn_params(k2, d_model, nhead)              # self_attn2 + norm21
        self.pff = _init_ffn_params(k3, d_model, dim_feedforward)    # linear1/2 + norm22

    def __call__(self, src):
        return fusion_layer_forward(src, self.p1, self.p2, self.pff, nhead=self.nhead)

    def reference(self, src):
        B, T, C, D = src.shape
        x = jnp.transpose(src, (0, 2, 1, 3)).reshape(B * C, T, D)
        x = _ref_layer_norm(x + _ref_mha(x, self.p1, self.nhead), self.p1["g"], self.p1["beta"])
        x = jnp.transpose(x.reshape(B, C, T, D), (0, 2, 1, 3)).reshape(B * T, C, D)
        x = _ref_layer_norm(x + _ref_mha(x, self.p2, self.nhead), self.p2["g"], self.p2["beta"])
        ff = jnp.maximum(x @ self.pff["w1"].astype(jnp.float32) + self.pff["b1"], 0.0)
        ff = ff @ self.pff["w2"].astype(jnp.float32) + self.pff["b2"]
        x = _ref_layer_norm(x + ff, self.pff["g"], self.pff["beta"])
        return x.reshape(B, T, C, D)


if __name__ == "__main__":
    # src: (batch, time, channel/attractor, d_model)
    B, T, C, D = 2, 8, 4, 32
    nhead, dim_ff = 4, 64

    root = jax.random.PRNGKey(0)
    k_model, k_data = jax.random.split(root)
    model = TransformerEncoderFusionLayerPallas(D, nhead, dim_ff, key=k_model)
    src = jax.random.normal(k_data, (B, T, C, D), jnp.float32)

    forward = jax.jit(model.__call__)
    out = jax.block_until_ready(forward(src))

    assert out.shape == (B, T, C, D)
    assert bool(jnp.all(jnp.isfinite(out)))

    # Kernel uses bf16 MXU operands + approx softmax reciprocal; reference is f32.
    ref = model.reference(src)
    max_err = float(jnp.max(jnp.abs(out - ref)))
    rel_err = float(jnp.linalg.norm(out - ref) / (jnp.linalg.norm(ref) + 1e-12))
    assert max_err < 5e-2, f"kernel deviates from reference: max abs err {max_err}"
    assert rel_err < 2.5e-2, f"kernel deviates from reference: rel l2 err {rel_err}"

    print("KERNEL_OK")
</pallas_src>

<mosaic_0001>
module attributes {stable_mosaic.version = 11 : i64} {
  func.func @_fusion_layer_kernel(%arg0: i32, %arg1: memref<1x8x4x32xf32, #tpu.memory_space<vmem>>, %arg2: memref<32x96xbf16, #tpu.memory_space<vmem>>, %arg3: memref<1x96xf32, #tpu.memory_space<vmem>>, %arg4: memref<32x32xbf16, #tpu.memory_space<vmem>>, %arg5: memref<1x32xf32, #tpu.memory_space<vmem>>, %arg6: memref<1x32xf32, #tpu.memory_space<vmem>>, %arg7: memref<1x32xf32, #tpu.memory_space<vmem>>, %arg8: memref<32x96xbf16, #tpu.memory_space<vmem>>, %arg9: memref<1x96xf32, #tpu.memory_space<vmem>>, %arg10: memref<32x32xbf16, #tpu.memory_space<vmem>>, %arg11: memref<1x32xf32, #tpu.memory_space<vmem>>, %arg12: memref<1x32xf32, #tpu.memory_space<vmem>>, %arg13: memref<1x32xf32, #tpu.memory_space<vmem>>, %arg14: memref<32x64xbf16, #tpu.memory_space<vmem>>, %arg15: memref<1x64xf32, #tpu.memory_space<vmem>>, %arg16: memref<64x32xbf16, #tpu.memory_space<vmem>>, %arg17: memref<1x32xf32, #tpu.memory_space<vmem>>, %arg18: memref<1x32xf32, #tpu.memory_space<vmem>>, %arg19: memref<1x32xf32, #tpu.memory_space<vmem>>, %arg20: memref<1x8x4x32xf32, #tpu.memory_space<vmem>>, %arg21: memref<8x4x32xf32, #tpu.memory_space<vmem>>) attributes {dimension_semantics = [#tpu.dimension_semantics<parallel>], iteration_bounds = array<i64: 2>, scalar_prefetch = 0 : i64, scratch_operands = 1 : i64, tpu.core_type = #tpu.core_type<tc>, window_params = [{transform_indices = @transform_0, window_bounds = array<i64: 1, 8, 4, 32>}, {pipeline_mode = #tpu.pipeline_mode<synchronous>, transform_indices = @transform_1, window_bounds = array<i64: 32, 96>}, {pipeline_mode = #tpu.pipeline_mode<synchronous>, transform_indices = @transform_2, window_bounds = array<i64: 1, 96>}, {pipeline_mode = #tpu.pipeline_mode<synchronous>, transform_indices = @transform_3, window_bounds = array<i64: 32, 32>}, {pipeline_mode = #tpu.pipeline_mode<synchronous>, transform_indices = @transform_4, window_bounds = array<i64: 1, 32>}, {pipeline_mode = #tpu.pipeline_mode<synchronous>, transform_indices = @transform_5, window_bounds = array<i64: 1, 32>}, {pipeline_mode = #tpu.pipeline_mode<synchronous>, transform_indices = @transform_6, window_bounds = array<i64: 1, 32>}, {pipeline_mode = #tpu.pipeline_mode<synchronous>, transform_indices = @transform_7, window_bounds = array<i64: 32, 96>}, {pipeline_mode = #tpu.pipeline_mode<synchronous>, transform_indices = @transform_8, window_bounds = array<i64: 1, 96>}, {pipeline_mode = #tpu.pipeline_mode<synchronous>, transform_indices = @transform_9, window_bounds = array<i64: 32, 32>}, {pipeline_mode = #tpu.pipeline_mode<synchronous>, transform_indices = @transform_10, window_bounds = array<i64: 1, 32>}, {pipeline_mode = #tpu.pipeline_mode<synchronous>, transform_indices = @transform_11, window_bounds = array<i64: 1, 32>}, {pipeline_mode = #tpu.pipeline_mode<synchronous>, transform_indices = @transform_12, window_bounds = array<i64: 1, 32>}, {pipeline_mode = #tpu.pipeline_mode<synchronous>, transform_indices = @transform_13, window_bounds = array<i64: 32, 64>}, {pipeline_mode = #tpu.pipeline_mode<synchronous>, transform_indices = @transform_14, window_bounds = array<i64: 1, 64>}, {pipeline_mode = #tpu.pipeline_mode<synchronous>, transform_indices = @transform_15, window_bounds = array<i64: 64, 32>}, {pipeline_mode = #tpu.pipeline_mode<synchronous>, transform_indices = @transform_16, window_bounds = array<i64: 1, 32>}, {pipeline_mode = #tpu.pipeline_mode<synchronous>, transform_indices = @transform_17, window_bounds = array<i64: 1, 32>}, {pipeline_mode = #tpu.pipeline_mode<synchronous>, transform_indices = @transform_18, window_bounds = array<i64: 1, 32>}, {transform_indices = @transform_19, window_bounds = array<i64: 1, 8, 4, 32>}]} {
    %c0 = arith.constant 0 : index
    %c0_0 = arith.constant 0 : index
    %c0_1 = arith.constant 0 : index
    %c0_2 = arith.constant 0 : index
    %0 = vector.load %arg1[%c0, %c0_0, %c0_1, %c0_2] : memref<1x8x4x32xf32, #tpu.memory_space<vmem>>, vector<1x8x4x32xf32>
    %1 = vector.extract_strided_slice %0 {offsets = [0, 0, 0, 0], sizes = [1, 8, 1, 32], strides = [1, 1, 1, 1]} : vector<1x8x4x32xf32> to vector<1x8x1x32xf32>
    %2 = vector.shape_cast %1 : vector<1x8x1x32xf32> to vector<1x8x32xf32>
    %3 = vector.shape_cast %2 : vector<1x8x32xf32> to vector<1x1x8x32xf32>
    %4 = vector.extract_strided_slice %0 {offsets = [0, 0, 1, 0], sizes = [1, 8, 1, 32], strides = [1, 1, 1, 1]} : vector<1x8x4x32xf32> to vector<1x8x1x32xf32>
    %5 = vector.shape_cast %4 : vector<1x8x1x32xf32> to vector<1x8x32xf32>
    %6 = vector.shape_cast %5 : vector<1x8x32xf32> to vector<1x1x8x32xf32>
    %7 = vector.extract_strided_slice %0 {offsets = [0, 0, 2, 0], sizes = [1, 8, 1, 32], strides = [1, 1, 1, 1]} : vector<1x8x4x32xf32> to vector<1x8x1x32xf32>
    %8 = vector.shape_cast %7 : vector<1x8x1x32xf32> to vector<1x8x32xf32>
    %9 = vector.shape_cast %8 : vector<1x8x32xf32> to vector<1x1x8x32xf32>
    %10 = vector.extract_strided_slice %0 {offsets = [0, 0, 3, 0], sizes = [1, 8, 1, 32], strides = [1, 1, 1, 1]} : vector<1x8x4x32xf32> to vector<1x8x1x32xf32>
    %11 = vector.shape_cast %10 : vector<1x8x1x32xf32> to vector<1x8x32xf32>
    %12 = vector.shape_cast %11 : vector<1x8x32xf32> to vector<1x1x8x32xf32>
    %13 = tpu.concatenate %3, %6, %9, %12 in 0 : vector<1x1x8x32xf32>, vector<1x1x8x32xf32>, vector<1x1x8x32xf32>, vector<1x1x8x32xf32> -> vector<4x1x8x32xf32>
    %14 = vector.shape_cast %13 : vector<4x1x8x32xf32> to vector<4x8x32xf32>
    %c0_3 = arith.constant 0 : index
    %c0_4 = arith.constant 0 : index
    %15 = vector.load %arg2[%c0_3, %c0_4] : memref<32x96xbf16, #tpu.memory_space<vmem>>, vector<32x96xbf16>
    %c0_5 = arith.constant 0 : index
    %c0_6 = arith.constant 0 : index
    %16 = vector.load %arg3[%c0_5, %c0_6] : memref<1x96xf32, #tpu.memory_space<vmem>>, vector<1x96xf32>
    %c0_7 = arith.constant 0 : index
    %c0_8 = arith.constant 0 : index
    %17 = vector.load %arg4[%c0_7, %c0_8] : memref<32x32xbf16, #tpu.memory_space<vmem>>, vector<32x32xbf16>
    %18 = vector.shape_cast %14 : vector<4x8x32xf32> to vector<32x32xf32>
    %19 = arith.truncf %18 : vector<32x32xf32> to vector<32x32xbf16>
    %cst = arith.constant dense<0.000000e+00> : vector<32x96xf32>
    %20 = tpu.matmul %19, %15, %cst {dimension_numbers = #tpu.dot_dimension_numbers<[1], [0], [0], [1], [0, 0, 1, 1], [], []>} : vector<32x32xbf16>, vector<32x96xbf16>, vector<32x96xf32> -> vector<32x96xf32>
    %21 = vector.broadcast %16 : vector<1x96xf32> to vector<32x96xf32>
    %22 = arith.addf %20, %21 : vector<32x96xf32>
    %23 = arith.truncf %22 : vector<32x96xf32> to vector<32x96xbf16>
    %24 = vector.extract_strided_slice %23 {offsets = [0, 0], sizes = [32, 8], strides = [1, 1]} : vector<32x96xbf16> to vector<32x8xbf16>
    %25 = vector.shape_cast %24 : vector<32x8xbf16> to vector<1x4x8x8xbf16>
    %26 = vector.extract_strided_slice %23 {offsets = [0, 8], sizes = [32, 8], strides = [1, 1]} : vector<32x96xbf16> to vector<32x8xbf16>
    %27 = vector.shape_cast %26 : vector<32x8xbf16> to vector<1x4x8x8xbf16>
    %28 = vector.extract_strided_slice %23 {offsets = [0, 16], sizes = [32, 8], strides = [1, 1]} : vector<32x96xbf16> to vector<32x8xbf16>
    %29 = vector.shape_cast %28 : vector<32x8xbf16> to vector<1x4x8x8xbf16>
    %30 = vector.extract_strided_slice %23 {offsets = [0, 24], sizes = [32, 8], strides = [1, 1]} : vector<32x96xbf16> to vector<32x8xbf16>
    %31 = vector.shape_cast %30 : vector<32x8xbf16> to vector<1x4x8x8xbf16>
    %32 = tpu.concatenate %25, %27, %29, %31 in 0 : vector<1x4x8x8xbf16>, vector<1x4x8x8xbf16>, vector<1x4x8x8xbf16>, vector<1x4x8x8xbf16> -> vector<4x4x8x8xbf16>
    %33 = vector.shape_cast %32 : vector<4x4x8x8xbf16> to vector<16x8x8xbf16>
    %34 = vector.extract_strided_slice %23 {offsets = [0, 32], sizes = [32, 8], strides = [1, 1]} : vector<32x96xbf16> to vector<32x8xbf16>
    %35 = vector.shape_cast %34 : vector<32x8xbf16> to vector<1x4x8x8xbf16>
    %36 = vector.extract_strided_slice %23 {offsets = [0, 40], sizes = [32, 8], strides = [1, 1]} : vector<32x96xbf16> to vector<32x8xbf16>
    %37 = vector.shape_cast %36 : vector<32x8xbf16> to vector<1x4x8x8xbf16>
    %38 = vector.extract_strided_slice %23 {offsets = [0, 48], sizes = [32, 8], strides = [1, 1]} : vector<32x96xbf16> to vector<32x8xbf16>
    %39 = vector.shape_cast %38 : vector<32x8xbf16> to vector<1x4x8x8xbf16>
    %40 = vector.extract_strided_slice %23 {offsets = [0, 56], sizes = [32, 8], strides = [1, 1]} : vector<32x96xbf16> to vector<32x8xbf16>
    %41 = vector.shape_cast %40 : vector<32x8xbf16> to vector<1x4x8x8xbf16>
    %42 = tpu.concatenate %35, %37, %39, %41 in 0 : vector<1x4x8x8xbf16>, vector<1x4x8x8xbf16>, vector<1x4x8x8xbf16>, vector<1x4x8x8xbf16> -> vector<4x4x8x8xbf16>
    %43 = vector.shape_cast %42 : vector<4x4x8x8xbf16> to vector<16x8x8xbf16>
    %44 = vector.extract_strided_slice %23 {offsets = [0, 64], sizes = [32, 8], strides = [1, 1]} : vector<32x96xbf16> to vector<32x8xbf16>
    %45 = vector.shape_cast %44 : vector<32x8xbf16> to vector<1x4x8x8xbf16>
    %46 = vector.extract_strided_slice %23 {offsets = [0, 72], sizes = [32, 8], strides = [1, 1]} : vector<32x96xbf16> to vector<32x8xbf16>
    %47 = vector.shape_cast %46 : vector<32x8xbf16> to vector<1x4x8x8xbf16>
    %48 = vector.extract_strided_slice %23 {offsets = [0, 80], sizes = [32, 8], strides = [1, 1]} : vector<32x96xbf16> to vector<32x8xbf16>
    %49 = vector.shape_cast %48 : vector<32x8xbf16> to vector<1x4x8x8xbf16>
    %50 = vector.extract_strided_slice %23 {offsets = [0, 88], sizes = [32, 8], strides = [1, 1]} : vector<32x96xbf16> to vector<32x8xbf16>
    %51 = vector.shape_cast %50 : vector<32x8xbf16> to vector<1x4x8x8xbf16>
    %52 = tpu.concatenate %45, %47, %49, %51 in 0 : vector<1x4x8x8xbf16>, vector<1x4x8x8xbf16>, vector<1x4x8x8xbf16>, vector<1x4x8x8xbf16> -> vector<4x4x8x8xbf16>
    %53 = vector.shape_cast %52 : vector<4x4x8x8xbf16> to vector<16x8x8xbf16>
    %cst_9 = arith.constant dense<0.000000e+00> : vector<16x8x8xf32>
    %54 = tpu.matmul %33, %43, %cst_9 {dimension_numbers = #tpu.dot_dimension_numbers<[2], [2], [1], [1], [0, 0, 0, 1, 1, 1], [0], [0]>} : vector<16x8x8xbf16>, vector<16x8x8xbf16>, vector<16x8x8xf32> -> vector<16x8x8xf32>
    %cst_10 = arith.constant dense<0xFF800000> : vector<16x8xf32>
    %55 = vector.multi_reduction <maximumf>, %54, %cst_10 [2] : vector<16x8x8xf32> to vector<16x8xf32>
    %56 = vector.shape_cast %55 : vector<16x8xf32> to vector<16x8x1xf32>
    %57 = vector.broadcast %56 : vector<16x8x1xf32> to vector<16x8x8xf32>
    %58 = arith.subf %54, %57 : vector<16x8x8xf32>
    %59 = math.exp %58 : vector<16x8x8xf32>
    %cst_11 = arith.constant dense<0.000000e+00> : vector<16x8xf32>
    %60 = vector.multi_reduction <add>, %59, %cst_11 [2] : vector<16x8x8xf32> to vector<16x8xf32>
    %61 = vector.shape_cast %60 : vector<16x8xf32> to vector<16x8x1xf32>
    %62 = tpu.reciprocal %61 {approx = true} : vector<16x8x1xf32> -> vector<16x8x1xf32>
    %63 = vector.broadcast %62 : vector<16x8x1xf32> to vector<16x8x8xf32>
    %64 = arith.mulf %59, %63 : vector<16x8x8xf32>
    %65 = arith.truncf %64 : vector<16x8x8xf32> to vector<16x8x8xbf16>
    %cst_12 = arith.constant dense<0.000000e+00> : vector<16x8x8xf32>
    %66 = tpu.matmul %65, %53, %cst_12 {dimension_numbers = #tpu.dot_dimension_numbers<[2], [1], [1], [2], [0, 0, 0, 1, 1, 2], [0], [0]>} : vector<16x8x8xbf16>, vector<16x8x8xbf16>, vector<16x8x8xf32> -> vector<16x8x8xf32>
    %67 = vector.extract_strided_slice %66 {offsets = [0, 0, 0], sizes = [4, 8, 8], strides = [1, 1, 1]} : vector<16x8x8xf32> to vector<4x8x8xf32>
    %68 = vector.shape_cast %67 : vector<4x8x8xf32> to vector<32x8xf32>
    %69 = arith.truncf %68 : vector<32x8xf32> to vector<32x8xbf16>
    %70 = vector.extract_strided_slice %17 {offsets = [0, 0], sizes = [8, 32], strides = [1, 1]} : vector<32x32xbf16> to vector<8x32xbf16>
    %cst_13 = arith.constant dense<0.000000e+00> : vector<32x32xf32>
    %71 = tpu.matmul %69, %70, %cst_13 {dimension_numbers = #tpu.dot_dimension_numbers<[1], [0], [0], [1], [0, 0, 1, 1], [], []>} : vector<32x8xbf16>, vector<8x32xbf16>, vector<32x32xf32> -> vector<32x32xf32>
    %72 = vector.extract_strided_slice %66 {offsets = [4, 0, 0], sizes = [4, 8, 8], strides = [1, 1, 1]} : vector<16x8x8xf32> to vector<4x8x8xf32>
    %73 = vector.shape_cast %72 : vector<4x8x8xf32> to vector<32x8xf32>
    %74 = arith.truncf %73 : vector<32x8xf32> to vector<32x8xbf16>
    %75 = vector.extract_strided_slice %17 {offsets = [8, 0], sizes = [8, 32], strides = [1, 1]} : vector<32x32xbf16> to vector<8x32xbf16>
    %cst_14 = arith.constant dense<0.000000e+00> : vector<32x32xf32>
    %76 = tpu.matmul %74, %75, %cst_14 {dimension_numbers = #tpu.dot_dimension_numbers<[1], [0], [0], [1], [0, 0, 1, 1], [], []>} : vector<32x8xbf16>, vector<8x32xbf16>, vector<32x32xf32> -> vector<32x32xf32>
    %77 = arith.addf %71, %76 : vector<32x32xf32>
    %78 = vector.extract_strided_slice %66 {offsets = [8, 0, 0], sizes = [4, 8, 8], strides = [1, 1, 1]} : vector<16x8x8xf32> to vector<4x8x8xf32>
    %79 = vector.shape_cast %78 : vector<4x8x8xf32> to vector<32x8xf32>
    %80 = arith.truncf %79 : vector<32x8xf32> to vector<32x8xbf16>
    %81 = vector.extract_strided_slice %17 {offsets = [16, 0], sizes = [8, 32], strides = [1, 1]} : vector<32x32xbf16> to vector<8x32xbf16>
    %cst_15 = arith.constant dense<0.000000e+00> : vector<32x32xf32>
    %82 = tpu.matmul %80, %81, %cst_15 {dimension_numbers = #tpu.dot_dimension_numbers<[1], [0], [0], [1], [0, 0, 1, 1], [], []>} : vector<32x8xbf16>, vector<8x32xbf16>, vector<32x32xf32> -> vector<32x32xf32>
    %83 = arith.addf %77, %82 : vector<32x32xf32>
    %84 = vector.extract_strided_slice %66 {offsets = [12, 0, 0], sizes = [4, 8, 8], strides = [1, 1, 1]} : vector<16x8x8xf32> to vector<4x8x8xf32>
    %85 = vector.shape_cast %84 : vector<4x8x8xf32> to vector<32x8xf32>
    %86 = arith.truncf %85 : vector<32x8xf32> to vector<32x8xbf16>
    %87 = vector.extract_strided_slice %17 {offsets = [24, 0], sizes = [8, 32], strides = [1, 1]} : vector<32x32xbf16> to vector<8x32xbf16>
    %cst_16 = arith.constant dense<0.000000e+00> : vector<32x32xf32>
    %88 = tpu.matmul %86, %87, %cst_16 {dimension_numbers = #tpu.dot_dimension_numbers<[1], [0], [0], [1], [0, 0, 1, 1], [], []>} : vector<32x8xbf16>, vector<8x32xbf16>, vector<32x32xf32> -> vector<32x32xf32>
    %89 = arith.addf %83, %88 : vector<32x32xf32>
    %90 = vector.shape_cast %14 : vector<4x8x32xf32> to vector<32x32xf32>
    %91 = arith.addf %90, %89 : vector<32x32xf32>
    %c0_17 = arith.constant 0 : index
    %c0_18 = arith.constant 0 : index
    %92 = vector.load %arg5[%c0_17, %c0_18] : memref<1x32xf32, #tpu.memory_space<vmem>>, vector<1x32xf32>
    %93 = vector.broadcast %92 : vector<1x32xf32> to vector<32x32xf32>
    %94 = arith.addf %91, %93 : vector<32x32xf32>
    %c0_19 = arith.constant 0 : index
    %c0_20 = arith.constant 0 : index
    %95 = vector.load %arg6[%c0_19, %c0_20] : memref<1x32xf32, #tpu.memory_space<vmem>>, vector<1x32xf32>
    %c0_21 = arith.constant 0 : index
    %c0_22 = arith.constant 0 : index
    %96 = vector.load %arg7[%c0_21, %c0_22] : memref<1x32xf32, #tpu.memory_space<vmem>>, vector<1x32xf32>
    %cst_23 = arith.constant dense<0.000000e+00> : vector<32xf32>
    %97 = vector.multi_reduction <add>, %94, %cst_23 [1] : vector<32x32xf32> to vector<32xf32>
    %98 = vector.shape_cast %97 : vector<32xf32> to vector<32x1xf32>
    %cst_24 = arith.constant 3.200000e+01 : f32
    %99 = vector.broadcast %cst_24 : f32 to vector<32x1xf32>
    %100 = arith.divf %98, %99 : vector<32x1xf32>
    %101 = vector.broadcast %100 : vector<32x1xf32> to vector<32x32xf32>
    %102 = arith.subf %94, %101 : vector<32x32xf32>
    %103 = arith.mulf %102, %102 : vector<32x32xf32>
    %cst_25 = arith.constant dense<0.000000e+00> : vector<32xf32>
    %104 = vector.multi_reduction <add>, %103, %cst_25 [1] : vector<32x32xf32> to vector<32xf32>
    %105 = vector.shape_cast %104 : vector<32xf32> to vector<32x1xf32>
    %cst_26 = arith.constant 3.200000e+01 : f32
    %106 = vector.broadcast %cst_26 : f32 to vector<32x1xf32>
    %107 = arith.divf %105, %106 : vector<32x1xf32>
    %cst_27 = arith.constant 9.99999974E-6 : f32
    %108 = vector.broadcast %cst_27 : f32 to vector<32x1xf32>
    %109 = arith.addf %107, %108 : vector<32x1xf32>
    %110 = math.rsqrt %109 : vector<32x1xf32>
    %111 = vector.broadcast %110 : vector<32x1xf32> to vector<32x32xf32>
    %112 = arith.mulf %102, %111 : vector<32x32xf32>
    %113 = vector.broadcast %95 : vector<1x32xf32> to vector<32x32xf32>
    %114 = arith.mulf %112, %113 : vector<32x32xf32>
    %115 = vector.broadcast %96 : vector<1x32xf32> to vector<32x32xf32>
    %116 = arith.addf %114, %115 : vector<32x32xf32>
    %117 = vector.shape_cast %116 : vector<32x32xf32> to vector<4x8x32xf32>
    %118 = vector.extract_strided_slice %117 {offsets = [0, 0, 0], sizes = [1, 8, 32], strides = [1, 1, 1]} : vector<4x8x32xf32> to vector<1x8x32xf32>
    %119 = vector.shape_cast %118 : vector<1x8x32xf32> to vector<8x32xf32>
    %c0_28 = arith.constant 0 : index
    %c0_29 = arith.constant 0 : index
    %c0_30 = arith.constant 0 : index
    %120 = vector.load %arg21[%c0_28, %c0_29, %c0_30] : memref<8x4x32xf32, #tpu.memory_space<vmem>>, vector<8x1x32xf32>
    %121 = vector.shape_cast %120 : vector<8x1x32xf32> to vector<8x32xf32>
    %122 = vector.shape_cast %119 : vector<8x32xf32> to vector<8x1x32xf32>
    tpu.vector_store %arg21[%c0_28, %c0_29, %c0_30], %122 {strides = array<i32>} : memref<8x4x32xf32, #tpu.memory_space<vmem>>, vector<8x1x32xf32>,
    %123 = vector.extract_strided_slice %117 {offsets = [1, 0, 0], sizes = [1, 8, 32], strides = [1, 1, 1]} : vector<4x8x32xf32> to vector<1x8x32xf32>
    %124 = vector.shape_cast %123 : vector<1x8x32xf32> to vector<8x32xf32>
    %c0_31 = arith.constant 0 : index
    %c1 = arith.constant 1 : index
    %c0_32 = arith.constant 0 : index
    %125 = vector.load %arg21[%c0_31, %c1, %c0_32] : memref<8x4x32xf32, #tpu.memory_space<vmem>>, vector<8x1x32xf32>
    %126 = vector.shape_cast %125 : vector<8x1x32xf32> to vector<8x32xf32>
    %127 = vector.shape_cast %124 : vector<8x32xf32> to vector<8x1x32xf32>
    tpu.vector_store %arg21[%c0_31, %c1, %c0_32], %127 {strides = array<i32>} : memref<8x4x32xf32, #tpu.memory_space<vmem>>, vector<8x1x32xf32>,
    %128 = vector.extract_strided_slice %117 {offsets = [2, 0, 0], sizes = [1, 8, 32], strides = [1, 1, 1]} : vector<4x8x32xf32> to vector<1x8x32xf32>
    %129 = vector.shape_cast %128 : vector<1x8x32xf32> to vector<8x32xf32>
    %c0_33 = arith.constant 0 : index
    %c2 = arith.constant 2 : index
    %c0_34 = arith.constant 0 : index
    %130 = vector.load %arg21[%c0_33, %c2, %c0_34] : memref<8x4x32xf32, #tpu.memory_space<vmem>>, vector<8x1x32xf32>
    %131 = vector.shape_cast %130 : vector<8x1x32xf32> to vector<8x32xf32>
    %132 = vector.shape_cast %129 : vector<8x32xf32> to vector<8x1x32xf32>
    tpu.vector_store %arg21[%c0_33, %c2, %c0_34], %132 {strides = array<i32>} : memref<8x4x32xf32, #tpu.memory_space<vmem>>, vector<8x1x32xf32>,
    %133 = vector.extract_strided_slice %117 {offsets = [3, 0, 0], sizes = [1, 8, 32], strides = [1, 1, 1]} : vector<4x8x32xf32> to vector<1x8x32xf32>
    %134 = vector.shape_cast %133 : vector<1x8x32xf32> to vector<8x32xf32>
    %c0_35 = arith.constant 0 : index
    %c3 = arith.constant 3 : index
    %c0_36 = arith.constant 0 : index
    %135 = vector.load %arg21[%c0_35, %c3, %c0_36] : memref<8x4x32xf32, #tpu.memory_space<vmem>>, vector<8x1x32xf32>
    %136 = vector.shape_cast %135 : vector<8x1x32xf32> to vector<8x32xf32>
    %137 = vector.shape_cast %134 : vector<8x32xf32> to vector<8x1x32xf32>
    tpu.vector_store %arg21[%c0_35, %c3, %c0_36], %137 {strides = array<i32>} : memref<8x4x32xf32, #tpu.memory_space<vmem>>, vector<8x1x32xf32>,
    %c0_37 = arith.constant 0 : index
    %c0_38 = arith.constant 0 : index
    %c0_39 = arith.constant 0 : index
    %138 = vector.load %arg21[%c0_37, %c0_38, %c0_39] : memref<8x4x32xf32, #tpu.memory_space<vmem>>, vector<8x4x32xf32>
    %c0_40 = arith.constant 0 : index
    %c0_41 = arith.constant 0 : index
    %139 = vector.load %arg8[%c0_40, %c0_41] : memref<32x96xbf16, #tpu.memory_space<vmem>>, vector<32x96xbf16>
    %c0_42 = arith.constant 0 : index
    %c0_43 = arith.constant 0 : index
    %140 = vector.load %arg9[%c0_42, %c0_43] : memref<1x96xf32, #tpu.memory_space<vmem>>, vector<1x96xf32>
    %c0_44 = arith.constant 0 : index
    %c0_45 = arith.constant 0 : index
    %141 = vector.load %arg10[%c0_44, %c0_45] : memref<32x32xbf16, #tpu.memory_space<vmem>>, vector<32x32xbf16>
    %142 = vector.shape_cast %138 : vector<8x4x32xf32> to vector<32x32xf32>
    %143 = arith.truncf %142 : vector<32x32xf32> to vector<32x32xbf16>
    %cst_46 = arith.constant dense<0.000000e+00> : vector<32x96xf32>
    %144 = tpu.matmul %143, %139, %cst_46 {dimension_numbers = #tpu.dot_dimension_numbers<[1], [0], [0], [1], [0, 0, 1, 1], [], []>} : vector<32x32xbf16>, vector<32x96xbf16>, vector<32x96xf32> -> vector<32x96xf32>
    %145 = vector.broadcast %140 : vector<1x96xf32> to vector<32x96xf32>
    %146 = arith.addf %144, %145 : vector<32x96xf32>
    %147 = arith.truncf %146 : vector<32x96xf32> to vector<32x96xbf16>
    %148 = vector.extract_strided_slice %147 {offsets = [0, 0], sizes = [32, 8], strides = [1, 1]} : vector<32x96xbf16> to vector<32x8xbf16>
    %149 = vector.shape_cast %148 : vector<32x8xbf16> to vector<1x8x4x8xbf16>
    %150 = vector.extract_strided_slice %147 {offsets = [0, 8], sizes = [32, 8], strides = [1, 1]} : vector<32x96xbf16> to vector<32x8xbf16>
    %151 = vector.shape_cast %150 : vector<32x8xbf16> to vector<1x8x4x8xbf16>
    %152 = vector.extract_strided_slice %147 {offsets = [0, 16], sizes = [32, 8], strides = [1, 1]} : vector<32x96xbf16> to vector<32x8xbf16>
    %153 = vector.shape_cast %152 : vector<32x8xbf16> to vector<1x8x4x8xbf16>
    %154 = vector.extract_strided_slice %147 {offsets = [0, 24], sizes = [32, 8], strides = [1, 1]} : vector<32x96xbf16> to vector<32x8xbf16>
    %155 = vector.shape_cast %154 : vector<32x8xbf16> to vector<1x8x4x8xbf16>
    %156 = tpu.concatenate %149, %151, %153, %155 in 0 : vector<1x8x4x8xbf16>, vector<1x8x4x8xbf16>, vector<1x8x4x8xbf16>, vector<1x8x4x8xbf16> -> vector<4x8x4x8xbf16>
    %157 = vector.shape_cast %156 : vector<4x8x4x8xbf16> to vector<32x4x8xbf16>
    %158 = vector.extract_strided_slice %147 {offsets = [0, 32], sizes = [32, 8], strides = [1, 1]} : vector<32x96xbf16> to vector<32x8xbf16>
    %159 = vector.shape_cast %158 : vector<32x8xbf16> to vector<1x8x4x8xbf16>
    %160 = vector.extract_strided_slice %147 {offsets = [0, 40], sizes = [32, 8], strides = [1, 1]} : vector<32x96xbf16> to vector<32x8xbf16>
    %161 = vector.shape_cast %160 : vector<32x8xbf16> to vector<1x8x4x8xbf16>
    %162 = vector.extract_strided_slice %147 {offsets = [0, 48], sizes = [32, 8], strides = [1, 1]} : vector<32x96xbf16> to vector<32x8xbf16>
    %163 = vector.shape_cast %162 : vector<32x8xbf16> to vector<1x8x4x8xbf16>
    %164 = vector.extract_strided_slice %147 {offsets = [0, 56], sizes = [32, 8], strides = [1, 1]} : vector<32x96xbf16> to vector<32x8xbf16>
    %165 = vector.shape_cast %164 : vector<32x8xbf16> to vector<1x8x4x8xbf16>
    %166 = tpu.concatenate %159, %161, %163, %165 in 0 : vector<1x8x4x8xbf16>, vector<1x8x4x8xbf16>, vector<1x8x4x8xbf16>, vector<1x8x4x8xbf16> -> vector<4x8x4x8xbf16>
    %167 = vector.shape_cast %166 : vector<4x8x4x8xbf16> to vector<32x4x8xbf16>
    %168 = vector.extract_strided_slice %147 {offsets = [0, 64], sizes = [32, 8], strides = [1, 1]} : vector<32x96xbf16> to vector<32x8xbf16>
    %169 = vector.shape_cast %168 : vector<32x8xbf16> to vector<1x8x4x8xbf16>
    %170 = vector.extract_strided_slice %147 {offsets = [0, 72], sizes = [32, 8], strides = [1, 1]} : vector<32x96xbf16> to vector<32x8xbf16>
    %171 = vector.shape_cast %170 : vector<32x8xbf16> to vector<1x8x4x8xbf16>
    %172 = vector.extract_strided_slice %147 {offsets = [0, 80], sizes = [32, 8], strides = [1, 1]} : vector<32x96xbf16> to vector<32x8xbf16>
    %173 = vector.shape_cast %172 : vector<32x8xbf16> to vector<1x8x4x8xbf16>
    %174 = vector.extract_strided_slice %147 {offsets = [0, 88], sizes = [32, 8], strides = [1, 1]} : vector<32x96xbf16> to vector<32x8xbf16>
    %175 = vector.shape_cast %174 : vector<32x8xbf16> to vector<1x8x4x8xbf16>
    %176 = tpu.concatenate %169, %171, %173, %175 in 0 : vector<1x8x4x8xbf16>, vector<1x8x4x8xbf16>, vector<1x8x4x8xbf16>, vector<1x8x4x8xbf16> -> vector<4x8x4x8xbf16>
    %177 = vector.shape_cast %176 : vector<4x8x4x8xbf16> to vector<32x4x8xbf16>
    %cst_47 = arith.constant dense<0.000000e+00> : vector<32x4x4xf32>
    %178 = tpu.matmul %157, %167, %cst_47 {dimension_numbers = #tpu.dot_dimension_numbers<[2], [2], [1], [1], [0, 0, 0, 1, 1, 1], [0], [0]>} : vector<32x4x8xbf16>, vector<32x4x8xbf16>, vector<32x4x4xf32> -> vector<32x4x4xf32>
    %cst_48 = arith.constant dense<0xFF800000> : vector<32x4xf32>
    %179 = vector.multi_reduction <maximumf>, %178, %cst_48 [2] : vector<32x4x4xf32> to vector<32x4xf32>
    %180 = vector.shape_cast %179 : vector<32x4xf32> to vector<32x4x1xf32>
    %181 = vector.broadcast %180 : vector<32x4x1xf32> to vector<32x4x4xf32>
    %182 = arith.subf %178, %181 : vector<32x4x4xf32>
    %183 = math.exp %182 : vector<32x4x4xf32>
    %cst_49 = arith.constant dense<0.000000e+00> : vector<32x4xf32>
    %184 = vector.multi_reduction <add>, %183, %cst_49 [2] : vector<32x4x4xf32> to vector<32x4xf32>
    %185 = vector.shape_cast %184 : vector<32x4xf32> to vector<32x4x1xf32>
    %186 = tpu.reciprocal %185 {approx = true} : vector<32x4x1xf32> -> vector<32x4x1xf32>
    %187 = vector.broadcast %186 : vector<32x4x1xf32> to vector<32x4x4xf32>
    %188 = arith.mulf %183, %187 : vector<32x4x4xf32>
    %189 = arith.truncf %188 : vector<32x4x4xf32> to vector<32x4x4xbf16>
    %cst_50 = arith.constant dense<0.000000e+00> : vector<32x4x8xf32>
    %190 = tpu.matmul %189, %177, %cst_50 {dimension_numbers = #tpu.dot_dimension_numbers<[2], [1], [1], [2], [0, 0, 0, 1, 1, 2], [0], [0]>} : vector<32x4x4xbf16>, vector<32x4x8xbf16>, vector<32x4x8xf32> -> vector<32x4x8xf32>
    %191 = vector.extract_strided_slice %190 {offsets = [0, 0, 0], sizes = [8, 4, 8], strides = [1, 1, 1]} : vector<32x4x8xf32> to vector<8x4x8xf32>
    %192 = vector.shape_cast %191 : vector<8x4x8xf32> to vector<32x8xf32>
    %193 = arith.truncf %192 : vector<32x8xf32> to vector<32x8xbf16>
    %194 = vector.extract_strided_slice %141 {offsets = [0, 0], sizes = [8, 32], strides = [1, 1]} : vector<32x32xbf16> to vector<8x32xbf16>
    %cst_51 = arith.constant dense<0.000000e+00> : vector<32x32xf32>
    %195 = tpu.matmul %193, %194, %cst_51 {dimension_numbers = #tpu.dot_dimension_numbers<[1], [0], [0], [1], [0, 0, 1, 1], [], []>} : vector<32x8xbf16>, vector<8x32xbf16>, vector<32x32xf32> -> vector<32x32xf32>
    %196 = vector.extract_strided_slice %190 {offsets = [8, 0, 0], sizes = [8, 4, 8], strides = [1, 1, 1]} : vector<32x4x8xf32> to vector<8x4x8xf32>
    %197 = vector.shape_cast %196 : vector<8x4x8xf32> to vector<32x8xf32>
    %198 = arith.truncf %197 : vector<32x8xf32> to vector<32x8xbf16>
    %199 = vector.extract_strided_slice %141 {offsets = [8, 0], sizes = [8, 32], strides = [1, 1]} : vector<32x32xbf16> to vector<8x32xbf16>
    %cst_52 = arith.constant dense<0.000000e+00> : vector<32x32xf32>
    %200 = tpu.matmul %198, %199, %cst_52 {dimension_numbers = #tpu.dot_dimension_numbers<[1], [0], [0], [1], [0, 0, 1, 1], [], []>} : vector<32x8xbf16>, vector<8x32xbf16>, vector<32x32xf32> -> vector<32x32xf32>
    %201 = arith.addf %195, %200 : vector<32x32xf32>
    %202 = vector.extract_strided_slice %190 {offsets = [16, 0, 0], sizes = [8, 4, 8], strides = [1, 1, 1]} : vector<32x4x8xf32> to vector<8x4x8xf32>
    %203 = vector.shape_cast %202 : vector<8x4x8xf32> to vector<32x8xf32>
    %204 = arith.truncf %203 : vector<32x8xf32> to vector<32x8xbf16>
    %205 = vector.extract_strided_slice %141 {offsets = [16, 0], sizes = [8, 32], strides = [1, 1]} : vector<32x32xbf16> to vector<8x32xbf16>
    %cst_53 = arith.constant dense<0.000000e+00> : vector<32x32xf32>
    %206 = tpu.matmul %204, %205, %cst_53 {dimension_numbers = #tpu.dot_dimension_numbers<[1], [0], [0], [1], [0, 0, 1, 1], [], []>} : vector<32x8xbf16>, vector<8x32xbf16>, vector<32x32xf32> -> vector<32x32xf32>
    %207 = arith.addf %201, %206 : vector<32x32xf32>
    %208 = vector.extract_strided_slice %190 {offsets = [24, 0, 0], sizes = [8, 4, 8], strides = [1, 1, 1]} : vector<32x4x8xf32> to vector<8x4x8xf32>
    %209 = vector.shape_cast %208 : vector<8x4x8xf32> to vector<32x8xf32>
    %210 = arith.truncf %209 : vector<32x8xf32> to vector<32x8xbf16>
    %211 = vector.extract_strided_slice %141 {offsets = [24, 0], sizes = [8, 32], strides = [1, 1]} : vector<32x32xbf16> to vector<8x32xbf16>
    %cst_54 = arith.constant dense<0.000000e+00> : vector<32x32xf32>
    %212 = tpu.matmul %210, %211, %cst_54 {dimension_numbers = #tpu.dot_dimension_numbers<[1], [0], [0], [1], [0, 0, 1, 1], [], []>} : vector<32x8xbf16>, vector<8x32xbf16>, vector<32x32xf32> -> vector<32x32xf32>
    %213 = arith.addf %207, %212 : vector<32x32xf32>
    %214 = vector.shape_cast %138 : vector<8x4x32xf32> to vector<32x32xf32>
    %215 = arith.addf %214, %213 : vector<32x32xf32>
    %c0_55 = arith.constant 0 : index
    %c0_56 = arith.constant 0 : index
    %216 = vector.load %arg11[%c0_55, %c0_56] : memref<1x32xf32, #tpu.memory_space<vmem>>, vector<1x32xf32>
    %217 = vector.broadcast %216 : vector<1x32xf32> to vector<32x32xf32>
    %218 = arith.addf %215, %217 : vector<32x32xf32>
    %c0_57 = arith.constant 0 : index
    %c0_58 = arith.constant 0 : index
    %219 = vector.load %arg12[%c0_57, %c0_58] : memref<1x32xf32, #tpu.memory_space<vmem>>, vector<1x32xf32>
    %c0_59 = arith.constant 0 : index
    %c0_60 = arith.constant 0 : index
    %220 = vector.load %arg13[%c0_59, %c0_60] : memref<1x32xf32, #tpu.memory_space<vmem>>, vector<1x32xf32>
    %cst_61 = arith.constant dense<0.000000e+00> : vector<32xf32>
    %221 = vector.multi_reduction <add>, %218, %cst_61 [1] : vector<32x32xf32> to vector<32xf32>
    %222 = vector.shape_cast %221 : vector<32xf32> to vector<32x1xf32>
    %cst_62 = arith.constant 3.200000e+01 : f32
    %223 = vector.broadcast %cst_62 : f32 to vector<32x1xf32>
    %224 = arith.divf %222, %223 : vector<32x1xf32>
    %225 = vector.broadcast %224 : vector<32x1xf32> to vector<32x32xf32>
    %226 = arith.subf %218, %225 : vector<32x32xf32>
    %227 = arith.mulf %226, %226 : vector<32x32xf32>
    %cst_63 = arith.constant dense<0.000000e+00> : vector<32xf32>
    %228 = vector.multi_reduction <add>, %227, %cst_63 [1] : vector<32x32xf32> to vector<32xf32>
    %229 = vector.shape_cast %228 : vector<32xf32> to vector<32x1xf32>
    %cst_64 = arith.constant 3.200000e+01 : f32
    %230 = vector.broadcast %cst_64 : f32 to vector<32x1xf32>
    %231 = arith.divf %229, %230 : vector<32x1xf32>
    %cst_65 = arith.constant 9.99999974E-6 : f32
    %232 = vector.broadcast %cst_65 : f32 to vector<32x1xf32>
    %233 = arith.addf %231, %232 : vector<32x1xf32>
    %234 = math.rsqrt %233 : vector<32x1xf32>
    %235 = vector.broadcast %234 : vector<32x1xf32> to vector<32x32xf32>
    %236 = arith.mulf %226, %235 : vector<32x32xf32>
    %237 = vector.broadcast %219 : vector<1x32xf32> to vector<32x32xf32>
    %238 = arith.mulf %236, %237 : vector<32x32xf32>
    %239 = vector.broadcast %220 : vector<1x32xf32> to vector<32x32xf32>
    %240 = arith.addf %238, %239 : vector<32x32xf32>
    %241 = arith.truncf %240 : vector<32x32xf32> to vector<32x32xbf16>
    %c0_66 = arith.constant 0 : index
    %c0_67 = arith.constant 0 : index
    %242 = vector.load %arg14[%c0_66, %c0_67] : memref<32x64xbf16, #tpu.memory_space<vmem>>, vector<32x64xbf16>
    %cst_68 = arith.constant dense<0.000000e+00> : vector<32x64xf32>
    %243 = tpu.matmul %241, %242, %cst_68 {dimension_numbers = #tpu.dot_dimension_numbers<[1], [0], [0], [1], [0, 0, 1, 1], [], []>} : vector<32x32xbf16>, vector<32x64xbf16>, vector<32x64xf32> -> vector<32x64xf32>
    %c0_69 = arith.constant 0 : index
    %c0_70 = arith.constant 0 : index
    %244 = vector.load %arg15[%c0_69, %c0_70] : memref<1x64xf32, #tpu.memory_space<vmem>>, vector<1x64xf32>
    %245 = vector.broadcast %244 : vector<1x64xf32> to vector<32x64xf32>
    %246 = arith.addf %243, %245 : vector<32x64xf32>
    %cst_71 = arith.constant 0.000000e+00 : f32
    %247 = vector.broadcast %cst_71 : f32 to vector<32x64xf32>
    %248 = arith.maximumf %246, %247 : vector<32x64xf32>
    %249 = arith.truncf %248 : vector<32x64xf32> to vector<32x64xbf16>
    %c0_72 = arith.constant 0 : index
    %c0_73 = arith.constant 0 : index
    %250 = vector.load %arg16[%c0_72, %c0_73] : memref<64x32xbf16, #tpu.memory_space<vmem>>, vector<64x32xbf16>
    %cst_74 = arith.constant dense<0.000000e+00> : vector<32x32xf32>
    %251 = tpu.matmul %249, %250, %cst_74 {dimension_numbers = #tpu.dot_dimension_numbers<[1], [0], [0], [1], [0, 0, 1, 1], [], []>} : vector<32x64xbf16>, vector<64x32xbf16>, vector<32x32xf32> -> vector<32x32xf32>
    %c0_75 = arith.constant 0 : index
    %c0_76 = arith.constant 0 : index
    %252 = vector.load %arg17[%c0_75, %c0_76] : memref<1x32xf32, #tpu.memory_space<vmem>>, vector<1x32xf32>
    %253 = vector.broadcast %252 : vector<1x32xf32> to vector<32x32xf32>
    %254 = arith.addf %251, %253 : vector<32x32xf32>
    %255 = arith.addf %240, %254 : vector<32x32xf32>
    %c0_77 = arith.constant 0 : index
    %c0_78 = arith.constant 0 : index
    %256 = vector.load %arg18[%c0_77, %c0_78] : memref<1x32xf32, #tpu.memory_space<vmem>>, vector<1x32xf32>
    %c0_79 = arith.constant 0 : index
    %c0_80 = arith.constant 0 : index
    %257 = vector.load %arg19[%c0_79, %c0_80] : memref<1x32xf32, #tpu.memory_space<vmem>>, vector<1x32xf32>
    %cst_81 = arith.constant dense<0.000000e+00> : vector<32xf32>
    %258 = vector.multi_reduction <add>, %255, %cst_81 [1] : vector<32x32xf32> to vector<32xf32>
    %259 = vector.shape_cast %258 : vector<32xf32> to vector<32x1xf32>
    %cst_82 = arith.constant 3.200000e+01 : f32
    %260 = vector.broadcast %cst_82 : f32 to vector<32x1xf32>
    %261 = arith.divf %259, %260 : vector<32x1xf32>
    %262 = vector.broadcast %261 : vector<32x1xf32> to vector<32x32xf32>
    %263 = arith.subf %255, %262 : vector<32x32xf32>
    %264 = arith.mulf %263, %263 : vector<32x32xf32>
    %cst_83 = arith.constant dense<0.000000e+00> : vector<32xf32>
    %265 = vector.multi_reduction <add>, %264, %cst_83 [1] : vector<32x32xf32> to vector<32xf32>
    %266 = vector.shape_cast %265 : vector<32xf32> to vector<32x1xf32>
    %cst_84 = arith.constant 3.200000e+01 : f32
    %267 = vector.broadcast %cst_84 : f32 to vector<32x1xf32>
    %268 = arith.divf %266, %267 : vector<32x1xf32>
    %cst_85 = arith.constant 9.99999974E-6 : f32
    %269 = vector.broadcast %cst_85 : f32 to vector<32x1xf32>
    %270 = arith.addf %268, %269 : vector<32x1xf32>
    %271 = math.rsqrt %270 : vector<32x1xf32>
    %272 = vector.broadcast %271 : vector<32x1xf32> to vector<32x32xf32>
    %273 = arith.mulf %263, %272 : vector<32x32xf32>
    %274 = vector.broadcast %256 : vector<1x32xf32> to vector<32x32xf32>
    %275 = arith.mulf %273, %274 : vector<32x32xf32>
    %276 = vector.broadcast %257 : vector<1x32xf32> to vector<32x32xf32>
    %277 = arith.addf %275, %276 : vector<32x32xf32>
    %278 = vector.shape_cast %277 : vector<32x32xf32> to vector<1x8x4x32xf32>
    %c0_86 = arith.constant 0 : index
    %c0_87 = arith.constant 0 : index
    %c0_88 = arith.constant 0 : index
    %c0_89 = arith.constant 0 : index
    %279 = vector.load %arg20[%c0_86, %c0_87, %c0_88, %c0_89] : memref<1x8x4x32xf32, #tpu.memory_space<vmem>>, vector<1x8x4x32xf32>
    tpu.vector_store %arg20[%c0_86, %c0_87, %c0_88, %c0_89], %278 {strides = array<i32>} : memref<1x8x4x32xf32, #tpu.memory_space<vmem>>, vector<1x8x4x32xf32>,
    return
  }
  func.func @transform_0(%arg0: i32) -> (i32, i32, i32, i32) {
    %c0_i32 = arith.constant 0 : i32
    %c0_i32_0 = arith.constant 0 : i32
    %c0_i32_1 = arith.constant 0 : i32
    %c0_i32_2 = arith.constant 0 : i32
    return %arg0, %c0_i32, %c0_i32_0, %c0_i32_1 : i32, i32, i32, i32
  }
  func.func @transform_1(%arg0: i32) -> (i32, i32) {
    %c0_i32 = arith.constant 0 : i32
    %c0_i32_0 = arith.constant 0 : i32
    %c0_i32_1 = arith.constant 0 : i32
    return %c0_i32, %c0_i32_0 : i32, i32
  }
  func.func @transform_2(%arg0: i32) -> (i32, i32) {
    %c0_i32 = arith.constant 0 : i32
    %c0_i32_0 = arith.constant 0 : i32
    %c0_i32_1 = arith.constant 0 : i32
    return %c0_i32, %c0_i32_0 : i32, i32
  }
  func.func @transform_3(%arg0: i32) -> (i32, i32) {
    %c0_i32 = arith.constant 0 : i32
    %c0_i32_0 = arith.constant 0 : i32
    %c0_i32_1 = arith.constant 0 : i32
    return %c0_i32, %c0_i32_0 : i32, i32
  }
  func.func @transform_4(%arg0: i32) -> (i32, i32) {
    %c0_i32 = arith.constant 0 : i32
    %c0_i32_0 = arith.constant 0 : i32
    %c0_i32_1 = arith.constant 0 : i32
    return %c0_i32, %c0_i32_0 : i32, i32
  }
  func.func @transform_5(%arg0: i32) -> (i32, i32) {
    %c0_i32 = arith.constant 0 : i32
    %c0_i32_0 = arith.constant 0 : i32
    %c0_i32_1 = arith.constant 0 : i32
    return %c0_i32, %c0_i32_0 : i32, i32
  }
  func.func @transform_6(%arg0: i32) -> (i32, i32) {
    %c0_i32 = arith.constant 0 : i32
    %c0_i32_0 = arith.constant 0 : i32
    %c0_i32_1 = arith.constant 0 : i32
    return %c0_i32, %c0_i32_0 : i32, i32
  }
  func.func @transform_7(%arg0: i32) -> (i32, i32) {
    %c0_i32 = arith.constant 0 : i32
    %c0_i32_0 = arith.constant 0 : i32
    %c0_i32_1 = arith.constant 0 : i32
    return %c0_i32, %c0_i32_0 : i32, i32
  }
  func.func @transform_8(%arg0: i32) -> (i32, i32) {
    %c0_i32 = arith.constant 0 : i32
    %c0_i32_0 = arith.constant 0 : i32
    %c0_i32_1 = arith.constant 0 : i32
    return %c0_i32, %c0_i32_0 : i32, i32
  }
  func.func @transform_9(%arg0: i32) -> (i32, i32) {
    %c0_i32 = arith.constant 0 : i32
    %c0_i32_0 = arith.constant 0 : i32
    %c0_i32_1 = arith.constant 0 : i32
    return %c0_i32, %c0_i32_0 : i32, i32
  }
  func.func @transform_10(%arg0: i32) -> (i32, i32) {
    %c0_i32 = arith.constant 0 : i32
    %c0_i32_0 = arith.constant 0 : i32
    %c0_i32_1 = arith.constant 0 : i32
    return %c0_i32, %c0_i32_0 : i32, i32
  }
  func.func @transform_11(%arg0: i32) -> (i32, i32) {
    %c0_i32 = arith.constant 0 : i32
    %c0_i32_0 = arith.constant 0 : i32
    %c0_i32_1 = arith.constant 0 : i32
    return %c0_i32, %c0_i32_0 : i32, i32
  }
  func.func @transform_12(%arg0: i32) -> (i32, i32) {
    %c0_i32 = arith.constant 0 : i32
    %c0_i32_0 = arith.constant 0 : i32
    %c0_i32_1 = arith.constant 0 : i32
    return %c0_i32, %c0_i32_0 : i32, i32
  }
  func.func @transform_13(%arg0: i32) -> (i32, i32) {
    %c0_i32 = arith.constant 0 : i32
    %c0_i32_0 = arith.constant 0 : i32
    %c0_i32_1 = arith.constant 0 : i32
    return %c0_i32, %c0_i32_0 : i32, i32
  }
  func.func @transform_14(%arg0: i32) -> (i32, i32) {
    %c0_i32 = arith.constant 0 : i32
    %c0_i32_0 = arith.constant 0 : i32
    %c0_i32_1 = arith.constant 0 : i32
    return %c0_i32, %c0_i32_0 : i32, i32
  }
  func.func @transform_15(%arg0: i32) -> (i32, i32) {
    %c0_i32 = arith.constant 0 : i32
    %c0_i32_0 = arith.constant 0 : i32
    %c0_i32_1 = arith.constant 0 : i32
    return %c0_i32, %c0_i32_0 : i32, i32
  }
  func.func @transform_16(%arg0: i32) -> (i32, i32) {
    %c0_i32 = arith.constant 0 : i32
    %c0_i32_0 = arith.constant 0 : i32
    %c0_i32_1 = arith.constant 0 : i32
    return %c0_i32, %c0_i32_0 : i32, i32
  }
  func.func @transform_17(%arg0: i32) -> (i32, i32) {
    %c0_i32 = arith.constant 0 : i32
    %c0_i32_0 = arith.constant 0 : i32
    %c0_i32_1 = arith.constant 0 : i32
    return %c0_i32, %c0_i32_0 : i32, i32
  }
  func.func @transform_18(%arg0: i32) -> (i32, i32) {
    %c0_i32 = arith.constant 0 : i32
    %c0_i32_0 = arith.constant 0 : i32
    %c0_i32_1 = arith.constant 0 : i32
    return %c0_i32, %c0_i32_0 : i32, i32
  }
  func.func @transform_19(%arg0: i32) -> (i32, i32, i32, i32) {
    %c0_i32 = arith.constant 0 : i32
    %c0_i32_0 = arith.constant 0 : i32
    %c0_i32_1 = arith.constant 0 : i32
    %c0_i32_2 = arith.constant 0 : i32
    return %arg0, %c0_i32, %c0_i32_0, %c0_i32_1 : i32, i32, i32, i32
  }
}

</mosaic_0001>

<bundles_post_ra>
// kernel: a_call__.1
= control target key start
LH: loop header
LB: loop body
LE: loop exit
PB: predicated region body
PF: predicated region fallthrough
CT: control target
= control target key end

     0   :  { %s9558_s0 = inlined_call_operand.hbm [shape: f32[2,8,4,32], index: 0, kind: input, shape index: {}]   ;;  %s9559_s1 = inlined_call_operand.hbm [shape: bf16[32,96], index: 1, kind: input, shape index: {}]   ;;  %s9560_s2 = inlined_call_operand.vmem [shape: f32[1,96], index: 2, kind: input, shape index: {}]   ;;  %s9561_s3 = inlined_call_operand.hbm [shape: bf16[32,32], index: 3, kind: input, shape index: {}]   ;;  %s9562_s4 = inlined_call_operand.vmem [shape: f32[1,32], index: 4, kind: input, shape index: {}]   ;;  %s9563_s5 = inlined_call_operand.vmem [shape: f32[1,32], index: 5, kind: input, shape index: {}, may-alias: {5,11,17}]   ;;  %s9564_s6 = inlined_call_operand.vmem [shape: f32[1,32], index: 6, kind: input, shape index: {}, may-alias: {6,12,18}]   ;;  %s9565_s7 = inlined_call_operand.hbm [shape: bf16[32,96], index: 7, kind: input, shape index: {}]   ;;  %s9566_s8 = inlined_call_operand.vmem [shape: f32[1,96], index: 8, kind: input, shape index: {}]   ;;  %s9567_s9 = inlined_call_operand.hbm [shape: bf16[32,32], index: 9, kind: input, shape index: {}]   ;;  %s9568_s10 = inlined_call_operand.vmem [shape: f32[1,32], index: 10, kind: input, shape index: {}]   ;;  %s9569_s11 = inlined_call_operand.vmem [shape: f32[1,32], index: 11, kind: input, shape index: {}, may-alias: {5,11,17}]   ;;  %s9570_s12 = inlined_call_operand.vmem [shape: f32[1,32], index: 12, kind: input, shape index: {}, may-alias: {6,12,18}]   ;;  %s9571_s13 = inlined_call_operand.hbm [shape: bf16[32,64], index: 13, kind: input, shape index: {}]   ;;  %s9572_s14 = inlined_call_operand.vmem [shape: f32[1,64], index: 14, kind: input, shape index: {}]   ;;  %s9573_s15 = inlined_call_operand.hbm [shape: bf16[64,32], index: 15, kind: input, shape index: {}]   ;;  %s9574_s16 = inlined_call_operand.vmem [shape: f32[1,32], index: 16, kind: input, shape index: {}]   ;;  %s9575_s17 = inlined_call_operand.vmem [shape: f32[1,32], index: 17, kind: input, shape index: {}, may-alias: {5,11,17}]   ;;  %s9576_s18 = inlined_call_operand.vmem [shape: f32[1,32], index: 18, kind: input, shape index: {}, may-alias: {6,12,18}]   ;;  %s9577_s19 = inlined_call_operand.hbm [shape: f32[2,8,4,32], index: 19, kind: output, shape index: {}]  }
   0x1   :  { %9590 = sst [smem:[#allocation28_spill]] %s9558_s0 }
   0x2   :  { %9591 = sst [smem:[#allocation29_spill]] %s9559_s1 }
   0x3   :  { %9592 = sst [smem:[#allocation30_spill]] %s9560_s2 }
   0x4   :  { %9593 = sst [smem:[#allocation31_spill]] %s9561_s3 }
   0x5   :  { %9594 = sst [smem:[#allocation32_spill]] %s9565_s7 }
   0x6   :  { %9595 = sst [smem:[#allocation33_spill]] %s9567_s9 }
   0x7   :  { %9596 = sst [smem:[#allocation34_spill]] %s9571_s13 }
   0x8   :  { %9597 = sst [smem:[#allocation35_spill]] %s9573_s15 }
   0x9   :  { %9598 = sst [smem:[#allocation36_spill]] %s9574_s16 }
   0xa   :  { %9599 = sst [smem:[#allocation37_spill]] %s9575_s17 }
   0xb   :  { %9600 = sst [smem:[#allocation38_spill]] %s9576_s18 }
   0xc   :  { %9601 = sst [smem:[#allocation39_spill]] %s9577_s19 }
   0xd   :  { %24 = vsyncpa [#allocation4], 0 }
   0xe   :  { %26 = vsyncpa [#allocation4 + $0x1], 0 }
   0xf   :  { %27 = vsyncpa [#allocation7], 0 }
  0x10   :  { %28 = vsyncpa [#allocation10], 0 }
  0x11   :  { %29 = vsyncpa [#allocation13], 0 }
  0x12   :  { %30 = vsyncpa [#allocation5], 0 }
  0x13   :  { %32 = vsyncpa [#allocation5 + $0x1], 0  ;;  %s7008_s0 = smov 0   ;;  %s7010_s30 = smov 0  }
  0x14   :  { %s7012_s20 = smov 0   ;;  %s7014_s21 = smov 0  }
  0x15 LB: > { %9602 = sst [smem:[#allocation21_spill]] %s6885_s20  ;;  %s7032_s24 = sadd.s32 4294967295, %s6889_s21   ;;  %s6889_s21 = sphi %s7014_s21, %s9635_s21   ;;  %s6885_s20 = sphi %s7012_s20, %s9637_s20   ;;  %s6881_s30 = sphi %s7010_s30, %s9639_s30   ;;  %s6877_s0 = sphi %s7008_s0, %s9638_s0  }
  0x16   : > { %s9603_s2 = sld [smem:[#allocation29_spill]]  ;;  %p6046_p0 = scmp.ge.s32.totalorder %s6889_s21, 1 }
  0x17   : > { %p59_p1 = scmp.eq.s32.totalorder %s7032_s24, 0  ;;  %p473_p2 = scmp.lt.s32.totalorder %s6889_s21, 3 }
  0x18   : > { %s6891_s3 = smov [#allocation6]   ;;  %s9605_s7 = sld [smem:[#allocation32_spill]] }
  0x19   : > { %p7037_p3 = pnand %p6046_p0, %p473_p2  ;;  %s486_s26 = sshll.u32 %s6891_s3, 4  ;;  %s487_s26 = int_to_ptr.vmem [resolvable:$true] %s486_s26 }
  0x1a   : > { %s9607_s13 = sld [smem:[#allocation34_spill]]  ;;  %s6892_s19 = smov [#allocation9]  }
  0x1b   : > { %p6273_p4 = pneg %p7037_p3  ;;  %s526_s18 = sshll.u32 %s6892_s19, 4  ;;  %s527_s18 = int_to_ptr.vmem [resolvable:$true] %s526_s18 }
  0x1c   : > { %s484_s23 = sshll.u32 %s9603_s2, 4  ;;  %s9580_s17 = smov 64   ;;  %s485_s23 = int_to_ptr.hbm [resolvable:$true] %s484_s23 }
  0x1d   : > { %p7049_p6 = pnand %p6273_p4, %p59_p1  ;;  %s9581_s16 = smov 4  }
  0x1e   : > { %s524_s29 = sshll.u32 %s9605_s7, 4  ;;  %s9608_s22 = sld [smem:[#allocation31_spill]]  ;;  %s525_s29 = int_to_ptr.hbm [resolvable:$true] %s524_s29 }
  0x1f   : > { %6276 = dma.hbm_to_vmem [thread:$0]  (!%p7049_p6), %s485_s23, 256, %s487_s26, [#allocation7], %s9580_s17, %s9580_s17, %s9581_s16  }
  0x20   : > { %s564_s3 = sshll.u32 %s9607_s13, 4  ;;  %s6895_s19 = smov [#allocation12]   ;;  %s565_s3 = int_to_ptr.hbm [resolvable:$true] %s564_s3 }
  0x21   : > { %6282 = dma.hbm_to_vmem [thread:$0]  (!%p7049_p6), %s525_s29, 256, %s527_s18, [#allocation10], %s9580_s17, %s9580_s17, %s9581_s16  }
  0x22   : > { %s566_s7 = sshll.u32 %s6895_s19, 4  ;;  %s6896_s23 = smov [#allocation8]   ;;  %s567_s7 = int_to_ptr.vmem [resolvable:$true] %s566_s7 }
  0x23   : > { %6288 = dma.hbm_to_vmem [thread:$0]  (!%p7049_p6), %s565_s3, 256, %s567_s7, [#allocation13], %s9580_s17, %s9580_s17, %s9581_s16  }
  0x24   : > { %s501_s2 = sshll.u32 %s9608_s22, 4  ;;  %s503_s26 = sshll.u32 %s6896_s23, 4  ;;  %s502_s2 = int_to_ptr.hbm [resolvable:$true] %s501_s2  ;;  %s504_s26 = int_to_ptr.vmem [resolvable:$true] %s503_s26 }
  0x25   : > { %s9609_s9 = sld [smem:[#allocation33_spill]]  ;;  %s6897_s28 = smov [#allocation11]  }
  0x26   : > { %6279 = dma.hbm_to_vmem [thread:$0]  (!%p7049_p6), %s502_s2, 256, %s504_s26, [#allocation7], %s9580_s17, %s9580_s17, %s9581_s16  }
  0x27   : > { %s9610_s15 = sld [smem:[#allocation35_spill]]  ;;  %s543_s13 = sshll.u32 %s6897_s28, 4  ;;  %s544_s13 = int_to_ptr.vmem [resolvable:$true] %s543_s13 }
  0x28   : > { %s6898_s22 = smov [#allocation14]   ;;  %s6045_s19 = sadd.s32 4294967294, %s6889_s21  }
  0x29   : > { %s583_s2 = sshll.u32 %s6898_s22, 4  ;;  %s7097_s23 = sadd.s32 1, %s6889_s21   ;;  %s584_s2 = int_to_ptr.vmem [resolvable:$true] %s583_s2 }
  0x2a   : > { %9611 = sst [smem:[#allocation22_spill]] %s7097_s23  ;;  %s42_s26 = ssub.s32 %s6889_s21, %s7097_s23 }
  0x2b   : > { %s541_s29 = sshll.u32 %s9609_s9, 4  ;;  %s45_s18 = sadd.s32 1, %s6885_s20  ;;  %s542_s29 = int_to_ptr.hbm [resolvable:$true] %s541_s29 }
  0x2c   : > { %6285 = dma.hbm_to_vmem [thread:$0]  (!%p7049_p6), %s542_s29, 256, %s544_s13, [#allocation10], %s9580_s17, %s9580_s17, %s9581_s16  }
  0x2d   : > { %s581_s3 = sshll.u32 %s9610_s15, 4  ;;  %p43_p7 = scmp.eq.s32.totalorder %s42_s26, 0  ;;  %s582_s3 = int_to_ptr.hbm [resolvable:$true] %s581_s3 }
  0x2e   : > { %6291 = dma.hbm_to_vmem [thread:$0]  (!%p7049_p6), %s582_s3, 512, %s584_s2, [#allocation13], %s9580_s17, %s9580_s17, %s9581_s16  }
  0x2f   : > { %p52_p8 = scmp.ne.s32.totalorder %s6885_s20, %s6881_s30  ;;  %p53_p9 = scmp.eq.s32.totalorder %s6889_s21, 0 }
  0x30   : > { %p58_p10 = scmp.ne.s32.totalorder %s6881_s30, %s6877_s0  ;;  %p460_p13 = scmp.eq.s32.totalorder %s7032_s24, 1 }
  0x31   : > { %s7108_s29 = scalar_select %p43_p7, %s6885_s20, %s45_s18  }
  0x32   : > { %p7110_p11 = por %p53_p9, %p52_p8  ;;  %p7116_p12 = por %p59_p1, %p58_p10 }
  0x33   : > { %9612 = sst [smem:[#allocation23_spill]] %s7108_s29  ;;  %p466_p0 = scmp.eq.s32.totalorder %s6045_s19, 1 }
  0x34   : > { %p6306_p2 = scmp.lt.s32.totalorder %s6889_s21, 2  ;;  %s606_s7 = sand.u32 1, %s6885_s20  }
  0x35   : > { %p7123_p4 = por %p460_p13, %p52_p8  ;;  %p7127_p6 = por %p466_p0, %p58_p10 }
  0x36   : > { %s6054_s13 = sshll.u32 %s606_s7, 5  ;;  %s6231_s22 = sshll.u32 %s6889_s21, 5 }
  0x37   : > { %s9617_s18 = sld [smem:[#allocation28_spill]]  ;;  %s610_s16 = scalar_lea.vmem [#allocation3], %s6054_s13 }
  0x38   : > { %s618_s9 = sshll.u32 %s610_s16, 4  ;;  %p7137_p7 = pnand %p6306_p2, %p7110_p11  ;;  %s619_s9 = int_to_ptr.vmem [resolvable:$true] %s618_s9 }
  0x39   : > { %s607_s29 = scalar_lea.sflag [#allocation4], %s606_s7 }
  0x3a   : > { %p6785_p9 = pneg %p7137_p7 }
  0x3d   : > { %s615_s17 = scalar_lea.hbm %s9617_s18, %s6231_s22 }
  0x3e   : > { %s616_s15 = sshll.u32 %s615_s17, 4  ;;  %s6788_s17 = scalar_lea.hbm %s9617_s18, 64  ;;  %s617_s15 = int_to_ptr.hbm [resolvable:$true] %s616_s15 }
  0x3f   : > { %s6781_s20 = sshra.s32 %s617_s15, 4  ;;  %s6782_s20 = int_to_ptr.hbm [resolvable:$true] %s6781_s20 }
  0x40   : > { %s6783_s23 = scalar_lea.hbm %s6782_s20, 32  ;;  %p6789_p11 = scmp.lt.s32.totalorder %s6782_s20, %s9617_s18 }
  0x41   : > { %p6784_p8 = scmp.ne.s32.totalorder %s6782_s20, %s6783_s23  ;;  %p6790_p0 = scmp.lt.s32.totalorder %s6788_s17, %s6783_s23 }
  0x43   : > { %p6786_p10 = pnand %p6785_p9, %p6784_p8  ;;  %p6791_p2 = por %p6790_p0, %p6789_p11 }
  0x45   : > { %p6787_p13 = pneg %p6786_p10 }
  0x47   : > { %p6792_p5 = pnand %p6791_p2, %p6787_p13 }
  0x49   : > { %6795 = shalt.err (!%p6792_p5)
}
  0x4a   : > { %s9619_s7 = smov 4   ;;  %s9620_s2 = smov 64  }
  0x4b   : > { %6295 = dma.hbm_to_vmem [thread:$0]  (!%p7137_p7), %s617_s15, 512, %s619_s9, %s607_s29, %s9620_s2, %s9620_s2, %s9619_s7  }
  0x4c   : > { %630 = sbr.rel (%p7037_p3) target bundleno = 4060 (0xfdc), region = 96 }
  0x51   : > { %s7157_s26 = sand.u32 1, %s6881_s30  }
  0x52   : > { %s6058_s20 = sshll.u32 %s7157_s26, 5  ;;  %s633_s23 = scalar_lea.sflag [#allocation4], %s7157_s26 }
  0x53   : > { %s7163_s13 = scalar_lea.vmem [#allocation3], %s6058_s20 }
  0x54   : > { %6856 = dma.done.wait (%p7116_p12), %s633_s23, 512  }
  0x55   : > { %6858 = vsyncadd (%p7116_p12), %s633_s23, 4294966784 }
  0x56   : > { %6860 = dma.done.wait (%p59_p1), [#allocation7], 512  }
  0x57   : > { %6862 = vsyncadd (%p59_p1), [#allocation7], 4294966784 }
  0x58   : > { %6864 = dma.done.wait (%p59_p1), [#allocation10], 512  }
  0x59   : > { %6866 = vsyncadd (%p59_p1), [#allocation10], 4294966784 }
  0x5a   : > { %6868 = dma.done.wait (%p59_p1), [#allocation13], 768  }
  0x5b   : > { %6870 = vsyncadd (%p59_p1), [#allocation13], 4294966528  ;;  %v6233_v0 = vld [vmem:[#allocation6 + $0x8] sm:$0xff]  ;;  %v6232_v1 = vld [vmem:[#allocation6] sm:$0xff]  ;;  %vm896_vm0 = vcmask 1041409   ;;  %vm899_vm1 = vcmask 1042434  }
  0x5c   : > { %v7182_v2 = vld [vmem:[%s7163_s13] sm:$0xf]  ;;  %v7185_v3 = vld [vmem:[%s7163_s13 + $0x4] sm:$0xf]  ;;  %v7188_v4 = vld [vmem:[%s7163_s13 + $0x8] sm:$0xf]  ;;  %985 = vmatpush.bf16.msra.mxu0 %v6233_v0  ;;  %6243 = vmatpush.bf16.msra.mxu2 %v6233_v0 }
  0x5d   : > { %v7191_v5 = vld [vmem:[%s7163_s13 + $0xc] sm:$0xf]  ;;  %v7194_v6 = vld [vmem:[%s7163_s13 + $0x10] sm:$0xf]  ;;  %v7197_v7 = vld [vmem:[%s7163_s13 + $0x14] sm:$0xf]  ;;  %v797_v9 = vpack.c.bf16 %v7185_v3, %v7185_v3  ;;  %v798_v10 = vpack.c.bf16 %v7188_v4, %v7188_v4  ;;  %v796_v21 = vpack.c.bf16 %v7182_v2, %v7182_v2 }
  0x5e   : > { %v7200_v8 = vld [vmem:[%s7163_s13 + $0x18] sm:$0xf]  ;;  %v799_v11 = vpack.c.bf16 %v7191_v5, %v7191_v5  ;;  %v7209_v12 = vld [vmem:[%s7163_s13 + $0x1c] sm:$0xf]  ;;  %v7212_v13 = vrot.slane %v7182_v2, 1  ;;  %v7215_v14 = vrot.slane %v7185_v3, 1  ;;  %v800_v22 = vpack.c.bf16 %v7194_v6, %v7194_v6 }
  0x5f   : > { %v7218_v15 = vrot.slane %v7188_v4, 1  ;;  %v7221_v16 = vrot.slane %v7191_v5, 1  ;;  %v7224_v17 = vrot.slane %v7194_v6, 1  ;;  %v7227_v18 = vrot.slane %v7197_v7, 1  ;;  %s9621_s25 = sld [smem:[#allocation30_spill]]  ;;  %s6899_s29 = smov 120  }
  0x60   : > { %v7230_v19 = vrot.slane %v7200_v8, 1  ;;  %v7233_v20 = vrot.slane %v7209_v12, 1  ;;  %v801_v23 = vpack.c.bf16 %v7197_v7, %v7197_v7  ;;  %vm902_vm2 = vcmask 1043459   ;;  %986 = vmatpush.bf16.msra.mxu0 %v6232_v1  ;;  %6244 = vmatpush.bf16.msra.mxu2 %v6232_v1  ;;  %s6900_s27 = smov 96   ;;  %s6901_s19 = smov 112  }
  0x61   : > { %v802_v24 = vpack.c.bf16 %v7200_v8, %v7200_v8  ;;  %v805_v25 = vpack.c.bf16 %v7215_v14, %v7215_v14  ;;  %v806_v26 = vpack.c.bf16 %v7218_v15, %v7218_v15  ;;  %v807_v27 = vpack.c.bf16 %v7221_v16, %v7221_v16  ;;  %s6902_s16 = smov 104   ;;  %s6903_s17 = smov 64  }
  0x62   : > { %vm905_vm3 = vcmask 1044484   ;;  %v803_v28 = vpack.c.bf16 %v7209_v12, %v7209_v12  ;;  %v804_v29 = vpack.c.bf16 %v7212_v13, %v7212_v13  ;;  %v808_v30 = vpack.c.bf16 %v7224_v17, %v7224_v17  ;;  %s9633_s7 = sld [smem:[#allocation39_spill]] }
  0x63   : > { %v809_v31 = vpack.c.bf16 %v7227_v18, %v7227_v18  ;;  %vm908_vm4 = vcmask 1045509   ;;  %v810_v32 = vpack.c.bf16 %v7230_v19, %v7230_v19  ;;  %v864_v33 = vunpack.c.l.b16 %v797_v9 }
  0x64   : > { %v865_v34 = vunpack.c.l.b16 %v798_v10  ;;  %v866_v35 = vunpack.c.l.b16 %v799_v11  ;;  %vm911_vm5 = vcmask 1046534   ;;  %v811_v36 = vpack.c.bf16 %v7233_v20, %v7233_v20 }
  0x65   : > { %v863_v37 = vunpack.c.l.b16 %v796_v21  ;;  %v867_v38 = vunpack.c.l.b16 %v800_v22  ;;  %v868_v39 = vunpack.c.l.b16 %v801_v23  ;;  %vm914_vm6 = vcmask 1047559  }
  0x66   : > { %v869_v40 = vunpack.c.l.b16 %v802_v24  ;;  %v872_v41 = vunpack.c.l.b16 %v805_v25  ;;  %v873_v42 = vunpack.c.l.b16 %v806_v26  ;;  %v874_v43 = vunpack.c.l.b16 %v807_v27 }
  0x67   : > { %v870_v44 = vunpack.c.l.b16 %v803_v28  ;;  %v871_v45 = vunpack.c.l.b16 %v804_v29  ;;  %v875_v46 = vunpack.c.l.b16 %v808_v30  ;;  %v876_v47 = vunpack.c.l.b16 %v809_v31 }
  0x68   : > { %v877_v48 = vunpack.c.l.b16 %v810_v32  ;;  %v895_v49 = vrot.slane %v864_v33, 7  ;;  %v898_v50 = vrot.slane %v865_v34, 6  ;;  %v901_v51 = vrot.slane %v866_v35, 5 }
  0x69   : > { %v878_v52 = vunpack.c.l.b16 %v811_v36  ;;  %v904_v53 = vrot.slane %v867_v38, 4  ;;  %v907_v54 = vrot.slane %v868_v39, 3  ;;  %v916_v55 = vrot.slane %v872_v41, 7 }
  0x6a   : > { %vm972_vm7 = vcmask 261120   ;;  %v897_v56 = vsel %vm896_vm0, %v895_v49, %v863_v37  ;;  %v918_v57 = vrot.slane %v873_v42, 6  ;;  %v920_v58 = vrot.slane %v874_v43, 5 }
  0x6b   : > { %v922_v59 = vrot.slane %v875_v46, 4  ;;  %v900_v60 = vsel %vm899_vm1, %v898_v50, %v897_v56  ;;  %v910_v61 = vrot.slane %v869_v40, 2  ;;  %v917_v62 = vsel %vm896_vm0, %v916_v55, %v871_v45 }
  0x6c   : > { %v924_v63 = vrot.slane %v876_v47, 3  ;;  %v903_v0 = vsel %vm902_vm2, %v901_v51, %v900_v60  ;;  %v913_v1 = vrot.slane %v870_v44, 1  ;;  %v919_v9 = vsel %vm899_vm1, %v918_v57, %v917_v62 }
  0x6d   : > { %v926_v10 = vrot.slane %v877_v48, 2  ;;  %v906_v11 = vsel %vm905_vm3, %v904_v53, %v903_v0  ;;  %v921_v21 = vsel %vm902_vm2, %v920_v58, %v919_v9  ;;  %v928_v22 = vrot.slane %v878_v52, 1 }
  0x6e   : > { %v7269_v23 = vrot.slane %v7182_v2, 2  ;;  %v909_v24 = vsel %vm908_vm4, %v907_v54, %v906_v11  ;;  %v923_v25 = vsel %vm905_vm3, %v922_v59, %v921_v21  ;;  %v7274_v26 = vrot.slane %v7185_v3, 2 }
  0x6f   : > { %v7277_v27 = vrot.slane %v7188_v4, 2  ;;  %v912_v28 = vsel %vm911_vm5, %v910_v61, %v909_v24  ;;  %v925_v29 = vsel %vm908_vm4, %v924_v63, %v923_v25  ;;  %v7282_v30 = vrot.slane %v7191_v5, 2 }
  0x70   : > { %v7285_v31 = vrot.slane %v7194_v6, 2  ;;  %v915_v32 = vsel %vm914_vm6, %v913_v1, %v912_v28  ;;  %v927_v33 = vsel %vm911_vm5, %v926_v10, %v925_v29  ;;  %v7290_v34 = vrot.slane %v7197_v7, 2 }
  0x71   : > { %v7293_v35 = vrot.slane %v7200_v8, 2  ;;  %v929_v36 = vsel %vm914_vm6, %v928_v22, %v927_v33  ;;  %v7297_v37 = vrot.slane %v7209_v12, 2  ;;  %v7300_v38 = vrot.slane %v7185_v3, 3 }
  0x72   : > { %v7303_v39 = vrot.slane %v7188_v4, 3  ;;  %v958_v40 = vpack.c.b16 %v929_v36, %v915_v32  ;;  %v7306_v41 = vrot.slane %v7182_v2, 3  ;;  %v7309_v42 = vrot.slane %v7191_v5, 3 }
  0x73   : > { %v7312_v43 = vrot.slane %v7194_v6, 3  ;;  %v7315_v44 = vrot.slane %v7197_v7, 3  ;;  %v7318_v45 = vrot.slane %v7200_v8, 3  ;;  %v813_v3 = vpack.c.bf16 %v7274_v26, %v7274_v26 }
  0x74   : > { %v814_v4 = vpack.c.bf16 %v7277_v27, %v7277_v27  ;;  %6074 = vmatmul.msk.bf16.vlgmr.msra.gmra.mxu0 %vm972_vm7, %v958_v40  ;;  %v7326_v2 = vrot.slane %v7209_v12, 3  ;;  %v815_v5 = vpack.c.bf16 %v7282_v30, %v7282_v30  ;;  %v816_v6 = vpack.c.bf16 %v7285_v31, %v7285_v31 }
  0x75   : > { %v817_v7 = vpack.c.bf16 %v7290_v34, %v7290_v34  ;;  %v812_v8 = vpack.c.bf16 %v7269_v23, %v7269_v23  ;;  %v818_v46 = vpack.c.bf16 %v7293_v35, %v7293_v35  ;;  %v821_v47 = vpack.c.bf16 %v7300_v38, %v7300_v38 }
  0x76   : > { %v822_v12 = vpack.c.bf16 %v7303_v39, %v7303_v39  ;;  %v819_v48 = vpack.c.bf16 %v7297_v37, %v7297_v37  ;;  %v820_v49 = vpack.c.bf16 %v7306_v41, %v7306_v41  ;;  %v823_v50 = vpack.c.bf16 %v7309_v42, %v7309_v42 }
  0x77   : > { %v824_v51 = vpack.c.bf16 %v7312_v43, %v7312_v43  ;;  %v825_v52 = vpack.c.bf16 %v7315_v44, %v7315_v44  ;;  %v826_v53 = vpack.c.bf16 %v7318_v45, %v7318_v45  ;;  %v880_v54 = vunpack.c.l.b16 %v813_v3 }
  0x78   : > { %v881_v55 = vunpack.c.l.b16 %v814_v4  ;;  %v827_v56 = vpack.c.bf16 %v7326_v2, %v7326_v2  ;;  %v882_v57 = vunpack.c.l.b16 %v815_v5  ;;  %v883_v58 = vunpack.c.l.b16 %v816_v6 }
  0x79   : > { %v884_v59 = vunpack.c.l.b16 %v817_v7  ;;  %v879_v60 = vunpack.c.l.b16 %v812_v8  ;;  %v885_v61 = vunpack.c.l.b16 %v818_v46  ;;  %v888_v62 = vunpack.c.l.b16 %v821_v47 }
  0x7a   : > { %v889_v63 = vunpack.c.l.b16 %v822_v12  ;;  %v886_v0 = vunpack.c.l.b16 %v819_v48  ;;  %v887_v1 = vunpack.c.l.b16 %v820_v49  ;;  %v890_v9 = vunpack.c.l.b16 %v823_v50 }
  0x7b   : > { %v891_v10 = vunpack.c.l.b16 %v824_v51  ;;  %v892_v11 = vunpack.c.l.b16 %v825_v52  ;;  %v930_v21 = vrot.slane %v880_v54, 7  ;;  %v932_v22 = vrot.slane %v881_v55, 6 }
  0x7c   : > { %v934_v24 = vrot.slane %v882_v57, 5  ;;  %v893_v25 = vunpack.c.l.b16 %v826_v53  ;;  %v894_v28 = vunpack.c.l.b16 %v827_v56  ;;  %v936_v29 = vrot.slane %v883_v58, 4 }
  0x7d   : > { %v938_v32 = vrot.slane %v884_v59, 3  ;;  %v931_v33 = vsel %vm896_vm0, %v930_v21, %v879_v60  ;;  %v944_v36 = vrot.slane %v888_v62, 7  ;;  %v946_v40 = vrot.slane %v889_v63, 6  ;;  %v6363_v60 = vld [vmem:[%s9621_s25] ss:$0 sm:$0xff]  ;;  %s9631_s25 = sld [smem:[#allocation37_spill]] }
  0x7e   : > { %v948_v3 = vrot.slane %v890_v9, 5  ;;  %v933_v4 = vsel %vm899_vm1, %v932_v22, %v931_v33  ;;  %v940_v5 = vrot.slane %v885_v61, 2  ;;  %v950_v6 = vrot.slane %v891_v10, 4 }
  0x7f   : > { %v935_v7 = vsel %vm902_vm2, %v934_v24, %v933_v4  ;;  %v942_v8 = vrot.slane %v886_v0, 1  ;;  %v945_v46 = vsel %vm896_vm0, %v944_v36, %v887_v1  ;;  %v952_v47 = vrot.slane %v892_v11, 3 }
  0x80   : > { %v937_v12 = vsel %vm905_vm3, %v936_v29, %v935_v7  ;;  %v947_v48 = vsel %vm899_vm1, %v946_v40, %v945_v46  ;;  %v954_v49 = vrot.slane %v893_v25, 2  ;;  %v956_v52 = vrot.slane %v894_v28, 1 }
  0x81   : > { %v939_v50 = vsel %vm908_vm4, %v938_v32, %v937_v12  ;;  %v949_v51 = vsel %vm902_vm2, %v948_v3, %v947_v48  ;;  %vm1034_vm8 = vcmask 64512   ;;  %vm1596_vm9 = vcmask 1043456  }
  0x82   : > { %v941_v53 = vsel %vm911_vm5, %v940_v5, %v939_v50  ;;  %v951_v54 = vsel %vm905_vm3, %v950_v6, %v949_v51  ;;  %vm2751_vm14 = vcmask 253952  }
  0x83   : > { %v943_v55 = vsel %vm914_vm6, %v942_v8, %v941_v53  ;;  %v953_v56 = vsel %vm908_vm4, %v952_v47, %v951_v54 }
  0x84   : > { %v955_v57 = vsel %vm911_vm5, %v954_v49, %v953_v56 }
  0x85   : > { %v957_v58 = vsel %vm914_vm6, %v956_v52, %v955_v57 }
  0x86   : > { %v959_v59 = vpack.c.b16 %v957_v58, %v943_v55 }
  0x88   : > { %6075 = vmatmul.msk.bf16.vlgmr.msra.gmra.mxu2 %vm972_vm7, %v959_v59 }
  0xf1   : > { %v988_v61 = vpop.f32.mrf.mxu0 }
  0xf2   : > { %v989_v62 = vadd.f32 %v6363_v60, %v988_v61 }
  0xf4   : > { %v998_v63 = vpack.c.bf16 %v989_v62, %v989_v62 }
  0xf6   : > { %1006 = vrot.lane.b32.xlu0 %v998_v63, %s6899_s29  ;;  %v1030_v0 = vunpack.c.l.b16 %v998_v63 }
  0xf8   : > { %v7375_v1 = vpack.c.b16 %v1030_v0, %v1030_v0 }
  0xf9   : > { %v990_v9 = vpop.f32.mrf.mxu0 }
  0xfa   : > { %v991_v10 = vadd.f32 %v6363_v60, %v990_v9  ;;  %1032 = vrot.lane.b32.xlu1 %v7375_v1, %s6900_s27 }
  0xfc   : > { %v999_v11 = vpack.c.bf16 %v991_v10, %v991_v10 }
  0xfe   : > { %1016 = vrot.lane.b32.xlu2 %v999_v11, %s6901_s19  ;;  %1008 = vrot.lane.b32.xlu0 %v999_v11, %s6899_s29  ;;  %v1054_v21 = vunpack.c.l.b16 %v999_v11 }
 0x100   : > { %v7382_v22 = vpack.c.b16 %v1054_v21, %v1054_v21 }
 0x102   : > { %1014 = vrot.lane.b32.xlu1 %v998_v63, %s6901_s19 }
 0x106   : > { %1056 = vrot.lane.b32.xlu2 %v7382_v22, %s6900_s27 }
 0x10b   : > { %v993_v24 = vpop.f32.mrf.mxu2 }
 0x10c   : > { %v994_v25 = vadd.f32 %v6363_v60, %v993_v24 }
 0x10e   : > { %v1000_v28 = vpack.c.bf16 %v994_v25, %v994_v25 }
 0x110   : > { %v1077_v29 = vunpack.c.l.b16 %v1000_v28  ;;  %1010 = vrot.lane.b32.xlu1 %v1000_v28, %s6899_s29 }
 0x112   : > { %v7387_v32 = vpack.c.b16 %v1077_v29, %v1077_v29 }
 0x113   : > { %v995_v33 = vpop.f32.mrf.mxu2 }
 0x114   : > { %1079 = vrot.lane.b32.xlu0 %v7387_v32, %s6900_s27  ;;  %v996_v36 = vadd.f32 %v6363_v60, %v995_v33 }
 0x116   : > { %v7391_v40 = vpack.c.bf16 %v996_v36, %v996_v36 }
 0x118   : > { %1024 = vrot.lane.b32.xlu1 %v999_v11, %s6902_s16  ;;  %1012 = vrot.lane.b32.xlu2 %v7391_v40, %s6899_s29  ;;  %v1100_v54 = vunpack.c.l.b16 %v7391_v40 }
 0x11a   : > { %v7419_v56 = vpack.c.b16 %v1100_v54, %v1100_v54 }
 0x11c   : > { %1022 = vrot.lane.b32.xlu0 %v998_v63, %s6902_s16 }
 0x120   : > { %1018 = vrot.lane.b32.xlu1 %v1000_v28, %s6901_s19 }
 0x158   : > { %v7398_v3 = vpop.permute.xlu2 %1016 }
 0x159   : > { %v1238_v52 = vunpack.c.l.b16 %v7398_v3 }
 0x15b   : > { %v7417_v55 = vpack.c.b16 %v1238_v52, %v1238_v52 }
 0x160   : > { %v1057_v4 = vpop.permute.xlu2 %1056 }
 0x161   : > { %v1062_v5 = vsel %vm1034_vm8, %v1057_v4, 0 }
 0x162   : > { %1071 = vmatpush.bf16.xpose.msrb.mxu2 %v1062_v5 }
 0x168   : > { %v1007_v6 = vpop.permute.xlu0 %1006 }
 0x169   : > { %v1123_v7 = vunpack.c.l.b16 %v1007_v6  ;;  %6077 = vmatmul.msk.bf16.vlgmr.msrb.gmra.mxu2 %vm1034_vm8, %v999_v11 }
 0x16b   : > { %v1124_v8 = vpack.c.b16 %v1123_v7, %v1123_v7 }
 0x16c   : > { %v1033_v46 = vpop.permute.xlu1 %1032 }
 0x16d   : > { %1125 = vrot.lane.b32.xlu2 %v1124_v8, %s6900_s27  ;;  %v1039_v47 = vsel %vm1034_vm8, %v1033_v46, 0 }
 0x16e   : > { %1048 = vmatpush.bf16.xpose.msra.mxu3 %v1039_v47 }
 0x170   : > { %v7404_v12 = vpop.permute.xlu0 %1008 }
 0x171   : > { %v1146_v48 = vunpack.c.l.b16 %v7404_v12 }
 0x172   : > { %v7427_v58 = vpop.permute.xlu2 %1012 }
 0x173   : > { %v1147_v49 = vpack.c.b16 %v1146_v48, %v1146_v48  ;;  %v1192_v61 = vunpack.c.l.b16 %v7427_v58 }
 0x174   : > { %v7407_v50 = vpop.permute.xlu1 %1014 }
 0x175   : > { %v1215_v51 = vunpack.c.l.b16 %v7407_v50  ;;  %1020 = vrot.lane.b32.xlu2 %v7391_v40, %s6901_s19  ;;  %1148 = vrot.lane.b32.xlu0 %v1147_v49, %s6900_s27  ;;  %v7436_v0 = vpack.c.b16 %v1192_v61, %v1192_v61 }
 0x176   : > { %6076 = vmatmul.msk.bf16.vlgmr.msra.gmra.mxu3 %vm1034_vm8, %v998_v63 }
 0x177   : > { %v1216_v53 = vpack.c.b16 %v1215_v51, %v1215_v51 }
 0x179   : > { %1217 = vrot.lane.b32.xlu1 %v1216_v53, %s6900_s27 }
 0x17d   : > { %1240 = vrot.lane.b32.xlu2 %v7417_v55, %s6900_s27  ;;  %1102 = vrot.lane.b32.xlu0 %v7419_v56, %s6900_s27 }
 0x181   : > { %1028 = vrot.lane.b32.xlu1 %v7391_v40, %s6902_s16 }
 0x182   : > { %v1011_v57 = vpop.permute.xlu1 %1010 }
 0x183   : > { %v1169_v59 = vunpack.c.l.b16 %v1011_v57 }
 0x185   : > { %1026 = vrot.lane.b32.xlu0 %v1000_v28, %s6902_s16  ;;  %v7430_v60 = vpack.c.b16 %v1169_v59, %v1169_v59 }
 0x186   : > { %v1080_v62 = vpop.permute.xlu0 %1079 }
 0x187   : > { %v1085_v63 = vsel %vm1034_vm8, %v1080_v62, 0  ;;  %1171 = vrot.lane.b32.xlu2 %v7430_v60, %s6900_s27 }
 0x188   : > { %1094 = vmatpush.bf16.xpose.msrb.mxu3 %v1085_v63 }
 0x18a   : > { %v7438_v9 = vpop.permute.xlu1 %1024 }
 0x18b   : > { %v1330_v10 = vunpack.c.l.b16 %v7438_v9 }
 0x18d   : > { %1194 = vrot.lane.b32.xlu0 %v7436_v0, %s6900_s27  ;;  %v7443_v11 = vpack.c.b16 %v1330_v10, %v1330_v10 }
 0x18e   : > { %v7445_v21 = vpop.permute.xlu0 %1022 }
 0x18f   : > { %v1307_v24 = vunpack.c.l.b16 %v7445_v21  ;;  %6078 = vmatmul.msk.bf16.vlgmr.msrb.gmra.mxu3 %vm1034_vm8, %v1000_v28  ;;  %1332 = vrot.lane.b32.xlu2 %v7443_v11, %s6900_s27 }
 0x191   : > { %v7451_v25 = vpack.c.b16 %v1307_v24, %v1307_v24 }
 0x192   : > { %v7453_v29 = vpop.permute.xlu1 %1018 }
 0x193   : > { %1309 = vrot.lane.b32.xlu1 %v7451_v25, %s6900_s27  ;;  %v1261_v33 = vunpack.c.l.b16 %v7453_v29 }
 0x195   : > { %v7458_v36 = vpack.c.b16 %v1261_v33, %v1261_v33 }
 0x197   : > { %1263 = vrot.lane.b32.xlu0 %v7458_v36, %s6900_s27 }
 0x19f   : > { %1676 = vrot.lane.b32.xlu0 %v1124_v8, %s6903_s17 }
 0x1a7   : > { %1697 = vrot.lane.b32.xlu0 %v1147_v49, %s6903_s17 }
 0x1c7   : > { %v1126_v28 = vpop.permute.xlu2 %1125 }
 0x1c8   : > { %v1131_v4 = vsel %vm1034_vm8, %v1126_v28, 0 }
 0x1c9   : > { %1140 = vmatpush.bf16.xpose.msra.mxu2 %v1131_v4 }
 0x1cf   : > { %v7465_v5 = vpop.permute.xlu2 %1020 }
 0x1d0   : > { %v1284_v7 = vunpack.c.l.b16 %v7465_v5  ;;  %6080 = vmatmul.msk.bf16.vlgmr.msra.gmra.mxu2 %vm1034_vm8, %v1007_v6 }
 0x1d2   : > { %v7469_v46 = vpack.c.b16 %v1284_v7, %v1284_v7 }
 0x1d4   : > { %1286 = vrot.lane.b32.xlu1 %v7469_v46, %s6900_s27 }
 0x1d7   : > { %v1241_v47 = vpop.permute.xlu2 %1240 }
 0x1d8   : > { %v1246_v6 = vsel %vm1034_vm8, %v1241_v47, 0 }
 0x1dc   : > { %1591 = vrot.lane.b32.xlu1 %v7375_v1, %s6903_s17 }
 0x1e1   : > { %v1172_v8 = vpop.permute.xlu2 %1171 }
 0x1e2   : > { %v1177_v48 = vsel %vm1034_vm8, %v1172_v8, 0 }
 0x1e3   : > { %1186 = vmatpush.bf16.xpose.msrb.mxu0 %v1177_v48 }
 0x1e4   : > { %1634 = vrot.lane.b32.xlu1 %v7387_v32, %s6903_s17 }
 0x1e7   : > { %v1149_v49 = vpop.permute.xlu0 %1148 }
 0x1e8   : > { %v1154_v51 = vsel %vm1034_vm8, %v1149_v49, 0 }
 0x1e9   : > { %1163 = vmatpush.bf16.xpose.msra.mxu3 %v1154_v51  ;;  %v1333_v59 = vpop.permute.xlu2 %1332 }
 0x1ea   : > { %6082 = vmatmul.msk.bf16.vlgmr.msrb.gmra.mxu0 %vm1034_vm8, %v1011_v57  ;;  %v1338_v32 = vsel %vm1034_vm8, %v1333_v59, 0 }
 0x1eb   : > { %v1218_v52 = vpop.permute.xlu1 %1217 }
 0x1ec   : > { %v1223_v54 = vsel %vm1034_vm8, %v1218_v52, 0  ;;  %v7482_v1 = vpop.f32.mrf.mxu2  ;;  %1760 = vrot.lane.b32.xlu1 %v1216_v53, %s6903_s17 }
 0x1ed   : > { %1232 = vmatpush.bf16.xpose.msrb.mxu2 %v1223_v54 }
 0x1ef   : > { %v1103_v61 = vpop.permute.xlu0 %1102 }
 0x1f0   : > { %6081 = vmatmul.msk.bf16.vlgmr.msra.gmra.mxu3 %vm1034_vm8, %v7404_v12  ;;  %v1108_v62 = vsel %vm1034_vm8, %v1103_v61, 0 }
 0x1f1   : > { %1255 = vmatpush.bf16.xpose.msrb.mxu3 %v1246_v6  ;;  %1117 = vmatpush.bf16.xpose.msra.mxu1 %v1108_v62 }
 0x1f3   : > { %v7489_v57 = vpop.permute.xlu1 %1028 }
 0x1f4   : > { %v1376_v63 = vunpack.c.l.b16 %v7489_v57  ;;  %v1075_v10 = vpop.f32.mrf.mxu2  ;;  %6084 = vmatmul.msk.bf16.vlgmr.msrb.gmra.mxu2 %vm1034_vm8, %v7407_v50 }
 0x1f6   : > { %v7494_v53 = vpack.c.b16 %v1376_v63, %v1376_v63 }
 0x1f7   : > { %v1027_v24 = vpop.permute.xlu0 %1026 }
 0x1f8   : > { %v1353_v33 = vunpack.c.l.b16 %v1027_v24  ;;  %6079 = vmatmul.msk.bf16.vlgmr.msra.gmra.mxu1 %vm1034_vm8, %v7391_v40  ;;  %1378 = vrot.lane.b32.xlu0 %v7494_v53, %s6900_s27 }
 0x1f9   : > { %1347 = vmatpush.bf16.xpose.msra.mxu3 %v1338_v32  ;;  %v7500_v12 = vpop.f32.mrf.mxu3 }
 0x1fa   : > { %v7502_v28 = vpack.c.b16 %v1353_v33, %v1353_v33 }
 0x1fc   : > { %1355 = vrot.lane.b32.xlu2 %v7502_v28, %s6900_s27 }
 0x1ff   : > { %v1195_v4 = vpop.permute.xlu0 %1194 }
 0x200   : > { %6085 = vmatmul.msk.bf16.vlgmr.msrb.gmra.mxu3 %vm1034_vm8, %v7398_v3  ;;  %1655 = vrot.lane.b32.xlu0 %v7419_v56, %s6903_s17  ;;  %v1200_v50 = vsel %vm1034_vm8, %v1195_v4, 0 }
 0x201   : > { %v1052_v40 = vpop.f32.mrf.mxu3  ;;  %1209 = vmatpush.bf16.xpose.msrb.mxu1 %v1200_v50 }
 0x204   : > { %1613 = vrot.lane.b32.xlu2 %v7382_v22, %s6903_s17  ;;  %v1399_v22 = vsel %vm1034_vm8, %v7500_v12, -inf }
 0x205   : > { %v1310_v7 = vpop.permute.xlu1 %1309 }
 0x206   : > { %v1315_v47 = vsel %vm1034_vm8, %v1310_v7, 0 }
 0x207   : > { %1324 = vmatpush.bf16.xpose.msra.mxu2 %v1315_v47 }
 0x208   : > { %6083 = vmatmul.msk.bf16.vlgmr.msrb.gmra.mxu1 %vm1034_vm8, %v7427_v58 }
 0x209   : > { %v1264_v8 = vpop.permute.xlu0 %1263 }
 0x20a   : > { %v1269_v3 = vsel %vm1034_vm8, %v1264_v8, 0 }
 0x20b   : > { %1278 = vmatpush.bf16.xpose.msra.mxu0 %v1269_v3 }
 0x20e   : > { %6088 = vmatmul.msk.bf16.vlgmr.msra.gmra.mxu2 %vm1034_vm8, %v7445_v21  ;;  %v1402_v21 = vsel %vm1034_vm8, %v7482_v1, -inf }
 0x210   : > { %6089 = vmatmul.msk.bf16.vlgmr.msra.gmra.mxu3 %vm1034_vm8, %v7438_v9 }
 0x211   : > { %v1677_v49 = vpop.permute.xlu0 %1676 }
 0x212   : > { %v7521_v56 = vpop.f32.mrf.mxu3  ;;  %6086 = vmatmul.msk.bf16.vlgmr.msra.gmra.mxu0 %vm1034_vm8, %v7453_v29  ;;  %v1682_v52 = vsel %vm1596_vm9, %v1677_v49, 0 }
 0x213   : > { %v1405_v48 = vsel %vm1034_vm8, %v7521_v56, -inf }
 0x216   : > { %1400 = vmax.xlane.f32.xlu1 %v1399_v22 }
 0x21a   : > { %v1098_v58 = vpop.f32.mrf.mxu3 }
 0x21e   : > { %1406 = vmax.xlane.f32.xlu1 %v1405_v48 }
 0x22d   : > { %1403 = vmax.xlane.f32.xlu2 %v1402_v21 }
 0x237   : > { %1718 = vrot.lane.b32.xlu1 %v7430_v60, %s6903_s17 }
 0x23f   : > { %1739 = vrot.lane.b32.xlu1 %v7436_v0, %s6903_s17 }
 0x246   : > { %v1287_v9 = vpop.permute.xlu1 %1286 }
 0x247   : > { %v1292_v29 = vsel %vm1034_vm8, %v1287_v9, 0 }
 0x248   : > { %1301 = vmatpush.bf16.xpose.msra.mxu1 %v1292_v29 }
 0x24e   : > { %v1592_v51 = vpop.permute.xlu1 %1591 }
 0x24f   : > { %v1598_v6 = vsel %vm1596_vm9, %v1592_v51, 0  ;;  %6087 = vmatmul.msk.bf16.vlgmr.msra.gmra.mxu1 %vm1034_vm8, %v7465_v5  ;;  %v1698_v5 = vpop.permute.xlu0 %1697 }
 0x250   : > { %1607 = vmatpush.bf16.msrb.mxu2 %v1598_v6  ;;  %v1703_v33 = vsel %vm1596_vm9, %v1698_v5, 0 }
 0x253   : > { %v7540_v60 = vpop.f32.mrf.mxu2 }
 0x254   : > { %1691 = vmatpush.bf16.msra.mxu2 %v1682_v52  ;;  %v1411_v0 = vsel %vm1034_vm8, %v7540_v60, -inf }
 0x255   : > { %1412 = vmax.xlane.f32.xlu0 %v1411_v0 }
 0x256   : > { %v1356_v54 = vpop.permute.xlu2 %1355  ;;  %v1635_v59 = vpop.permute.xlu1 %1634 }
 0x257   : > { %v1361_v61 = vsel %vm1034_vm8, %v1356_v54, 0  ;;  %v1640_v32 = vsel %vm1596_vm9, %v1635_v59, 0 }
 0x258   : > { %1370 = vmatpush.bf16.xpose.msrb.mxu0 %v1361_v61 }
 0x25b   : > { %v1144_v62 = vpop.f32.mrf.mxu2 }
 0x25e   : > { %v1614_v63 = vpop.permute.xlu2 %1613  ;;  %v7567_v29 = vpop.permute.xlu1 %1760 }
 0x25f   : > { %v1619_v10 = vsel %vm1596_vm9, %v1614_v63, 0  ;;  %6090 = vmatmul.msk.bf16.vlgmr.msrb.gmra.mxu0 %vm1034_vm8, %v1027_v24 }
 0x260   : > { %1649 = vmatpush.bf16.msra.mxu0 %v1640_v32  ;;  %1628 = vmatpush.bf16.msrb.mxu3 %v1619_v10 }
 0x264   : > { %1712 = vmatpush.bf16.msra.mxu3 %v1703_v33 }
 0x267   : > { %v7549_v4 = vpop.f32.mrf.mxu0 }
 0x268   : > { %v1417_v21 = vsel %vm1034_vm8, %v7549_v4, -inf }
 0x269   : > { %1844 = vrot.lane.b32.xlu0 %v7451_v25, %s6903_s17 }
 0x26a   : > { %v1379_v50 = vpop.permute.xlu0 %1378 }
 0x26b   : > { %v1384_v40 = vsel %vm1034_vm8, %v1379_v50, 0 }
 0x26c   : > { %1393 = vmatpush.bf16.xpose.msrb.mxu1 %v1384_v40 }
 0x26f   : > { %v1190_v7 = vpop.f32.mrf.mxu0 }
 0x272   : > { %v1656_v47 = vpop.permute.xlu0 %1655 }
 0x273   : > { %v1661_v8 = vsel %vm1596_vm9, %v1656_v47, 0  ;;  %v7555_v3 = vpop.f32.mrf.mxu3  ;;  %6091 = vmatmul.msk.bf16.vlgmr.msrb.gmra.mxu1 %vm1034_vm8, %v7489_v57 }
 0x274   : > { %1670 = vmatpush.bf16.msra.mxu1 %v1661_v8  ;;  %v1414_v51 = vsel %vm1034_vm8, %v7555_v3, -inf }
 0x275   : > { %v7559_v24 = vpop.f32.mrf.mxu1 }
 0x276   : > { %v1408_v22 = vsel %vm1034_vm8, %v7559_v24, -inf }
 0x277   : > { %1409 = vmax.xlane.f32.xlu2 %v1408_v22  ;;  %v7563_v25 = vpop.f32.mrf.mxu2 }
 0x278   : > { %v1423_v8 = vsel %vm1034_vm8, %v7563_v25, -inf }
 0x27b   : > { %v1167_v58 = vpop.f32.mrf.mxu3 }
 0x27d   : > { %v1121_v48 = vpop.f32.mrf.mxu1 }
 0x27f   : > { %1418 = vmax.xlane.f32.xlu2 %v1417_v21  ;;  %v1236_v9 = vpop.f32.mrf.mxu2 }
 0x283   : > { %v7569_v49 = vpop.f32.mrf.mxu3 }
 0x285   : > { %v7571_v57 = vpop.f32.mrf.mxu1 }
 0x286   : > { %v1420_v62 = vsel %vm1034_vm8, %v7571_v57, -inf }
 0x287   : > { %1415 = vmax.xlane.f32.xlu2 %v1414_v51 }
 0x289   : > { %v1401_v6 = vpop.xlane.xlu1 %1400 }
 0x28a   : > { %v1447_v52 = vsub.f32 %v7500_v12, %v1401_v6 }
 0x28b   : > { %v1259_v0 = vpop.f32.mrf.mxu3 }
 0x28c   : > { %v1463_v54 = vmul.f32 1.442695, %v1447_v52 }
 0x28d   : > { %v1213_v59 = vpop.f32.mrf.mxu1 }
 0x28e   : > { %6375 = vpow2.f32 %v1463_v54 }
 0x28f   : > { %v7576_v61 = vpop.f32.mrf.mxu0 }
 0x290   : > { %v1429_v54 = vsel %vm1034_vm8, %v7576_v61, -inf }
 0x291   : > { %v7578_v32 = vpop.f32.mrf.mxu2  ;;  %v1407_v7 = vpop.xlane.xlu1 %1406 }
 0x292   : > { %v1435_v6 = vsel %vm1034_vm8, %v7578_v32, -inf  ;;  %v1449_v52 = vsub.f32 %v7521_v56, %v1407_v7 }
 0x293   : > { %v7582_v5 = vpop.f32.mrf.mxu3  ;;  %1421 = vmax.xlane.f32.xlu0 %v1420_v62 }
 0x294   : > { %v7584_v63 = vpop.eup %6375  ;;  %v1467_v0 = vmul.f32 1.442695, %v1449_v52 }
 0x295   : > { %v1495_v12 = vsel %vm1034_vm8, %v7584_v63, 0.0 }
 0x297   : > { %v1282_v10 = vpop.f32.mrf.mxu0 }
 0x299   : > { %v1328_v33 = vpop.f32.mrf.mxu2 }
 0x29b   : > { %v1351_v50 = vpop.f32.mrf.mxu3  ;;  %1496 = vadd.xlane.f32.xlu0 %v1495_v12  ;;  %v1438_v12 = vsel %vm1034_vm8, %v7582_v5, -inf }
 0x29f   : > { %1781 = vrot.lane.b32.xlu2 %v7417_v55, %s6903_s17 }
 0x2a0   : > { %v1404_v40 = vpop.xlane.xlu2 %1403 }
 0x2a1   : > { %v1448_v47 = vsub.f32 %v7482_v1, %v1404_v40  ;;  %v1426_v1 = vsel %vm1034_vm8, %v7569_v49, -inf }
 0x2a3   : > { %v1465_v22 = vmul.f32 1.442695, %v1448_v47  ;;  %1424 = vmax.xlane.f32.xlu0 %v1423_v8 }
 0x2a5   : > { %6377 = vpow2.f32 %v1465_v22 }
 0x2a6   : > { %6379 = vpow2.f32 %v1467_v0 }
 0x2a9   : > { %v1719_v58 = vpop.permute.xlu1 %1718 }
 0x2aa   : > { %v1724_v48 = vsel %vm1596_vm9, %v1719_v58, 0 }
 0x2ab   : > { %v7594_v21 = vpop.eup %6377  ;;  %1733 = vmatpush.bf16.msrb.mxu0 %v1724_v48 }
 0x2ac   : > { %v1498_v9 = vsel %vm1034_vm8, %v7594_v21, 0.0  ;;  %v7606_v59 = vpop.eup %6379 }
 0x2ad   : > { %1499 = vadd.xlane.f32.xlu1 %v1498_v9  ;;  %v1501_v10 = vsel %vm1034_vm8, %v7606_v59, 0.0 }
 0x2b1   : > { %v1740_v55 = vpop.permute.xlu1 %1739 }
 0x2b2   : > { %v1745_v51 = vsel %vm1596_vm9, %v1740_v55, 0 }
 0x2b3   : > { %1754 = vmatpush.bf16.msrb.mxu1 %v1745_v51 }
 0x2b5   : > { %1427 = vmax.xlane.f32.xlu1 %v1426_v1 }
 0x2bd   : > { %1436 = vmax.xlane.f32.xlu1 %v1435_v6 }
 0x2c8   : > { %1430 = vmax.xlane.f32.xlu2 %v1429_v54  ;;  %v1413_v51 = vpop.xlane.xlu0 %1412 }
 0x2c9   : > { %v1451_v52 = vsub.f32 %v7540_v60, %v1413_v51 }
 0x2cc   : > { %v7608_v62 = vpop.f32.mrf.mxu1 }
 0x2cd   : > { %v1432_v54 = vsel %vm1034_vm8, %v7608_v62, -inf }
 0x2d0   : > { %1502 = vadd.xlane.f32.xlu2 %v1501_v10  ;;  %v1471_v10 = vmul.f32 1.442695, %v1451_v52 }
 0x2d4   : > { %v1305_v33 = vpop.f32.mrf.mxu1 }
 0x2d8   : > { %1439 = vmax.xlane.f32.xlu2 %v1438_v12 }
 0x2db   : > { %v7629_v0 = vpop.permute.xlu0 %1844 }
 0x2dc   : > { %v7614_v56 = vpop.f32.mrf.mxu0 }
 0x2e4   : > { %v1374_v50 = vpop.f32.mrf.mxu0 }
 0x2ea   : > { %v1410_v40 = vpop.xlane.xlu2 %1409 }
 0x2eb   : > { %v1450_v7 = vsub.f32 %v7559_v24, %v1410_v40  ;;  %v1441_v40 = vsel %vm1034_vm8, %v7614_v56, -inf }
 0x2ed   : > { %v1469_v47 = vmul.f32 1.442695, %v1450_v7 }
 0x2ef   : > { %6381 = vpow2.f32 %v1469_v47 }
 0x2f0   : > { %v7617_v8 = vpop.f32.mrf.mxu1 }
 0x2f1   : > { %v1444_v22 = vsel %vm1034_vm8, %v7617_v8, -inf }
 0x2f2   : > { %v1419_v58 = vpop.xlane.xlu2 %1418  ;;  %1445 = vmax.xlane.f32.xlu1 %v1444_v22 }
 0x2f3   : > { %v1453_v48 = vsub.f32 %v7549_v4, %v1419_v58 }
 0x2f5   : > { %v7622_v9 = vpop.eup %6381  ;;  %v1475_v55 = vmul.f32 1.442695, %v1453_v48 }
 0x2f6   : > { %v1504_v1 = vsel %vm1034_vm8, %v7622_v9, 0.0 }
 0x2f7   : > { %6383 = vpow2.f32 %v1475_v55  ;;  %1505 = vadd.xlane.f32.xlu0 %v1504_v1 }
 0x2f8   : > { %v1397_v24 = vpop.f32.mrf.mxu1  ;;  %6385 = vpow2.f32 %v1471_v10 }
 0x2fa   : > { %v1416_v33 = vpop.xlane.xlu2 %1415 }
 0x2fb   : > { %v1452_v12 = vsub.f32 %v7555_v3, %v1416_v33  ;;  %v1766_v33 = vsel %vm1596_vm9, %v7567_v29, 0 }
 0x2fd   : > { %v7626_v6 = vpop.eup %6383  ;;  %v1473_v7 = vmul.f32 1.442695, %v1452_v12 }
 0x2fe   : > { %v1513_v4 = vsel %vm1034_vm8, %v7626_v6, 0.0  ;;  %v7639_v22 = vpop.eup %6385 }
 0x2ff   : > { %1433 = vmax.xlane.f32.xlu0 %v1432_v54  ;;  %1514 = vadd.xlane.f32.xlu2 %v1513_v4  ;;  %v1507_v48 = vsel %vm1034_vm8, %v7639_v22, 0.0 }
 0x306   : > { %v1422_v50 = vpop.xlane.xlu0 %1421 }
 0x307   : > { %v1454_v60 = vsub.f32 %v7571_v57, %v1422_v50  ;;  %1442 = vmax.xlane.f32.xlu0 %v1441_v40 }
 0x309   : > { %v1477_v47 = vmul.f32 1.442695, %v1454_v60 }
 0x30b   : > { %6387 = vpow2.f32 %v1477_v47 }
 0x30c   : > { %6389 = vpow2.f32 %v1473_v7  ;;  %v1782_v7 = vpop.permute.xlu2 %1781 }
 0x30e   : > { %v1497_v58 = vpop.xlane.xlu0 %1496 }
 0x30f   : > { %6391 = vrcp.f32 %v1497_v58  ;;  %1508 = vadd.xlane.f32.xlu0 %v1507_v48  ;;  %v1787_v48 = vsel %vm1596_vm9, %v1782_v7, 0 }
 0x311   : > { %v7643_v3 = vpop.eup %6387 }
 0x312   : > { %v1516_v55 = vsel %vm1034_vm8, %v7643_v3, 0.0  ;;  %v7647_v51 = vpop.eup %6389 }
 0x313   : > { %1517 = vadd.xlane.f32.xlu2 %v1516_v55  ;;  %v1510_v52 = vsel %vm1034_vm8, %v7647_v51, 0.0 }
 0x315   : > { %v6392_v57 = vpop.eup %6391 }
 0x316   : > { %v1559_v1 = vmul.f32 %v6392_v57, %v7584_v63  ;;  %v1425_v24 = vpop.xlane.xlu0 %1424 }
 0x317   : > { %v1455_v54 = vsub.f32 %v7563_v25, %v1425_v24  ;;  %1511 = vadd.xlane.f32.xlu0 %v1510_v52 }
 0x318   : > { %v1575_v4 = vpack.c.bf16 %v1559_v1, %v1559_v1 }
 0x319   : > { %v1479_v10 = vmul.f32 1.442695, %v1455_v54 }
 0x31a   : > { %6092 = vmatmul.msk.bf16.vlgmr.msrb.gmra.mxu2 %vm1034_vm8, %v1575_v4 }
 0x31b   : > { %6393 = vpow2.f32 %v1479_v10  ;;  %1775 = vmatpush.bf16.msrb.mxu2 %v1766_v33 }
 0x320   : > { %v1500_v12 = vpop.xlane.xlu1 %1499 }
 0x321   : > { %v7656_v50 = vpop.eup %6393  ;;  %6395 = vrcp.f32 %v1500_v12 }
 0x322   : > { %v1519_v63 = vsel %vm1034_vm8, %v7656_v50, 0.0 }
 0x323   : > { %1520 = vadd.xlane.f32.xlu2 %v1519_v63 }
 0x327   : > { %v6396_v40 = vpop.eup %6395 }
 0x328   : > { %v1560_v25 = vmul.f32 %v6396_v40, %v7594_v21  ;;  %v1428_v60 = vpop.xlane.xlu1 %1427 }
 0x329   : > { %v1456_v47 = vsub.f32 %v7569_v49, %v1428_v60 }
 0x32a   : > { %v1576_v29 = vpack.c.bf16 %v1560_v25, %v1560_v25 }
 0x32b   : > { %v1481_v58 = vmul.f32 1.442695, %v1456_v47 }
 0x32c   : > { %6093 = vmatmul.msk.bf16.vlgmr.msrb.gmra.mxu3 %vm1034_vm8, %v1576_v29 }
 0x32d   : > { %6397 = vpow2.f32 %v1481_v58  ;;  %1796 = vmatpush.bf16.msrb.mxu3 %v1787_v48 }
 0x330   : > { %v1437_v55 = vpop.xlane.xlu1 %1436 }
 0x331   : > { %v1459_v57 = vsub.f32 %v7578_v32, %v1437_v55 }
 0x333   : > { %v7665_v1 = vpop.eup %6397  ;;  %v1487_v24 = vmul.f32 1.442695, %v1459_v57 }
 0x334   : > { %v1522_v21 = vsel %vm1034_vm8, %v7665_v1, 0.0 }
 0x335   : > { %6399 = vpow2.f32 %v1487_v24  ;;  %1523 = vadd.xlane.f32.xlu0 %v1522_v21 }
 0x33b   : > { %v7669_v49 = vpop.eup %6399  ;;  %v1431_v52 = vpop.xlane.xlu2 %1430 }
 0x33c   : > { %v1457_v54 = vsub.f32 %v7576_v61, %v1431_v52  ;;  %v1531_v4 = vsel %vm1034_vm8, %v7669_v49, 0.0 }
 0x33d   : > { %1532 = vadd.xlane.f32.xlu1 %v1531_v4 }
 0x33e   : > { %v1483_v10 = vmul.f32 1.442695, %v1457_v54 }
 0x340   : > { %6401 = vpow2.f32 %v1483_v10 }
 0x343   : > { %v1503_v32 = vpop.xlane.xlu2 %1502 }
 0x344   : > { %6403 = vrcp.f32 %v1503_v32 }
 0x346   : > { %v7674_v33 = vpop.eup %6401 }
 0x347   : > { %v1525_v12 = vsel %vm1034_vm8, %v7674_v33, 0.0 }
 0x348   : > { %1526 = vadd.xlane.f32.xlu2 %v1525_v12 }
 0x34a   : > { %v6404_v63 = vpop.eup %6403 }
 0x34b   : > { %v1561_v40 = vmul.f32 %v6404_v63, %v7606_v59  ;;  %v1440_v61 = vpop.xlane.xlu2 %1439 }
 0x34d   : > { %v1577_v25 = vpack.c.bf16 %v1561_v40, %v1561_v40 }
 0x34f   : > { %6094 = vmatmul.msk.bf16.vlgmr.msra.gmra.mxu0 %vm1034_vm8, %v1577_v25 }
 0x356   : > { %1802 = vrot.lane.b32.xlu1 %v7458_v36, %s6903_s17 }
 0x360   : > { %1823 = vrot.lane.b32.xlu2 %v7469_v46, %s6903_s17 }
 0x365   : > { %v1446_v7 = vpop.xlane.xlu1 %1445 }
 0x366   : > { %v1462_v47 = vsub.f32 %v7617_v8, %v1446_v7 }
 0x368   : > { %1886 = vrot.lane.b32.xlu2 %v7502_v28, %s6903_s17  ;;  %v1493_v29 = vmul.f32 1.442695, %v1462_v47  ;;  %v1460_v28 = vsub.f32 %v7582_v5, %v1440_v61 }
 0x36a   : > { %v1506_v60 = vpop.xlane.xlu0 %1505  ;;  %v1489_v24 = vmul.f32 1.442695, %v1460_v28 }
 0x36b   : > { %6405 = vrcp.f32 %v1506_v60  ;;  %v1850_v60 = vsel %vm1596_vm9, %v7629_v0, 0 }
 0x370   : > { %1907 = vrot.lane.b32.xlu2 %v7494_v53, %s6903_s17 }
 0x371   : > { %v6406_v59 = vpop.eup %6405 }
 0x372   : > { %v1562_v58 = vmul.f32 %v6406_v59, %v7622_v9  ;;  %v1434_v36 = vpop.xlane.xlu0 %1433  ;;  %v1515_v48 = vpop.xlane.xlu2 %1514 }
 0x373   : > { %v1458_v46 = vsub.f32 %v7608_v62, %v1434_v36  ;;  %6407 = vrcp.f32 %v1515_v48 }
 0x374   : > { %v1578_v55 = vpack.c.bf16 %v1562_v58, %v1562_v58  ;;  %6409 = vpow2.f32 %v1493_v29 }
 0x375   : > { %v1485_v57 = vmul.f32 1.442695, %v1458_v46 }
 0x376   : > { %6095 = vmatmul.msk.bf16.vlgmr.msra.gmra.mxu1 %vm1034_vm8, %v1578_v55 }
 0x377   : > { %6411 = vpow2.f32 %v1485_v57 }
 0x378   : > { %6413 = vpow2.f32 %v1489_v24 }
 0x379   : > { %v6408_v8 = vpop.eup %6407 }
 0x37a   : > { %v1565_v53 = vmul.f32 %v6408_v8, %v7626_v6  ;;  %v1443_v21 = vpop.xlane.xlu0 %1442  ;;  %v7694_v52 = vpop.eup %6409 }
 0x37b   : > { %v1540_v62 = vsel %vm1034_vm8, %v7694_v52, 0.0 }
 0x37c   : > { %v1581_v9 = vpack.c.bf16 %v1565_v53, %v1565_v53  ;;  %v1461_v53 = vsub.f32 %v7614_v56, %v1443_v21 }
 0x37d   : > { %v7696_v54 = vpop.eup %6411 }
 0x37e   : > { %6098 = vmatmul.msk.bf16.vlgmr.msrb.gmra.mxu0 %vm1034_vm8, %v1581_v9  ;;  %v1528_v5 = vsel %vm1034_vm8, %v7696_v54, 0.0  ;;  %v7703_v10 = vpop.eup %6413  ;;  %v1491_v9 = vmul.f32 1.442695, %v1461_v53 }
 0x37f   : > { %1529 = vadd.xlane.f32.xlu0 %v1528_v5  ;;  %v1534_v32 = vsel %vm1034_vm8, %v7703_v10, 0.0 }
 0x380   : > { %1541 = vadd.xlane.f32.xlu1 %v1540_v62 }
 0x382   : > { %v1509_v4 = vpop.xlane.xlu0 %1508 }
 0x383   : > { %6415 = vrcp.f32 %v1509_v4 }
 0x386   : > { %v1518_v6 = vpop.xlane.xlu2 %1517 }
 0x387   : > { %6417 = vrcp.f32 %v1518_v6  ;;  %1535 = vadd.xlane.f32.xlu0 %v1534_v32 }
 0x389   : > { %v6416_v12 = vpop.eup %6415 }
 0x38a   : > { %v1563_v63 = vmul.f32 %v6416_v12, %v7639_v22  ;;  %v1512_v40 = vpop.xlane.xlu0 %1511 }
 0x38b   : > { %6419 = vrcp.f32 %v1512_v40 }
 0x38c   : > { %v1579_v25 = vpack.c.bf16 %v1563_v63, %v1563_v63 }
 0x38d   : > { %v6418_v61 = vpop.eup %6417 }
 0x38e   : > { %v1566_v7 = vmul.f32 %v6418_v61, %v7643_v3  ;;  %6096 = vmatmul.msk.bf16.vlgmr.msra.gmra.mxu2 %vm1034_vm8, %v1579_v25 }
 0x38f   : > { %1859 = vmatpush.bf16.msra.mxu2 %v1850_v60 }
 0x390   : > { %v1582_v47 = vpack.c.bf16 %v1566_v7, %v1566_v7 }
 0x391   : > { %v6420_v59 = vpop.eup %6419 }
 0x392   : > { %v1564_v29 = vmul.f32 %v6420_v59, %v7647_v51  ;;  %6099 = vmatmul.msk.bf16.vlgmr.msrb.gmra.mxu1 %vm1034_vm8, %v1582_v47 }
 0x394   : > { %v1580_v58 = vpack.c.bf16 %v1564_v29, %v1564_v29 }
 0x396   : > { %v1521_v22 = vpop.xlane.xlu2 %1520  ;;  %6097 = vmatmul.msk.bf16.vlgmr.msra.gmra.mxu3 %vm1034_vm8, %v1580_v58 }
 0x397   : > { %6421 = vrcp.f32 %v1521_v22 }
 0x39b   : > { %1865 = vrot.lane.b32.xlu0 %v7443_v11, %s6903_s17 }
 0x39d   : > { %v6422_v0 = vpop.eup %6421  ;;  %v7717_v36 = vpop.f32.mrf.mxu2 }
 0x39e   : > { %v1567_v3 = vmul.f32 %v6422_v0, %v7656_v50 }
 0x3a0   : > { %v1583_v48 = vpack.c.bf16 %v1567_v3, %v1567_v3  ;;  %v793_v3 = vld [vmem:[#allocation8 + $0x4] sm:$0xf] }
 0x3a2   : > { %6100 = vmatmul.msk.bf16.vlgmr.msrb.gmra.mxu2 %vm1034_vm8, %v1583_v48 }
 0x3a5   : > { %v1611_v46 = vpop.f32.mrf.mxu2 }
 0x3a8   : > { %v1524_v51 = vpop.xlane.xlu0 %1523 }
 0x3a9   : > { %6423 = vrcp.f32 %v1524_v51  ;;  %v1939_v51 = vsel %vm1596_vm9, %v793_v3, 0 }
 0x3aa   : > { %1948 = vmatpush.bf16.msrb.mxu2 %v1939_v51 }
 0x3af   : > { %v6424_v55 = vpop.eup %6423  ;;  %v7721_v28 = vpop.f32.mrf.mxu3 }
 0x3b0   : > { %v1568_v57 = vmul.f32 %v6424_v55, %v7665_v1  ;;  %v1928_v8 = vpack.c.bf16 %v7721_v28, %v7717_v36  ;;  %v1533_v11 = vpop.xlane.xlu1 %1532 }
 0x3b1   : > { %6425 = vrcp.f32 %v1533_v11 }
 0x3b2   : > { %v1584_v24 = vpack.c.bf16 %v1568_v57, %v1568_v57  ;;  %6427 = vpow2.f32 %v1491_v9 }
 0x3b4   : > { %6101 = vmatmul.msk.bf16.vlgmr.msrb.gmra.mxu3 %vm1034_vm8, %v1584_v24 }
 0x3b7   : > { %v6426_v50 = vpop.eup %6425  ;;  %v1632_v5 = vpop.f32.mrf.mxu3 }
 0x3b8   : > { %v1571_v62 = vmul.f32 %v6426_v50, %v7669_v49  ;;  %v7730_v1 = vpop.eup %6427  ;;  %v792_v5 = vld [vmem:[#allocation8] sm:$0xf] }
 0x3b9   : > { %v1537_v56 = vsel %vm1034_vm8, %v7730_v1, 0.0 }
 0x3ba   : > { %v1587_v4 = vpack.c.bf16 %v1571_v62, %v1571_v62 }
 0x3bb   : > { %v1527_v6 = vpop.xlane.xlu2 %1526 }
 0x3bc   : > { %6104 = vmatmul.msk.bf16.vlgmr.msra.gmra.mxu2 %vm1034_vm8, %v1587_v4  ;;  %6429 = vrcp.f32 %v1527_v6  ;;  %v1967_v6 = vsel %vm1596_vm9, %v792_v5, 0 }
 0x3c2   : > { %v6430_v12 = vpop.eup %6429 }
 0x3c3   : > { %v1824_v32 = vpop.permute.xlu2 %1823  ;;  %v1569_v21 = vmul.f32 %v6430_v12, %v7674_v33 }
 0x3c4   : > { %v1829_v63 = vsel %vm1596_vm9, %v1824_v32, 0 }
 0x3c5   : > { %1838 = vmatpush.bf16.msra.mxu1 %v1829_v63  ;;  %1538 = vadd.xlane.f32.xlu0 %v1537_v56  ;;  %v1585_v25 = vpack.c.bf16 %v1569_v21, %v1569_v21 }
 0x3c8   : > { %v1803_v49 = vpop.permute.xlu1 %1802 }
 0x3c9   : > { %v1808_v40 = vsel %vm1596_vm9, %v1803_v49, 0 }
 0x3ca   : > { %1817 = vmatpush.bf16.msra.mxu0 %v1808_v40 }
 0x3cb   : > { %v1887_v61 = vpop.permute.xlu2 %1886 }
 0x3cc   : > { %v1892_v60 = vsel %vm1596_vm9, %v1887_v61, 0  ;;  %v1651_v7 = vpop.f32.mrf.mxu0 }
 0x3cd   : > { %6102 = vmatmul.msk.bf16.vlgmr.msra.gmra.mxu0 %vm1034_vm8, %v1585_v25 }
 0x3ce   : > { %1901 = vmatpush.bf16.msrb.mxu0 %v1892_v60  ;;  %v794_v60 = vld [vmem:[#allocation8 + $0x8] sm:$0xf] }
 0x3d3   : > { %v1908_v47 = vpop.permute.xlu2 %1907 }
 0x3d4   : > { %v1913_v59 = vsel %vm1596_vm9, %v1908_v47, 0  ;;  %v1653_v29 = vpop.f32.mrf.mxu0  ;;  %v1997_v47 = vsel %vm1596_vm9, %v794_v60, 0 }
 0x3d5   : > { %1922 = vmatpush.bf16.msrb.mxu1 %v1913_v59  ;;  %2006 = vmatpush.bf16.msra.mxu0 %v1997_v47 }
 0x3f2   : > { %v1530_v58 = vpop.xlane.xlu0 %1529 }
 0x3f3   : > { %6431 = vrcp.f32 %v1530_v58  ;;  %v1672_v33 = vpop.f32.mrf.mxu1  ;;  %v1542_v57 = vpop.xlane.xlu1 %1541 }
 0x3f4   : > { %6433 = vrcp.f32 %v1542_v57  ;;  %v1929_v29 = vpack.c.bf16 %v1672_v33, %v1651_v7  ;;  %v795_v7 = vld [vmem:[#allocation8 + $0xc] sm:$0xf] }
 0x3f5   : > { %v2031_v33 = vsel %vm1596_vm9, %v795_v7, 0  ;;  %v6597_v7 = vld [vmem:[%s7163_s13 + $0x10] sm:$0xf] }
 0x3f9   : > { %v6432_v22 = vpop.eup %6431 }
 0x3fa   : > { %v1570_v0 = vmul.f32 %v6432_v22, %v7696_v54  ;;  %v1536_v11 = vpop.xlane.xlu0 %1535  ;;  %v6434_v53 = vpop.eup %6433 }
 0x3fb   : > { %v1674_v48 = vpop.f32.mrf.mxu1  ;;  %v1735_v46 = vpop.f32.mrf.mxu0  ;;  %6435 = vrcp.f32 %v1536_v11  ;;  %v1574_v50 = vmul.f32 %v6434_v53, %v7694_v52 }
 0x3fc   : > { %v1586_v55 = vpack.c.bf16 %v1570_v0, %v1570_v0 }
 0x3fd   : > { %v1590_v54 = vpack.c.bf16 %v1574_v50, %v1574_v50 }
 0x3fe   : > { %6103 = vmatmul.msk.bf16.vlgmr.msra.gmra.mxu1 %vm1034_vm8, %v1586_v55 }
 0x3ff   : > { %2040 = vmatpush.bf16.msra.mxu1 %v2031_v33 }
 0x401   : > { %v6436_v9 = vpop.eup %6435 }
 0x402   : > { %v1572_v62 = vmul.f32 %v6436_v9, %v7703_v10 }
 0x403   : > { %v1737_v24 = vpop.f32.mrf.mxu0 }
 0x404   : > { %v1588_v63 = vpack.c.bf16 %v1572_v62, %v1572_v62 }
 0x40d   : > { %v1866_v4 = vpop.permute.xlu0 %1865 }
 0x40e   : > { %v1871_v32 = vsel %vm1596_vm9, %v1866_v4, 0  ;;  %6107 = vmatmul.msk.bf16.vlgmr.msrb.gmra.mxu1 %vm1034_vm8, %v1590_v54 }
 0x40f   : > { %v1756_v12 = vpop.f32.mrf.mxu1  ;;  %1880 = vmatpush.bf16.msra.mxu3 %v1871_v32 }
 0x410   : > { %v1931_v61 = vpack.c.bf16 %v1756_v12, %v1735_v46 }
 0x411   : > { %v1693_v56 = vpop.f32.mrf.mxu2 }
 0x412   : > { %6105 = vmatmul.msk.bf16.vlgmr.msra.gmra.mxu3 %vm1034_vm8, %v1588_v63 }
 0x413   : > { %1976 = vmatpush.bf16.msrb.mxu3 %v1967_v6 }
 0x417   : > { %v1758_v52 = vpop.f32.mrf.mxu1 }
 0x419   : > { %v1695_v21 = vpop.f32.mrf.mxu2  ;;  %v1714_v49 = vpop.f32.mrf.mxu3 }
 0x41a   : > { %v1930_v40 = vpack.c.bf16 %v1714_v49, %v1693_v56 }
 0x41c   : > { %6108 = vmatmul.msk.bf16.vlgmr.msrb.gmra.mxu2 %vm1034_vm8, %v1930_v40 }
 0x421   : > { %v1716_v10 = vpop.f32.mrf.mxu3 }
 0x422   : > { %6110 = vmatmul.msk.bf16.vlgmr.msrb.gmra.mxu3 %vm1034_vm8, %v1928_v8 }
 0x425   : > { %v1777_v25 = vpop.f32.mrf.mxu2 }
 0x42c   : > { %6109 = vmatmul.msk.bf16.gmra.mxu2 %vm1034_vm8, %v1931_v61 }
 0x42d   : > { %v1779_v59 = vpop.f32.mrf.mxu2 }
 0x432   : > { %6111 = vmatmul.msk.bf16.gmra.mxu3 %vm1034_vm8, %v1929_v29 }
 0x437   : > { %v1798_v58 = vpop.f32.mrf.mxu3 }
 0x438   : > { %v1539_v22 = vpop.xlane.xlu0 %1538  ;;  %v1988_v51 = vpack.c.bf16 %v1798_v58, %v1777_v25 }
 0x439   : > { %6437 = vrcp.f32 %v1539_v22 }
 0x43f   : > { %v6438_v0 = vpop.eup %6437  ;;  %v1800_v3 = vpop.f32.mrf.mxu3 }
 0x440   : > { %v1861_v36 = vpop.f32.mrf.mxu2  ;;  %v1573_v28 = vmul.f32 %v6438_v0, %v7730_v1  ;;  %v6593_v0 = vld [vmem:[%s7163_s13] sm:$0xf] }
 0x442   : > { %v1589_v8 = vpack.c.bf16 %v1573_v28, %v1573_v28  ;;  %v6594_v28 = vld [vmem:[%s7163_s13 + $0x4] sm:$0xf] }
 0x444   : > { %6106 = vmatmul.msk.bf16.vlgmr.msrb.gmra.mxu0 %vm1034_vm8, %v1589_v8 }
 0x448   : > { %v1863_v48 = vpop.f32.mrf.mxu2 }
 0x449   : > { %v6595_v48 = vld [vmem:[%s7163_s13 + $0x8] sm:$0xf] }
 0x44a   : > { %v1819_v46 = vpop.f32.mrf.mxu0 }
 0x452   : > { %v1821_v55 = vpop.f32.mrf.mxu0 }
 0x454   : > { %6112 = vmatmul.msk.bf16.vlgmr.msra.gmra.mxu0 %vm1034_vm8, %v1988_v51  ;;  %v6596_v51 = vld [vmem:[%s7163_s13 + $0xc] sm:$0xf] }
 0x47b   : > { %v1840_v57 = vpop.f32.mrf.mxu1 }
 0x47c   : > { %v1989_v11 = vpack.c.bf16 %v1840_v57, %v1819_v46 }
 0x47e   : > { %6113 = vmatmul.msk.bf16.gmra.mxu0 %vm1034_vm8, %v1989_v11  ;;  %v6598_v11 = vld [vmem:[%s7163_s13 + $0x14] sm:$0xf] }
 0x483   : > { %v1842_v24 = vpop.f32.mrf.mxu1 }
 0x48b   : > { %v1924_v53 = vpop.f32.mrf.mxu1 }
 0x493   : > { %v1926_v1 = vpop.f32.mrf.mxu1 }
 0x495   : > { %v1882_v50 = vpop.f32.mrf.mxu3 }
 0x496   : > { %v2022_v9 = vpack.c.bf16 %v1882_v50, %v1861_v36  ;;  %v7768_v36 = vld [vmem:[%s9562_s4] ss:$0 sm:$0xff]  ;;  %v6600_v50 = vld [vmem:[%s7163_s13 + $0x1c] sm:$0xf] }
 0x498   : > { %6114 = vmatmul.msk.bf16.vlgmr.msra.gmra.mxu1 %vm1034_vm8, %v2022_v9 }
 0x49d   : > { %v1884_v5 = vpop.f32.mrf.mxu3 }
 0x49f   : > { %v1950_v32 = vpop.f32.mrf.mxu2 }
 0x4a5   : > { %v1978_v6 = vpop.f32.mrf.mxu3 }
 0x4a6   : > { %v1979_v63 = vadd.f32 %v1978_v6, %v1950_v32 }
 0x4a7   : > { %v1952_v49 = vpop.f32.mrf.mxu2 }
 0x4ad   : > { %v1980_v56 = vpop.f32.mrf.mxu3 }
 0x4ae   : > { %v1981_v10 = vadd.f32 %v1980_v56, %v1952_v49 }
 0x4c1   : > { %v1903_v54 = vpop.f32.mrf.mxu0 }
 0x4c2   : > { %v2023_v62 = vpack.c.bf16 %v1924_v53, %v1903_v54  ;;  %v6599_v53 = vld [vmem:[%s7163_s13 + $0x18] sm:$0xf]  ;;  %s9630_s13 = sld [smem:[#allocation36_spill]] }
 0x4c4   : > { %6115 = vmatmul.msk.bf16.gmra.mxu1 %vm1034_vm8, %v2023_v62 }
 0x4c9   : > { %v1905_v4 = vpop.f32.mrf.mxu0 }
 0x4d1   : > { %v2008_v12 = vpop.f32.mrf.mxu0 }
 0x4d2   : > { %v2018_v52 = vadd.f32 %v2008_v12, %v1979_v63 }
 0x4d9   : > { %v2010_v25 = vpop.f32.mrf.mxu0 }
 0x4da   : > { %v2019_v57 = vadd.f32 %v2010_v25, %v1981_v10 }
 0x515   : > { %v2042_v21 = vpop.f32.mrf.mxu1 }
 0x516   : > { %v2052_v40 = vadd.f32 %v2042_v21, %v2018_v52 }
 0x518   : > { %v2060_v61 = vrot.slane %v2052_v40, 1  ;;  %v2061_v60 = vrot.slane %v2052_v40, 2  ;;  %v2062_v47 = vrot.slane %v2052_v40, 3  ;;  %v2063_v59 = vrot.slane %v2052_v40, 4 }
 0x519   : > { %v2064_v29 = vrot.slane %v2052_v40, 5  ;;  %v2065_v58 = vrot.slane %v2052_v40, 6  ;;  %v2066_v22 = vrot.slane %v2052_v40, 7  ;;  %v2120_v3 = vadd.f32 %v6593_v0, %v2052_v40 }
 0x51a   : > { %v2121_v8 = vadd.f32 %v6594_v28, %v2060_v61  ;;  %v2122_v46 = vadd.f32 %v6595_v48, %v2061_v60  ;;  %v2123_v55 = vadd.f32 %v6596_v51, %v2062_v47  ;;  %v2124_v33 = vadd.f32 %v6597_v7, %v2063_v59 }
 0x51b   : > { %v2125_v24 = vadd.f32 %v6598_v11, %v2064_v29  ;;  %v2126_v1 = vadd.f32 %v6599_v53, %v2065_v58  ;;  %v2127_v9 = vadd.f32 %v6600_v50, %v2066_v22  ;;  %v7790_v32 = vadd.f32 %v7768_v36, %v2120_v3 }
 0x51c   : > { %v7778_v5 = vadd.f32 %v7768_v36, %v2121_v8  ;;  %v7781_v54 = vadd.f32 %v7768_v36, %v2122_v46  ;;  %v7784_v62 = vadd.f32 %v7768_v36, %v2123_v55  ;;  %v7787_v4 = vadd.f32 %v7768_v36, %v2124_v33 }
 0x51d   : > { %v2044_v6 = vpop.f32.mrf.mxu1  ;;  %v7793_v12 = vadd.f32 %v7768_v36, %v2125_v24  ;;  %v7796_v63 = vadd.f32 %v7768_v36, %v2126_v1  ;;  %v7799_v52 = vadd.f32 %v7768_v36, %v2127_v9 }
 0x51e   : > { %v2053_v56 = vadd.f32 %v2044_v6, %v2019_v57  ;;  %v2222_v21 = vrot.slane %v7778_v5, 7  ;;  %v2224_v49 = vrot.slane %v7781_v54, 6  ;;  %v2226_v40 = vrot.slane %v7784_v62, 5 }
 0x51f   : > { %v2228_v10 = vrot.slane %v7787_v4, 4  ;;  %v2230_v25 = vrot.slane %v7793_v12, 3  ;;  %v2232_v61 = vrot.slane %v7796_v63, 2  ;;  %v2234_v11 = vrot.slane %v7799_v52, 1 }
 0x520   : > { %v2223_v60 = vsel %vm896_vm0, %v2222_v21, %v7790_v32  ;;  %v2067_v47 = vrot.slane %v2053_v56, 1  ;;  %v2068_v59 = vrot.slane %v2053_v56, 2  ;;  %v2069_v29 = vrot.slane %v2053_v56, 3 }
 0x521   : > { %v2225_v58 = vsel %vm899_vm1, %v2224_v49, %v2223_v60  ;;  %v2070_v22 = vrot.slane %v2053_v56, 4  ;;  %v2071_v0 = vrot.slane %v2053_v56, 5  ;;  %v2072_v3 = vrot.slane %v2053_v56, 6 }
 0x522   : > { %v2227_v28 = vsel %vm902_vm2, %v2226_v40, %v2225_v58  ;;  %v2073_v8 = vrot.slane %v2053_v56, 7  ;;  %v2128_v48 = vadd.f32 %v2053_v56, %v7212_v13  ;;  %v2129_v46 = vadd.f32 %v2067_v47, %v7215_v14 }
 0x523   : > { %v2229_v51 = vsel %vm905_vm3, %v2228_v10, %v2227_v28  ;;  %v2130_v55 = vadd.f32 %v2068_v59, %v7218_v15  ;;  %v2131_v7 = vadd.f32 %v2069_v29, %v7221_v16  ;;  %v2132_v33 = vadd.f32 %v2070_v22, %v7224_v17  ;;  %v1983_v28 = vpop.f32.mrf.mxu3 }
 0x524   : > { %v2231_v57 = vsel %vm908_vm4, %v2230_v25, %v2229_v51  ;;  %v2133_v24 = vadd.f32 %v2071_v0, %v7227_v18  ;;  %v2134_v53 = vadd.f32 %v2072_v3, %v7230_v19  ;;  %v2135_v14 = vadd.f32 %v2073_v8, %v7233_v20  ;;  %v1955_v8 = vpop.f32.mrf.mxu2 }
 0x525   : > { %v2233_v13 = vsel %vm911_vm5, %v2232_v61, %v2231_v57  ;;  %v7824_v1 = vadd.f32 %v7768_v36, %v2129_v46  ;;  %v7827_v15 = vadd.f32 %v7768_v36, %v2130_v55  ;;  %v7831_v17 = vadd.f32 %v7768_v36, %v2131_v7 }
 0x526   : > { %v2235_v16 = vsel %vm914_vm6, %v2234_v11, %v2233_v13  ;;  %v7834_v50 = vadd.f32 %v7768_v36, %v2132_v33  ;;  %v7838_v19 = vadd.f32 %v7768_v36, %v2128_v48  ;;  %v7841_v20 = vadd.f32 %v7768_v36, %v2133_v24  ;;  %v2013_v48 = vpop.f32.mrf.mxu0 }
 0x527   : > { %v2282_v18 = vsel %vm972_vm7, %v2235_v16, 0.0  ;;  %v2236_v9 = vrot.slane %v7824_v1, 7  ;;  %v7845_v6 = vadd.f32 %v7768_v36, %v2134_v53  ;;  %v2238_v56 = vrot.slane %v7827_v15, 6 }
 0x528   : > { %2283 = vadd.xlane.f32.xlu2 %v2282_v18  ;;  %v7849_v21 = vadd.f32 %v7768_v36, %v2135_v14  ;;  %v2240_v40 = vrot.slane %v7831_v17, 5  ;;  %v2242_v25 = vrot.slane %v7834_v50, 4  ;;  %v2244_v60 = vrot.slane %v7841_v20, 3 }
 0x529   : > { %v2237_v49 = vsel %vm896_vm0, %v2236_v9, %v7838_v19  ;;  %v2246_v59 = vrot.slane %v7845_v6, 2  ;;  %v1984_v46 = vadd.f32 %v1983_v28, %v1955_v8 }
 0x52a   : > { %v2239_v10 = vsel %vm899_vm1, %v2238_v56, %v2237_v49  ;;  %v2248_v58 = vrot.slane %v7849_v21, 1 }
 0x52b   : > { %v2241_v61 = vsel %vm902_vm2, %v2240_v40, %v2239_v10  ;;  %v1985_v51 = vpop.f32.mrf.mxu3  ;;  %v2020_v55 = vadd.f32 %v2013_v48, %v1984_v46 }
 0x52c   : > { %v2243_v47 = vsel %vm905_vm3, %v2242_v25, %v2241_v61  ;;  %v1957_v33 = vpop.f32.mrf.mxu2 }
 0x52d   : > { %v2245_v29 = vsel %vm908_vm4, %v2244_v60, %v2243_v47  ;;  %v1986_v11 = vadd.f32 %v1985_v51, %v1957_v33 }
 0x52e   : > { %v2247_v22 = vsel %vm911_vm5, %v2246_v59, %v2245_v29  ;;  %v2015_v24 = vpop.f32.mrf.mxu0 }
 0x52f   : > { %v2249_v0 = vsel %vm914_vm6, %v2248_v58, %v2247_v22  ;;  %v2021_v60 = vadd.f32 %v2015_v24, %v1986_v11 }
 0x530   : > { %v2285_v3 = vsel %vm972_vm7, %v2249_v0, 0.0 }
 0x531   : > { %2286 = vadd.xlane.f32.xlu0 %v2285_v3 }
 0x541   : > { %v2047_v7 = vpop.f32.mrf.mxu1 }
 0x542   : > { %v2054_v57 = vadd.f32 %v2047_v7, %v2020_v55 }
 0x544   : > { %v2074_v53 = vrot.slane %v2054_v57, 1  ;;  %v2075_v13 = vrot.slane %v2054_v57, 2  ;;  %v2076_v14 = vrot.slane %v2054_v57, 3  ;;  %v2077_v16 = vrot.slane %v2054_v57, 4 }
 0x545   : > { %v2078_v18 = vrot.slane %v2054_v57, 5  ;;  %v2079_v9 = vrot.slane %v2054_v57, 6  ;;  %v2080_v56 = vrot.slane %v2054_v57, 7  ;;  %v2136_v49 = vadd.f32 %v2054_v57, %v7269_v23 }
 0x546   : > { %v2137_v40 = vadd.f32 %v2074_v53, %v7274_v26  ;;  %v2138_v10 = vadd.f32 %v2075_v13, %v7277_v27  ;;  %v2139_v25 = vadd.f32 %v2076_v14, %v7282_v30  ;;  %v2140_v61 = vadd.f32 %v2077_v16, %v7285_v31 }
 0x547   : > { %v2141_v47 = vadd.f32 %v2078_v18, %v7290_v34  ;;  %v2142_v59 = vadd.f32 %v2079_v9, %v7293_v35  ;;  %v2143_v29 = vadd.f32 %v2080_v56, %v7297_v37  ;;  %v7886_v31 = vadd.f32 %v7768_v36, %v2136_v49 }
 0x548   : > { %v7874_v58 = vadd.f32 %v7768_v36, %v2137_v40  ;;  %v7877_v23 = vadd.f32 %v7768_v36, %v2138_v10  ;;  %v7880_v26 = vadd.f32 %v7768_v36, %v2139_v25  ;;  %v7883_v27 = vadd.f32 %v7768_v36, %v2140_v61 }
 0x549   : > { %v2049_v30 = vpop.f32.mrf.mxu1  ;;  %v7889_v34 = vadd.f32 %v7768_v36, %v2141_v47  ;;  %v7892_v35 = vadd.f32 %v7768_v36, %v2142_v59  ;;  %v7895_v22 = vadd.f32 %v7768_v36, %v2143_v29 }
 0x54a   : > { %v2055_v37 = vadd.f32 %v2049_v30, %v2021_v60  ;;  %v2250_v0 = vrot.slane %v7874_v58, 7  ;;  %v2252_v3 = vrot.slane %v7877_v23, 6  ;;  %v2254_v28 = vrot.slane %v7880_v26, 5 }
 0x54b   : > { %v2256_v8 = vrot.slane %v7883_v27, 4  ;;  %v2258_v48 = vrot.slane %v7889_v34, 3  ;;  %v2260_v46 = vrot.slane %v7892_v35, 2  ;;  %v2262_v25 = vrot.slane %v7895_v22, 1 }
 0x54c   : > { %v2251_v51 = vsel %vm896_vm0, %v2250_v0, %v7886_v31  ;;  %v2081_v55 = vrot.slane %v2055_v37, 1  ;;  %v2082_v7 = vrot.slane %v2055_v37, 2  ;;  %v2083_v33 = vrot.slane %v2055_v37, 3 }
 0x54d   : > { %v2253_v57 = vsel %vm899_vm1, %v2252_v3, %v2251_v51  ;;  %v2084_v11 = vrot.slane %v2055_v37, 4  ;;  %v2085_v24 = vrot.slane %v2055_v37, 5  ;;  %v2086_v53 = vrot.slane %v2055_v37, 6 }
 0x54e   : > { %v2255_v13 = vsel %vm902_vm2, %v2254_v28, %v2253_v57  ;;  %v2087_v14 = vrot.slane %v2055_v37, 7  ;;  %v2144_v16 = vadd.f32 %v2055_v37, %v7306_v41  ;;  %v2145_v18 = vadd.f32 %v2081_v55, %v7300_v38 }
 0x54f   : > { %v2257_v9 = vsel %vm905_vm3, %v2256_v8, %v2255_v13  ;;  %v2146_v56 = vadd.f32 %v2082_v7, %v7303_v39  ;;  %v2147_v49 = vadd.f32 %v2083_v33, %v7309_v42  ;;  %v2148_v40 = vadd.f32 %v2084_v11, %v7312_v43 }
 0x550   : > { %v2259_v10 = vsel %vm908_vm4, %v2258_v48, %v2257_v9  ;;  %v2149_v61 = vadd.f32 %v2085_v24, %v7315_v44  ;;  %v2150_v60 = vadd.f32 %v2086_v53, %v7318_v45  ;;  %v2151_v38 = vadd.f32 %v2087_v14, %v7326_v2 }
 0x551   : > { %v2261_v41 = vsel %vm911_vm5, %v2260_v46, %v2259_v10  ;;  %v7920_v47 = vadd.f32 %v7768_v36, %v2145_v18  ;;  %v7923_v39 = vadd.f32 %v7768_v36, %v2146_v56  ;;  %v7927_v43 = vadd.f32 %v7768_v36, %v2147_v49 }
 0x552   : > { %v2263_v42 = vsel %vm914_vm6, %v2262_v25, %v2261_v41  ;;  %v7930_v59 = vadd.f32 %v7768_v36, %v2148_v40  ;;  %v7934_v45 = vadd.f32 %v7768_v36, %v2144_v16  ;;  %v7937_v2 = vadd.f32 %v7768_v36, %v2149_v61 }
 0x553   : > { %v2288_v44 = vsel %vm972_vm7, %v2263_v42, 0.0  ;;  %v2264_v29 = vrot.slane %v7920_v47, 7  ;;  %v7941_v30 = vadd.f32 %v7768_v36, %v2150_v60  ;;  %v2266_v37 = vrot.slane %v7923_v39, 6 }
 0x554   : > { %2289 = vadd.xlane.f32.xlu0 %v2288_v44  ;;  %v7945_v0 = vadd.f32 %v7768_v36, %v2151_v38  ;;  %v2268_v28 = vrot.slane %v7927_v43, 5  ;;  %v2270_v48 = vrot.slane %v7930_v59, 4  ;;  %v2272_v51 = vrot.slane %v7937_v2, 3 }
 0x555   : > { %v2265_v3 = vsel %vm896_vm0, %v2264_v29, %v7934_v45  ;;  %v2274_v7 = vrot.slane %v7941_v30, 2  ;;  %v6904_v53 = vmov 32.0  }
 0x556   : > { %v2267_v8 = vsel %vm899_vm1, %v2266_v37, %v2265_v3  ;;  %v2276_v33 = vrot.slane %v7945_v0, 1  ;;  %6439 = vrcp.f32 %v6904_v53 }
 0x557   : > { %v2269_v46 = vsel %vm902_vm2, %v2268_v28, %v2267_v8 }
 0x558   : > { %v2271_v55 = vsel %vm905_vm3, %v2270_v48, %v2269_v46 }
 0x559   : > { %v2273_v36 = vsel %vm908_vm4, %v2272_v51, %v2271_v55 }
 0x55a   : > { %v2275_v57 = vsel %vm911_vm5, %v2274_v7, %v2273_v36 }
 0x55b   : > { %v2277_v11 = vsel %vm914_vm6, %v2276_v33, %v2275_v57 }
 0x55c   : > { %v2291_v24 = vsel %vm972_vm7, %v2277_v11, 0.0  ;;  %v6440_v13 = vpop.eup %6439 }
 0x55d   : > { %2292 = vadd.xlane.f32.xlu0 %v2291_v24  ;;  %v2295_v14 = vmul.f32 32.0, %v6440_v13  ;;  %vm2299_vm10 = vweird.f32 %v6440_v13 }
 0x55f   : > { %v2296_v16 = vsub.f32 1.0, %v2295_v14 }
 0x561   : > { %v2297_v18 = vmul.f32 %v6440_v13, %v2296_v16 }
 0x563   : > { %v2298_v9 = vadd.f32 %v6440_v13, %v2297_v18 }
 0x565   : > { %v7961_v56 = vsel %vm2299_vm10, %v6440_v13, %v2298_v9 }
 0x566   : > { %9622 = vst [vmem:[#allocation24_spill] sm:$0xff] %v7961_v56 }
 0x59b   : > { %v2284_v49 = vpop.xlane.xlu2 %2283 }
 0x59c   : > { %v2301_v40 = vmul.f32 %v7961_v56, %v2284_v49 }
 0x59e   : > { %v2309_v10 = vrot.slane %v2301_v40, 1  ;;  %v2310_v25 = vrot.slane %v2301_v40, 2  ;;  %v2311_v61 = vrot.slane %v2301_v40, 3  ;;  %v2312_v60 = vrot.slane %v2301_v40, 4 }
 0x59f   : > { %v2313_v41 = vrot.slane %v2301_v40, 5  ;;  %v2314_v38 = vrot.slane %v2301_v40, 6  ;;  %v2315_v42 = vrot.slane %v2301_v40, 7  ;;  %v7965_v44 = vsub.f32 %v7790_v32, %v2301_v40 }
 0x5a0   : > { %v7968_v29 = vsub.f32 %v7778_v5, %v2309_v10  ;;  %v7971_v37 = vsub.f32 %v7781_v54, %v2310_v25  ;;  %v7974_v3 = vsub.f32 %v7784_v62, %v2311_v61  ;;  %v7977_v28 = vsub.f32 %v7787_v4, %v2312_v60 }
 0x5a1   : > { %v7980_v8 = vsub.f32 %v7793_v12, %v2313_v41  ;;  %v7983_v48 = vsub.f32 %v7796_v63, %v2314_v38  ;;  %v7986_v32 = vsub.f32 %v7799_v52, %v2315_v42  ;;  %v2401_v51 = vmul.f32 %v7965_v44, %v7965_v44 }
 0x5a2   : > { %v2402_v5 = vmul.f32 %v7968_v29, %v7968_v29  ;;  %v2403_v54 = vmul.f32 %v7971_v37, %v7971_v37  ;;  %v2404_v62 = vmul.f32 %v7974_v3, %v7974_v3  ;;  %v2405_v4 = vmul.f32 %v7977_v28, %v7977_v28 }
 0x5a3   : > { %v2406_v12 = vmul.f32 %v7980_v8, %v7980_v8  ;;  %v2407_v63 = vmul.f32 %v7983_v48, %v7983_v48  ;;  %v2408_v52 = vmul.f32 %v7986_v32, %v7986_v32 }
 0x5a4   : > { %v2287_v46 = vpop.xlane.xlu0 %2286  ;;  %v2465_v55 = vrot.slane %v2402_v5, 7  ;;  %v2467_v7 = vrot.slane %v2403_v54, 6  ;;  %v2469_v33 = vrot.slane %v2404_v62, 5  ;;  %v2471_v57 = vrot.slane %v2405_v4, 4 }
 0x5a5   : > { %v2302_v36 = vmul.f32 %v7961_v56, %v2287_v46  ;;  %v2473_v24 = vrot.slane %v2406_v12, 3  ;;  %v2475_v53 = vrot.slane %v2407_v63, 2  ;;  %v2477_v13 = vrot.slane %v2408_v52, 1 }
 0x5a6   : > { %v2466_v11 = vsel %vm896_vm0, %v2465_v55, %v2401_v51 }
 0x5a7   : > { %v2468_v14 = vsel %vm899_vm1, %v2467_v7, %v2466_v11  ;;  %v2316_v16 = vrot.slane %v2302_v36, 1  ;;  %v2317_v18 = vrot.slane %v2302_v36, 2  ;;  %v2318_v9 = vrot.slane %v2302_v36, 3 }
 0x5a8   : > { %v2470_v49 = vsel %vm902_vm2, %v2469_v33, %v2468_v14  ;;  %v2319_v40 = vrot.slane %v2302_v36, 4  ;;  %v2320_v10 = vrot.slane %v2302_v36, 5  ;;  %v2321_v25 = vrot.slane %v2302_v36, 6 }
 0x5a9   : > { %v2472_v61 = vsel %vm905_vm3, %v2471_v57, %v2470_v49  ;;  %v2322_v60 = vrot.slane %v2302_v36, 7  ;;  %v8010_v41 = vsub.f32 %v7838_v19, %v2302_v36  ;;  %v8013_v38 = vsub.f32 %v7824_v1, %v2316_v16 }
 0x5aa   : > { %v2474_v42 = vsel %vm908_vm4, %v2473_v24, %v2472_v61  ;;  %v8017_v5 = vsub.f32 %v7827_v15, %v2317_v18  ;;  %v8020_v54 = vsub.f32 %v7831_v17, %v2318_v9  ;;  %v8023_v62 = vsub.f32 %v7834_v50, %v2319_v40 }
 0x5ab   : > { %v2476_v4 = vsel %vm911_vm5, %v2475_v53, %v2474_v42  ;;  %v8027_v12 = vsub.f32 %v7841_v20, %v2320_v10  ;;  %v8030_v19 = vsub.f32 %v7845_v6, %v2321_v25  ;;  %v8034_v63 = vsub.f32 %v7849_v21, %v2322_v60 }
 0x5ac   : > { %v2478_v1 = vsel %vm914_vm6, %v2477_v13, %v2476_v4  ;;  %v2410_v15 = vmul.f32 %v8013_v38, %v8013_v38  ;;  %v2411_v17 = vmul.f32 %v8017_v5, %v8017_v5  ;;  %v2412_v20 = vmul.f32 %v8020_v54, %v8020_v54 }
 0x5ad   : > { %v2525_v50 = vsel %vm972_vm7, %v2478_v1, 0.0  ;;  %v2413_v6 = vmul.f32 %v8023_v62, %v8023_v62  ;;  %v2409_v52 = vmul.f32 %v8010_v41, %v8010_v41  ;;  %v2414_v21 = vmul.f32 %v8027_v12, %v8027_v12 }
 0x5ae   : > { %2526 = vadd.xlane.f32.xlu1 %v2525_v50  ;;  %v2479_v46 = vrot.slane %v2410_v15, 7  ;;  %v2481_v51 = vrot.slane %v2411_v17, 6  ;;  %v2415_v55 = vmul.f32 %v8030_v19, %v8030_v19  ;;  %v2416_v7 = vmul.f32 %v8034_v63, %v8034_v63 }
 0x5af   : > { %v2483_v33 = vrot.slane %v2412_v20, 5  ;;  %v2485_v11 = vrot.slane %v2413_v6, 4  ;;  %v2487_v53 = vrot.slane %v2414_v21, 3 }
 0x5b0   : > { %v2480_v36 = vsel %vm896_vm0, %v2479_v46, %v2409_v52  ;;  %v2489_v14 = vrot.slane %v2415_v55, 2  ;;  %v2491_v18 = vrot.slane %v2416_v7, 1 }
 0x5b1   : > { %v2482_v57 = vsel %vm899_vm1, %v2481_v51, %v2480_v36 }
 0x5b2   : > { %v2484_v24 = vsel %vm902_vm2, %v2483_v33, %v2482_v57 }
 0x5b3   : > { %v2486_v13 = vsel %vm905_vm3, %v2485_v11, %v2484_v24 }
 0x5b4   : > { %v2488_v16 = vsel %vm908_vm4, %v2487_v53, %v2486_v13 }
 0x5b5   : > { %v2490_v9 = vsel %vm911_vm5, %v2489_v14, %v2488_v16 }
 0x5b6   : > { %v2492_v49 = vsel %vm914_vm6, %v2491_v18, %v2490_v9 }
 0x5b7   : > { %v2528_v40 = vsel %vm972_vm7, %v2492_v49, 0.0 }
 0x5b8   : > { %2529 = vadd.xlane.f32.xlu0 %v2528_v40 }
 0x5c7   : > { %v2290_v10 = vpop.xlane.xlu0 %2289 }
 0x5c8   : > { %v2303_v25 = vmul.f32 %v7961_v56, %v2290_v10 }
 0x5ca   : > { %v2323_v61 = vrot.slane %v2303_v25, 1  ;;  %v2324_v60 = vrot.slane %v2303_v25, 2  ;;  %v2325_v42 = vrot.slane %v2303_v25, 3  ;;  %v2326_v4 = vrot.slane %v2303_v25, 4 }
 0x5cb   : > { %v2327_v1 = vrot.slane %v2303_v25, 5  ;;  %v2328_v15 = vrot.slane %v2303_v25, 6  ;;  %v2329_v17 = vrot.slane %v2303_v25, 7  ;;  %v8063_v50 = vsub.f32 %v7886_v31, %v2303_v25 }
 0x5cc   : > { %v8066_v20 = vsub.f32 %v7874_v58, %v2323_v61  ;;  %v8069_v6 = vsub.f32 %v7877_v23, %v2324_v60  ;;  %v8072_v52 = vsub.f32 %v7880_v26, %v2325_v42  ;;  %v8075_v21 = vsub.f32 %v7883_v27, %v2326_v4 }
 0x5cd   : > { %v8078_v46 = vsub.f32 %v7889_v34, %v2327_v1  ;;  %v8081_v51 = vsub.f32 %v7892_v35, %v2328_v15  ;;  %v8084_v31 = vsub.f32 %v7895_v22, %v2329_v17  ;;  %v2417_v7 = vmul.f32 %v8063_v50, %v8063_v50 }
 0x5ce   : > { %v2418_v58 = vmul.f32 %v8066_v20, %v8066_v20  ;;  %v2419_v23 = vmul.f32 %v8069_v6, %v8069_v6  ;;  %v2420_v26 = vmul.f32 %v8072_v52, %v8072_v52  ;;  %v2421_v27 = vmul.f32 %v8075_v21, %v8075_v21 }
 0x5cf   : > { %v2422_v34 = vmul.f32 %v8078_v46, %v8078_v46  ;;  %v2423_v35 = vmul.f32 %v8081_v51, %v8081_v51  ;;  %v2424_v22 = vmul.f32 %v8084_v31, %v8084_v31 }
 0x5d0   : > { %v2293_v55 = vpop.xlane.xlu0 %2292  ;;  %v2493_v36 = vrot.slane %v2418_v58, 7  ;;  %v2495_v33 = vrot.slane %v2419_v23, 6  ;;  %v2497_v11 = vrot.slane %v2420_v26, 5  ;;  %v2499_v24 = vrot.slane %v2421_v27, 4 }
 0x5d1   : > { %v2304_v57 = vmul.f32 %v7961_v56, %v2293_v55  ;;  %v2501_v13 = vrot.slane %v2422_v34, 3  ;;  %v2503_v14 = vrot.slane %v2423_v35, 2  ;;  %v2505_v16 = vrot.slane %v2424_v22, 1 }
 0x5d2   : > { %v2494_v53 = vsel %vm896_vm0, %v2493_v36, %v2417_v7 }
 0x5d3   : > { %v2496_v18 = vsel %vm899_vm1, %v2495_v33, %v2494_v53  ;;  %v2330_v9 = vrot.slane %v2304_v57, 1  ;;  %v2331_v49 = vrot.slane %v2304_v57, 2  ;;  %v2332_v40 = vrot.slane %v2304_v57, 3 }
 0x5d4   : > { %v2498_v10 = vsel %vm902_vm2, %v2497_v11, %v2496_v18  ;;  %v2333_v25 = vrot.slane %v2304_v57, 4  ;;  %v2334_v61 = vrot.slane %v2304_v57, 5  ;;  %v2335_v60 = vrot.slane %v2304_v57, 6 }
 0x5d5   : > { %v2500_v42 = vsel %vm905_vm3, %v2499_v24, %v2498_v10  ;;  %v2336_v4 = vrot.slane %v2304_v57, 7  ;;  %v8108_v1 = vsub.f32 %v7934_v45, %v2304_v57  ;;  %v8111_v15 = vsub.f32 %v7920_v47, %v2330_v9 }
 0x5d6   : > { %v2502_v17 = vsel %vm908_vm4, %v2501_v13, %v2500_v42  ;;  %v8115_v58 = vsub.f32 %v7923_v39, %v2331_v49  ;;  %v8118_v23 = vsub.f32 %v7927_v43, %v2332_v40  ;;  %v8121_v26 = vsub.f32 %v7930_v59, %v2333_v25 }
 0x5d7   : > { %v2504_v27 = vsel %vm911_vm5, %v2503_v14, %v2502_v17  ;;  %v8125_v34 = vsub.f32 %v7937_v2, %v2334_v61  ;;  %v8128_v45 = vsub.f32 %v7941_v30, %v2335_v60  ;;  %v8132_v35 = vsub.f32 %v7945_v0, %v2336_v4 }
 0x5d8   : > { %v2506_v47 = vsel %vm914_vm6, %v2505_v16, %v2504_v27  ;;  %v2426_v39 = vmul.f32 %v8111_v15, %v8111_v15  ;;  %v2427_v43 = vmul.f32 %v8115_v58, %v8115_v58  ;;  %v2428_v2 = vmul.f32 %v8118_v23, %v8118_v23 }
 0x5d9   : > { %v2531_v59 = vsel %vm972_vm7, %v2506_v47, 0.0  ;;  %v2429_v30 = vmul.f32 %v8121_v26, %v8121_v26  ;;  %v2425_v22 = vmul.f32 %v8108_v1, %v8108_v1  ;;  %v2430_v0 = vmul.f32 %v8125_v34, %v8125_v34 }
 0x5da   : > { %2532 = vadd.xlane.f32.xlu1 %v2531_v59  ;;  %v2507_v55 = vrot.slane %v2426_v39, 7  ;;  %v2509_v7 = vrot.slane %v2427_v43, 6  ;;  %v2431_v36 = vmul.f32 %v8128_v45, %v8128_v45  ;;  %v2432_v33 = vmul.f32 %v8132_v35, %v8132_v35 }
 0x5db   : > { %v2511_v11 = vrot.slane %v2428_v2, 5  ;;  %v2513_v53 = vrot.slane %v2429_v30, 4  ;;  %v2515_v14 = vrot.slane %v2430_v0, 3  ;;  %v8164_v0 = vld [vmem:[%s9563_s5] ss:$0 sm:$0xff] }
 0x5dc   : > { %v2508_v57 = vsel %vm896_vm0, %v2507_v55, %v2425_v22  ;;  %v2517_v18 = vrot.slane %v2431_v36, 2  ;;  %v2519_v49 = vrot.slane %v2432_v33, 1 }
 0x5dd   : > { %v2510_v24 = vsel %vm899_vm1, %v2509_v7, %v2508_v57 }
 0x5de   : > { %v2512_v13 = vsel %vm902_vm2, %v2511_v11, %v2510_v24  ;;  %v8169_v24 = vld [vmem:[%s9564_s6] ss:$0 sm:$0xff] }
 0x5df   : > { %v2514_v16 = vsel %vm905_vm3, %v2513_v53, %v2512_v13 }
 0x5e0   : > { %v2516_v9 = vsel %vm908_vm4, %v2515_v14, %v2514_v16 }
 0x5e1   : > { %v2518_v40 = vsel %vm911_vm5, %v2517_v18, %v2516_v9 }
 0x5e2   : > { %v2520_v10 = vsel %vm914_vm6, %v2519_v49, %v2518_v40 }
 0x5e3   : > { %v2534_v25 = vsel %vm972_vm7, %v2520_v10, 0.0 }
 0x5e4   : > { %2535 = vadd.xlane.f32.xlu0 %v2534_v25 }
 0x621   : > { %v2527_v61 = vpop.xlane.xlu1 %2526 }
 0x622   : > { %v2537_v60 = vmul.f32 %v2527_v61, %v7961_v56 }
 0x624   : > { %v2541_v42 = vadd.f32 1e-05, %v2537_v60 }
 0x626   : > { %6441 = vrsqrt.f32 %v2541_v42  ;;  %vm2551_vm12 = vweird.f32 %v2541_v42 }
 0x62b   : > { %v2530_v4 = vpop.xlane.xlu0 %2529 }
 0x62c   : > { %v6442_v17 = vpop.eup %6441  ;;  %v2538_v27 = vmul.f32 %v2530_v4, %v7961_v56 }
 0x62d   : > { %v2546_v47 = vmul.f32 %v6442_v17, %v2541_v42  ;;  %vm2552_vm11 = vweird.f32 %v6442_v17 }
 0x62e   : > { %v2542_v39 = vadd.f32 1e-05, %v2538_v27  ;;  %vm2553_vm13 = vmor %vm2551_vm12, %vm2552_vm11  ;;  %vm2886_vm11 = vcmask 1041408   ;;  %vm2890_vm12 = vcmask 1043458  }
 0x62f   : > { %v2547_v43 = vmul.f32 %v6442_v17, %v2546_v47 }
 0x630   : > { %6443 = vrsqrt.f32 %v2542_v39  ;;  %vm2561_vm0 = vweird.f32 %v2542_v39 }
 0x631   : > { %v2548_v59 = vmul.f32 0.5, %v2547_v43 }
 0x633   : > { %v2549_v2 = vsub.f32 1.5, %v2548_v59 }
 0x635   : > { %v2550_v30 = vmul.f32 %v6442_v17, %v2549_v2 }
 0x636   : > { %v6444_v22 = vpop.eup %6443 }
 0x637   : > { %v2554_v55 = vsel %vm2553_vm13, %v6442_v17, %v2550_v30  ;;  %v2556_v7 = vmul.f32 %v6444_v22, %v2542_v39  ;;  %vm2562_vm15 = vweird.f32 %v6444_v22  ;;  %vm3728_vm13 = vcmask 27648  }
 0x638   : > { %v2589_v36 = vrot.slane %v2554_v55, 1  ;;  %v2590_v33 = vrot.slane %v2554_v55, 2  ;;  %v2591_v57 = vrot.slane %v2554_v55, 3  ;;  %v2592_v11 = vrot.slane %v2554_v55, 4  ;;  %vm2563_vm1 = vmor %vm2561_vm0, %vm2562_vm15 }
 0x639   : > { %v2593_v53 = vrot.slane %v2554_v55, 5  ;;  %v2594_v13 = vrot.slane %v2554_v55, 6  ;;  %v2595_v14 = vrot.slane %v2554_v55, 7  ;;  %v2649_v16 = vmul.f32 %v2554_v55, %v7965_v44 }
 0x63a   : > { %v2650_v18 = vmul.f32 %v2589_v36, %v7968_v29  ;;  %v2651_v9 = vmul.f32 %v2590_v33, %v7971_v37  ;;  %v2652_v49 = vmul.f32 %v2591_v57, %v7974_v3  ;;  %v2653_v40 = vmul.f32 %v2592_v11, %v7977_v28 }
 0x63b   : > { %v2654_v10 = vmul.f32 %v2593_v53, %v7980_v8  ;;  %v2655_v25 = vmul.f32 %v2594_v13, %v7983_v48  ;;  %v2656_v61 = vmul.f32 %v2595_v14, %v7986_v32  ;;  %v2684_v60 = vmul.f32 %v8164_v0, %v2649_v16 }
 0x63c   : > { %v2685_v42 = vmul.f32 %v8164_v0, %v2650_v18  ;;  %v2686_v44 = vmul.f32 %v8164_v0, %v2651_v9  ;;  %v2687_v29 = vmul.f32 %v8164_v0, %v2652_v49  ;;  %v2688_v37 = vmul.f32 %v8164_v0, %v2653_v40 }
 0x63d   : > { %v2689_v3 = vmul.f32 %v8164_v0, %v2654_v10  ;;  %v2690_v28 = vmul.f32 %v8164_v0, %v2655_v25  ;;  %v2719_v8 = vadd.f32 %v8169_v24, %v2684_v60  ;;  %v2691_v48 = vmul.f32 %v8164_v0, %v2656_v61 }
 0x63e   : > { %v2720_v32 = vadd.f32 %v8169_v24, %v2685_v42  ;;  %v2721_v4 = vadd.f32 %v8169_v24, %v2686_v44  ;;  %v2722_v17 = vadd.f32 %v8169_v24, %v2687_v29  ;;  %v2723_v27 = vadd.f32 %v8169_v24, %v2688_v37 }
 0x63f   : > { %2752 = vst.msk [vmem:[#allocation2] sm:$0x1] %vm2751_vm14, %v2719_v8  ;;  %v2557_v47 = vmul.f32 %v6444_v22, %v2556_v7  ;;  %v2724_v43 = vadd.f32 %v8169_v24, %v2689_v3  ;;  %v2725_v59 = vadd.f32 %v8169_v24, %v2690_v28  ;;  %v2726_v30 = vadd.f32 %v8169_v24, %v2691_v48 }
 0x640   : > { %2753 = vst.msk [vmem:[#allocation2 + $0x4] sm:$0x1] %vm2751_vm14, %v2720_v32 }
 0x641   : > { %2754 = vst.msk [vmem:[#allocation2 + $0x8] sm:$0x1] %vm2751_vm14, %v2721_v4  ;;  %v2558_v2 = vmul.f32 0.5, %v2557_v47 }
 0x642   : > { %2755 = vst.msk [vmem:[#allocation2 + $0xc] sm:$0x1] %vm2751_vm14, %v2722_v17 }
 0x643   : > { %2756 = vst.msk [vmem:[#allocation2 + $0x10] sm:$0x1] %vm2751_vm14, %v2723_v27  ;;  %v2559_v55 = vsub.f32 1.5, %v2558_v2 }
 0x644   : > { %2757 = vst.msk [vmem:[#allocation2 + $0x14] sm:$0x1] %vm2751_vm14, %v2724_v43 }
 0x645   : > { %2758 = vst.msk [vmem:[#allocation2 + $0x18] sm:$0x1] %vm2751_vm14, %v2725_v59  ;;  %v2560_v7 = vmul.f32 %v6444_v22, %v2559_v55 }
 0x646   : > { %2759 = vst.msk [vmem:[#allocation2 + $0x1c] sm:$0x1] %vm2751_vm14, %v2726_v30 }
 0x647   : > { %v2564_v36 = vsel %vm2563_vm1, %v6444_v22, %v2560_v7 }
 0x648   : > { %v2596_v33 = vrot.slane %v2564_v36, 1  ;;  %v2597_v57 = vrot.slane %v2564_v36, 2  ;;  %v2598_v11 = vrot.slane %v2564_v36, 3  ;;  %v2599_v53 = vrot.slane %v2564_v36, 4 }
 0x649   : > { %v2600_v13 = vrot.slane %v2564_v36, 5  ;;  %v2601_v14 = vrot.slane %v2564_v36, 6  ;;  %v2602_v16 = vrot.slane %v2564_v36, 7  ;;  %v2657_v18 = vmul.f32 %v2564_v36, %v8010_v41 }
 0x64a   : > { %v2658_v9 = vmul.f32 %v2596_v33, %v8013_v38  ;;  %v2659_v49 = vmul.f32 %v2597_v57, %v8017_v5  ;;  %v2660_v40 = vmul.f32 %v2598_v11, %v8020_v54  ;;  %v2661_v39 = vmul.f32 %v2599_v53, %v8023_v62 }
 0x64b   : > { %v2662_v10 = vmul.f32 %v2600_v13, %v8027_v12  ;;  %v2663_v22 = vmul.f32 %v2601_v14, %v8030_v19  ;;  %v2664_v25 = vmul.f32 %v2602_v16, %v8034_v63  ;;  %v2692_v61 = vmul.f32 %v8164_v0, %v2657_v18 }
 0x64c   : > { %v2693_v60 = vmul.f32 %v8164_v0, %v2658_v9  ;;  %v2694_v41 = vmul.f32 %v8164_v0, %v2659_v49  ;;  %v2695_v38 = vmul.f32 %v8164_v0, %v2660_v40  ;;  %v2696_v5 = vmul.f32 %v8164_v0, %v2661_v39 }
 0x64d   : > { %v2697_v54 = vmul.f32 %v8164_v0, %v2662_v10  ;;  %v2698_v62 = vmul.f32 %v8164_v0, %v2663_v22  ;;  %v2727_v12 = vadd.f32 %v8169_v24, %v2692_v61  ;;  %v2533_v42 = vpop.xlane.xlu1 %2532  ;;  %v2699_v19 = vmul.f32 %v8164_v0, %v2664_v25 }
 0x64e   : > { %v2728_v63 = vadd.f32 %v8169_v24, %v2693_v60  ;;  %v2729_v44 = vadd.f32 %v8169_v24, %v2694_v41  ;;  %v2730_v29 = vadd.f32 %v8169_v24, %v2695_v38  ;;  %v2731_v37 = vadd.f32 %v8169_v24, %v2696_v5 }
 0x64f   : > { %2760 = vst.msk [vmem:[#allocation2 + $0x1] sm:$0x1] %vm2751_vm14, %v2727_v12  ;;  %v2539_v3 = vmul.f32 %v2533_v42, %v7961_v56  ;;  %v2732_v28 = vadd.f32 %v8169_v24, %v2697_v54  ;;  %v2733_v8 = vadd.f32 %v8169_v24, %v2698_v62  ;;  %v2734_v32 = vadd.f32 %v8169_v24, %v2699_v19  ;;  %v6235_v12 = vld [vmem:[#allocation9 + $0x8] sm:$0xff] }
 0x650   : > { %2761 = vst.msk [vmem:[#allocation2 + $0x5] sm:$0x1] %vm2751_vm14, %v2728_v63  ;;  %2861 = vmatpush.bf16.msra.mxu2 %v6235_v12 }
 0x651   : > { %2762 = vst.msk [vmem:[#allocation2 + $0x9] sm:$0x1] %vm2751_vm14, %v2729_v44  ;;  %v2543_v48 = vadd.f32 1e-05, %v2539_v3  ;;  %v6234_v44 = vld [vmem:[#allocation9] sm:$0xff] }
 0x652   : > { %2763 = vst.msk [vmem:[#allocation2 + $0xd] sm:$0x1] %vm2751_vm14, %v2730_v29 }
 0x653   : > { %2764 = vst.msk [vmem:[#allocation2 + $0x11] sm:$0x1] %vm2751_vm14, %v2731_v37  ;;  %6445 = vrsqrt.f32 %v2543_v48  ;;  %vm2571_vm3 = vweird.f32 %v2543_v48 }
 0x654   : > { %2765 = vst.msk [vmem:[#allocation2 + $0x15] sm:$0x1] %vm2751_vm14, %v2732_v28  ;;  %2862 = vmatpush.bf16.msra.mxu2 %v6234_v44 }
 0x655   : > { %2766 = vst.msk [vmem:[#allocation2 + $0x19] sm:$0x1] %vm2751_vm14, %v2733_v8 }
 0x656   : > { %2767 = vst.msk [vmem:[#allocation2 + $0x1d] sm:$0x1] %vm2751_vm14, %v2734_v32 }
 0x657   : > { %v2536_v4 = vpop.xlane.xlu0 %2535 }
 0x658   : > { %v2540_v17 = vmul.f32 %v2536_v4, %v7961_v56 }
 0x659   : > { %v6446_v27 = vpop.eup %6445 }
 0x65a   : > { %v2566_v47 = vmul.f32 %v6446_v27, %v2543_v48  ;;  %v2544_v43 = vadd.f32 1e-05, %v2540_v17  ;;  %vm2572_vm2 = vweird.f32 %v6446_v27 }
 0x65b   : > { %vm2573_vm4 = vmor %vm2571_vm3, %vm2572_vm2 }
 0x65c   : > { %v2567_v59 = vmul.f32 %v6446_v27, %v2566_v47  ;;  %6447 = vrsqrt.f32 %v2544_v43  ;;  %vm2581_vm6 = vweird.f32 %v2544_v43 }
 0x65e   : > { %v2568_v2 = vmul.f32 0.5, %v2567_v59 }
 0x660   : > { %v2569_v30 = vsub.f32 1.5, %v2568_v2 }
 0x662   : > { %v6448_v55 = vpop.eup %6447  ;;  %v2570_v7 = vmul.f32 %v6446_v27, %v2569_v30 }
 0x663   : > { %v2576_v33 = vmul.f32 %v6448_v55, %v2544_v43  ;;  %vm2582_vm5 = vweird.f32 %v6448_v55 }
 0x664   : > { %v2574_v36 = vsel %vm2573_vm4, %v6446_v27, %v2570_v7  ;;  %vm2583_vm10 = vmor %vm2581_vm6, %vm2582_vm5 }
 0x665   : > { %v2603_v57 = vrot.slane %v2574_v36, 1  ;;  %v2604_v11 = vrot.slane %v2574_v36, 2  ;;  %v2605_v53 = vrot.slane %v2574_v36, 3  ;;  %v2606_v13 = vrot.slane %v2574_v36, 4 }
 0x666   : > { %v2607_v14 = vrot.slane %v2574_v36, 5  ;;  %v2608_v16 = vrot.slane %v2574_v36, 6  ;;  %v2609_v18 = vrot.slane %v2574_v36, 7  ;;  %v2665_v9 = vmul.f32 %v2574_v36, %v8063_v50 }
 0x667   : > { %v2666_v49 = vmul.f32 %v2603_v57, %v8066_v20  ;;  %v2667_v40 = vmul.f32 %v2604_v11, %v8069_v6  ;;  %v2668_v39 = vmul.f32 %v2605_v53, %v8072_v52  ;;  %v2669_v10 = vmul.f32 %v2606_v13, %v8075_v21 }
 0x668   : > { %v2670_v22 = vmul.f32 %v2607_v14, %v8078_v46  ;;  %v2671_v25 = vmul.f32 %v2608_v16, %v8081_v51  ;;  %v2672_v61 = vmul.f32 %v2609_v18, %v8084_v31  ;;  %v2700_v60 = vmul.f32 %v8164_v0, %v2665_v9 }
 0x669   : > { %v2701_v41 = vmul.f32 %v8164_v0, %v2666_v49  ;;  %v2702_v50 = vmul.f32 %v8164_v0, %v2667_v40  ;;  %v2703_v20 = vmul.f32 %v8164_v0, %v2668_v39  ;;  %v2704_v6 = vmul.f32 %v8164_v0, %v2669_v10 }
 0x66a   : > { %v2705_v52 = vmul.f32 %v8164_v0, %v2670_v22  ;;  %v2706_v21 = vmul.f32 %v8164_v0, %v2671_v25  ;;  %v2735_v46 = vadd.f32 %v8169_v24, %v2700_v60  ;;  %v2707_v51 = vmul.f32 %v8164_v0, %v2672_v61 }
 0x66b   : > { %v2736_v31 = vadd.f32 %v8169_v24, %v2701_v41  ;;  %v2737_v38 = vadd.f32 %v8169_v24, %v2702_v50  ;;  %v2738_v5 = vadd.f32 %v8169_v24, %v2703_v20  ;;  %v2739_v54 = vadd.f32 %v8169_v24, %v2704_v6 }
 0x66c   : > { %2768 = vst.msk [vmem:[#allocation2 + $0x2] sm:$0x1] %vm2751_vm14, %v2735_v46  ;;  %v2577_v62 = vmul.f32 %v6448_v55, %v2576_v33  ;;  %v2740_v42 = vadd.f32 %v8169_v24, %v2705_v52  ;;  %v2741_v19 = vadd.f32 %v8169_v24, %v2706_v21  ;;  %v2742_v29 = vadd.f32 %v8169_v24, %v2707_v51  ;;  %v6367_v52 = vld [vmem:[%s9566_s8] ss:$0 sm:$0xff] }
 0x66d   : > { %2769 = vst.msk [vmem:[#allocation2 + $0x6] sm:$0x1] %vm2751_vm14, %v2736_v31 }
 0x66e   : > { %2770 = vst.msk [vmem:[#allocation2 + $0xa] sm:$0x1] %vm2751_vm14, %v2737_v38  ;;  %v2578_v63 = vmul.f32 0.5, %v2577_v62 }
 0x66f   : > { %2771 = vst.msk [vmem:[#allocation2 + $0xe] sm:$0x1] %vm2751_vm14, %v2738_v5 }
 0x670   : > { %2772 = vst.msk [vmem:[#allocation2 + $0x12] sm:$0x1] %vm2751_vm14, %v2739_v54  ;;  %v2579_v37 = vsub.f32 1.5, %v2578_v63 }
 0x671   : > { %2773 = vst.msk [vmem:[#allocation2 + $0x16] sm:$0x1] %vm2751_vm14, %v2740_v42 }
 0x672   : > { %2774 = vst.msk [vmem:[#allocation2 + $0x1a] sm:$0x1] %vm2751_vm14, %v2741_v19  ;;  %v2580_v3 = vmul.f32 %v6448_v55, %v2579_v37 }
 0x673   : > { %2775 = vst.msk [vmem:[#allocation2 + $0x1e] sm:$0x1] %vm2751_vm14, %v2742_v29 }
 0x674   : > { %v2584_v28 = vsel %vm2583_vm10, %v6448_v55, %v2580_v3 }
 0x675   : > { %v2610_v8 = vrot.slane %v2584_v28, 1  ;;  %v2611_v48 = vrot.slane %v2584_v28, 2  ;;  %v2612_v32 = vrot.slane %v2584_v28, 3  ;;  %v2613_v4 = vrot.slane %v2584_v28, 4 }
 0x676   : > { %v2614_v17 = vrot.slane %v2584_v28, 5  ;;  %v2615_v27 = vrot.slane %v2584_v28, 6  ;;  %v2616_v47 = vrot.slane %v2584_v28, 7  ;;  %v2673_v59 = vmul.f32 %v2584_v28, %v8108_v1 }
 0x677   : > { %v2674_v2 = vmul.f32 %v2610_v8, %v8111_v15  ;;  %v2675_v30 = vmul.f32 %v2611_v48, %v8115_v58  ;;  %v2676_v43 = vmul.f32 %v2612_v32, %v8118_v23  ;;  %v2677_v7 = vmul.f32 %v2613_v4, %v8121_v26 }
 0x678   : > { %v2678_v36 = vmul.f32 %v2614_v17, %v8125_v34  ;;  %v2679_v55 = vmul.f32 %v2615_v27, %v8128_v45  ;;  %v2680_v33 = vmul.f32 %v2616_v47, %v8132_v35  ;;  %v2708_v57 = vmul.f32 %v8164_v0, %v2673_v59 }
 0x679   : > { %v2709_v11 = vmul.f32 %v8164_v0, %v2674_v2  ;;  %v2710_v1 = vmul.f32 %v8164_v0, %v2675_v30  ;;  %v2711_v15 = vmul.f32 %v8164_v0, %v2676_v43  ;;  %v2712_v58 = vmul.f32 %v8164_v0, %v2677_v7 }
 0x67a   : > { %v2713_v23 = vmul.f32 %v8164_v0, %v2678_v36  ;;  %v2714_v26 = vmul.f32 %v8164_v0, %v2679_v55  ;;  %v2715_v34 = vmul.f32 %v8164_v0, %v2680_v33  ;;  %v2743_v45 = vadd.f32 %v8169_v24, %v2708_v57 }
 0x67b   : > { %v2744_v35 = vadd.f32 %v8169_v24, %v2709_v11  ;;  %v2745_v53 = vadd.f32 %v8169_v24, %v2710_v1  ;;  %v2746_v13 = vadd.f32 %v8169_v24, %v2711_v15  ;;  %v2747_v14 = vadd.f32 %v8169_v24, %v2712_v58 }
 0x67c   : > { %v2748_v16 = vadd.f32 %v8169_v24, %v2713_v23  ;;  %v2749_v18 = vadd.f32 %v8169_v24, %v2714_v26  ;;  %v2750_v9 = vadd.f32 %v8169_v24, %v2715_v34  ;;  %2776 = vst.msk [vmem:[#allocation2 + $0x3] sm:$0x1] %vm2751_vm14, %v2743_v45 }
 0x67d   : > { %2777 = vst.msk [vmem:[#allocation2 + $0x7] sm:$0x1] %vm2751_vm14, %v2744_v35 }
 0x67e   : > { %2778 = vst.msk [vmem:[#allocation2 + $0xb] sm:$0x1] %vm2751_vm14, %v2745_v53 }
 0x67f   : > { %2779 = vst.msk [vmem:[#allocation2 + $0xf] sm:$0x1] %vm2751_vm14, %v2746_v13 }
 0x680   : > { %2780 = vst.msk [vmem:[#allocation2 + $0x13] sm:$0x1] %vm2751_vm14, %v2747_v14 }
 0x681   : > { %2781 = vst.msk [vmem:[#allocation2 + $0x17] sm:$0x1] %vm2751_vm14, %v2748_v16 }
 0x682   : > { %2782 = vst.msk [vmem:[#allocation2 + $0x1b] sm:$0x1] %vm2751_vm14, %v2749_v18 }
 0x683   : > { %2783 = vst.msk [vmem:[#allocation2 + $0x1f] sm:$0x1] %vm2751_vm14, %v2750_v9  ;;  %v8301_v0 = vld [vmem:[#allocation2] sm:$0xf]  ;;  %vm4118_vm14 = vcmask 31744  }
 0x684   : > { %v8303_v49 = vld [vmem:[#allocation2 + $0x4] sm:$0xf]  ;;  %2809 = vst [vmem:[#allocation1] ss:$2 sm:$0xff] %v8301_v0 }
 0x685   : > { %v8306_v24 = vld [vmem:[#allocation2 + $0x8] sm:$0xf]  ;;  %2811 = vst [vmem:[#allocation1 + $0x1] ss:$2 sm:$0xff] %v8303_v49 }
 0x686   : > { %v8309_v40 = vld [vmem:[#allocation2 + $0xc] sm:$0xf]  ;;  %2813 = vst [vmem:[#allocation1 + $0x10] ss:$2 sm:$0xff] %v8306_v24 }
 0x687   : > { %v8312_v39 = vld [vmem:[#allocation2 + $0x10] sm:$0xf]  ;;  %2815 = vst [vmem:[#allocation1 + $0x11] ss:$2 sm:$0xff] %v8309_v40 }
 0x688   : > { %v8315_v10 = vld [vmem:[#allocation2 + $0x14] sm:$0xf]  ;;  %2817 = vst [vmem:[#allocation1 + $0x20] ss:$2 sm:$0xff] %v8312_v39 }
 0x689   : > { %9623 = vst [vmem:[#allocation25_spill] sm:$0xff] %v8315_v10  ;;  %v8318_v22 = vld [vmem:[#allocation2 + $0x18] sm:$0xf] }
 0x68a   : > { %9624 = vst [vmem:[#allocation26_spill] sm:$0xff] %v8318_v22  ;;  %v8321_v25 = vld [vmem:[#allocation2 + $0x1c] sm:$0xf] }
 0x68b   : > { %2819 = vst [vmem:[#allocation1 + $0x21] ss:$2 sm:$0xff] %v8315_v10 }
 0x68c   : > { %9625 = vst [vmem:[#allocation27_spill] sm:$0xff] %v8321_v25  ;;  %v2824_v61 = vld.sshfl [vmem:[#allocation1] sm:$0xff pattern:$0x75316420] }
 0x68d   : > { %2821 = vst [vmem:[#allocation1 + $0x30] ss:$2 sm:$0xff] %v8318_v22 }
 0x68e   : > { %2823 = vst [vmem:[#allocation1 + $0x31] ss:$2 sm:$0xff] %v8321_v25  ;;  %v2825_v60 = vld.sshfl [vmem:[#allocation1 + $0x10] sm:$0xff pattern:$0x75316420] }
 0x68f   : > { %v2832_v41 = vpack.c.bf16 %v2825_v60, %v2824_v61 }
 0x691   : > { %6124 = vmatmul.msk.bf16.vlgmr.msra.gmra.mxu2 %vm972_vm7, %v2832_v41 }
 0x692   : > { %v2826_v50 = vld.sshfl [vmem:[#allocation1 + $0x20] sm:$0xff pattern:$0x75316420] }
 0x695   : > { %v2827_v20 = vld.sshfl [vmem:[#allocation1 + $0x30] sm:$0xff pattern:$0x75316420] }
 0x696   : > { %v2833_v6 = vpack.c.bf16 %v2827_v20, %v2826_v50 }
 0x6a1   : > { %6125 = vmatmul.msk.bf16.gmra.mxu2 %vm972_vm7, %v2833_v6 }
 0x714   : > { %v2864_v21 = vpop.f32.mrf.mxu2 }
 0x715   : > { %v2865_v46 = vadd.f32 %v6367_v52, %v2864_v21 }
 0x717   : > { %v2874_v51 = vpack.c.bf16 %v2865_v46, %v2865_v46 }
 0x719   : > { %v2882_v31 = vrot.slane %v2874_v51, 2 }
 0x71b   : > { %v8331_v38 = vsel %vm2886_vm11, %v2874_v51, %v2882_v31  ;;  %v2891_v5 = vsel %vm2890_vm12, %v2874_v51, %v2882_v31 }
 0x71c   : > { %v8334_v54 = vrot.slane %v2891_v5, 2  ;;  %2964 = vst [vmem:[#allocation1] ss:$4 sm:$0xff] %v8331_v38  ;;  %v2866_v62 = vpop.f32.mrf.mxu2  ;;  %2932 = vrot.lane.b32.xlu2 %v8331_v38, %s6901_s19  ;;  %2916 = vrot.lane.b32.xlu1 %v8331_v38, %s6899_s29 }
 0x71d   : > { %v2867_v12 = vadd.f32 %v6367_v52, %v2866_v62 }
 0x71e   : > { %2934 = vrot.lane.b32.xlu0 %v8334_v54, %s6901_s19 }
 0x71f   : > { %v2875_v42 = vpack.c.bf16 %v2867_v12, %v2867_v12 }
 0x721   : > { %v2883_v19 = vrot.slane %v2875_v42, 2 }
 0x723   : > { %v2965_v63 = vld.sshfl [vmem:[#allocation1] sm:$0xff pattern:$0x73625140]  ;;  %v8349_v44 = vsel %vm2886_vm11, %v2875_v42, %v2883_v19  ;;  %v2897_v3 = vsel %vm2890_vm12, %v2875_v42, %v2883_v19 }
 0x724   : > { %2988 = vst [vmem:[#allocation1] ss:$4 sm:$0xff] %v8334_v54  ;;  %2948 = vrot.lane.b32.xlu2 %v8331_v38, %s6902_s16  ;;  %2950 = vrot.lane.b32.xlu1 %v8334_v54, %s6902_s16  ;;  %v2869_v37 = vpop.f32.mrf.mxu2  ;;  %v8360_v8 = vrot.slane %v2897_v3, 2 }
 0x725   : > { %v2870_v28 = vadd.f32 %v6367_v52, %v2869_v37 }
 0x726   : > { %2920 = vrot.lane.b32.xlu0 %v8349_v44, %s6899_s29 }
 0x727   : > { %v2876_v32 = vpack.c.bf16 %v2870_v28, %v2870_v28 }
 0x729   : > { %v2884_v4 = vrot.slane %v2876_v32, 2 }
 0x72b   : > { %v2989_v29 = vld.sshfl [vmem:[#allocation1] sm:$0xff pattern:$0x73625140]  ;;  %v8370_v27 = vsel %vm2886_vm11, %v2876_v32, %v2884_v4  ;;  %v2903_v59 = vsel %vm2890_vm12, %v2876_v32, %v2884_v4 }
 0x72c   : > { %3011 = vst [vmem:[#allocation1] ss:$4 sm:$0xff] %v8349_v44  ;;  %2918 = vrot.lane.b32.xlu2 %v8334_v54, %s6899_s29  ;;  %2936 = vrot.lane.b32.xlu1 %v8349_v44, %s6901_s19  ;;  %v2871_v47 = vpop.f32.mrf.mxu2  ;;  %v8380_v30 = vrot.slane %v2903_v59, 2 }
 0x72d   : > { %v2872_v2 = vadd.f32 %v6367_v52, %v2871_v47 }
 0x72e   : > { %2967 = vrot.lane.b32.xlu0 %v2965_v63, %s6900_s27 }
 0x72f   : > { %v2877_v7 = vpack.c.bf16 %v2872_v2, %v2872_v2 }
 0x731   : > { %v2885_v36 = vrot.slane %v2877_v7, 2 }
 0x733   : > { %v3012_v48 = vld.sshfl [vmem:[#allocation1] sm:$0xff pattern:$0x73625140]  ;;  %v8389_v33 = vsel %vm2886_vm11, %v2877_v7, %v2885_v36  ;;  %v2909_v57 = vsel %vm2890_vm12, %v2877_v7, %v2885_v36  ;;  %vm5566_vm12 = vcmask 523264  }
 0x734   : > { %3035 = vst [vmem:[#allocation1] ss:$4 sm:$0xff] %v8360_v8  ;;  %2938 = vrot.lane.b32.xlu2 %v8360_v8, %s6901_s19  ;;  %2954 = vrot.lane.b32.xlu1 %v8360_v8, %s6902_s16  ;;  %v8399_v11 = vrot.slane %v2909_v57, 2 }
 0x736   : > { %2952 = vrot.lane.b32.xlu0 %v8349_v44, %s6902_s16 }
 0x73b   : > { %v3036_v17 = vld.sshfl [vmem:[#allocation1] sm:$0xff pattern:$0x73625140] }
 0x73c   : > { %3058 = vst [vmem:[#allocation1] ss:$4 sm:$0xff] %v8370_v27  ;;  %2956 = vrot.lane.b32.xlu2 %v8370_v27, %s6902_s16  ;;  %2924 = vrot.lane.b32.xlu1 %v8370_v27, %s6899_s29 }
 0x73e   : > { %2922 = vrot.lane.b32.xlu0 %v8360_v8, %s6899_s29 }
 0x743   : > { %v3059_v43 = vld.sshfl [vmem:[#allocation1] sm:$0xff pattern:$0x73625140] }
 0x744   : > { %3082 = vst [vmem:[#allocation1] ss:$4 sm:$0xff] %v8380_v30  ;;  %2926 = vrot.lane.b32.xlu2 %v8380_v30, %s6899_s29  ;;  %2991 = vrot.lane.b32.xlu1 %v2989_v29, %s6900_s27 }
 0x746   : > { %2940 = vrot.lane.b32.xlu0 %v8370_v27, %s6901_s19 }
 0x74b   : > { %v3083_v55 = vld.sshfl [vmem:[#allocation1] sm:$0xff pattern:$0x73625140] }
 0x74c   : > { %3105 = vst [vmem:[#allocation1] ss:$4 sm:$0xff] %v8389_v33  ;;  %2944 = vrot.lane.b32.xlu2 %v8389_v33, %s6901_s19  ;;  %2942 = vrot.lane.b32.xlu1 %v8380_v30, %s6901_s19 }
 0x74e   : > { %2928 = vrot.lane.b32.xlu0 %v8389_v33, %s6899_s29 }
 0x753   : > { %v3106_v1 = vld.sshfl [vmem:[#allocation1] sm:$0xff pattern:$0x73625140] }
 0x754   : > { %3129 = vst [vmem:[#allocation1] ss:$4 sm:$0xff] %v8399_v11  ;;  %2958 = vrot.lane.b32.xlu1 %v8380_v30, %s6902_s16  ;;  %3014 = vrot.lane.b32.xlu2 %v3012_v48, %s6900_s27 }
 0x756   : > { %3038 = vrot.lane.b32.xlu0 %v3036_v17, %s6900_s27 }
 0x75b   : > { %v3130_v15 = vld.sshfl [vmem:[#allocation1] sm:$0xff pattern:$0x73625140] }
 0x75c   : > { %2930 = vrot.lane.b32.xlu1 %v8399_v11, %s6899_s29  ;;  %2960 = vrot.lane.b32.xlu2 %v8389_v33, %s6902_s16 }
 0x75e   : > { %3061 = vrot.lane.b32.xlu0 %v3059_v43, %s6900_s27 }
 0x764   : > { %2946 = vrot.lane.b32.xlu1 %v8399_v11, %s6901_s19  ;;  %3108 = vrot.lane.b32.xlu2 %v3106_v1, %s6900_s27  ;;  %s9632_s19 = sld [smem:[#allocation38_spill]] }
 0x766   : > { %3132 = vrot.lane.b32.xlu0 %v3130_v15, %s6900_s27 }
 0x76c   : > { %2962 = vrot.lane.b32.xlu1 %v8399_v11, %s6902_s16  ;;  %s9478_s16 = scalar_lea.vmem [#allocation15], %s6058_s20  ;;  %s6242_s20 = sshll.u32 %s7032_s24, 5 }
 0x76d   : > { %s5911_s2 = scalar_lea.hbm %s9633_s7, %s6242_s20  ;;  %s5912_s24 = sshll.u32 %s9478_s16, 4  ;;  %s5913_s24 = int_to_ptr.vmem [resolvable:$true] %s5912_s24 }
 0x76e   : > { %s5914_s23 = sshll.u32 %s5911_s2, 4  ;;  %s5915_s23 = int_to_ptr.hbm [resolvable:$true] %s5914_s23 }
 0x76f   : > { %s6825_s9 = sshra.s32 %s5915_s23, 4  ;;  %s6826_s9 = int_to_ptr.hbm [resolvable:$true] %s6825_s9 }
 0x770   : > { %s6827_s15 = scalar_lea.hbm %s6826_s9, 32  ;;  %p6832_p12 = scmp.lt.s32.totalorder %s6826_s9, %s9633_s7 }
 0x771   : > { %p6828_p1 = scmp.ne.s32.totalorder %s6826_s9, %s6827_s15 }
 0x773   : > { %p6829_p3 = pnand %p6828_p1, %p7123_p4 }
 0x774   : > { %3085 = vrot.lane.b32.xlu1 %v3083_v55, %s6900_s27 }
 0x775   : > { %p6830_p5 = pneg %p6829_p3 }
 0x776   : > { %v8418_v58 = vpop.permute.xlu2 %2932 }
 0x77e   : > { %v8420_v23 = vpop.permute.xlu2 %2948 }
 0x786   : > { %v8422_v26 = vpop.permute.xlu2 %2918 }
 0x78e   : > { %v8424_v34 = vpop.permute.xlu2 %2938  ;;  %v8426_v45 = vpop.permute.xlu1 %2916 }
 0x78f   : > { %3153 = vst [vmem:[#allocation1] ss:$4 sm:$0xff] %v8426_v45 }
 0x790   : > { %v8429_v35 = vpop.permute.xlu0 %2934 }
 0x796   : > { %v3154_v53 = vld.sshfl [vmem:[#allocation1] sm:$0xff pattern:$0x73625140]  ;;  %v8431_v13 = vpop.permute.xlu2 %2956  ;;  %v8433_v14 = vpop.permute.xlu1 %2950 }
 0x797   : > { %3177 = vst [vmem:[#allocation1] ss:$4 sm:$0xff] %v8422_v26  ;;  %3156 = vrot.lane.b32.xlu0 %v3154_v53, %s6900_s27 }
 0x798   : > { %v8437_v16 = vpop.permute.xlu0 %2920 }
 0x79e   : > { %v3178_v18 = vld.sshfl [vmem:[#allocation1] sm:$0xff pattern:$0x73625140]  ;;  %v8439_v9 = vpop.permute.xlu2 %2926  ;;  %v8441_v61 = vpop.permute.xlu1 %2936 }
 0x79f   : > { %3201 = vst [vmem:[#allocation1] ss:$4 sm:$0xff] %v8437_v16  ;;  %3180 = vrot.lane.b32.xlu1 %v3178_v18, %s6900_s27 }
 0x7a0   : > { %v2968_v60 = vpop.permute.xlu0 %2967 }
 0x7a1   : > { %v2972_v41 = vsel %vm1034_vm8, %v2968_v60, 0 }
 0x7a2   : > { %2981 = vmatpush.bf16.xpose.msra.mxu3 %v2972_v41 }
 0x7a6   : > { %v3202_v50 = vld.sshfl [vmem:[#allocation1] sm:$0xff pattern:$0x73625140]  ;;  %v8446_v20 = vpop.permute.xlu2 %2944  ;;  %v8448_v6 = vpop.permute.xlu1 %2954 }
 0x7a7   : > { %3204 = vrot.lane.b32.xlu2 %v3202_v50, %s6900_s27 }
 0x7a8   : > { %v8451_v52 = vpop.permute.xlu0 %2952 }
 0x7a9   : > { %6126 = vmatmul.msk.bf16.vlgmr.msra.gmra.mxu3 %vm1034_vm8, %v8331_v38 }
 0x7ae   : > { %v8455_v21 = vpop.permute.xlu1 %2924  ;;  %v3015_v46 = vpop.permute.xlu2 %3014 }
 0x7af   : > { %v3019_v51 = vsel %vm1034_vm8, %v3015_v46, 0 }
 0x7b0   : > { %v8458_v31 = vpop.permute.xlu0 %2922  ;;  %3028 = vmatpush.bf16.xpose.msrb.mxu1 %v3019_v51 }
 0x7b1   : > { %3225 = vst [vmem:[#allocation1] ss:$4 sm:$0xff] %v8458_v31 }
 0x7b6   : > { %v2992_v5 = vpop.permute.xlu1 %2991  ;;  %v8461_v62 = vpop.permute.xlu2 %2960 }
 0x7b7   : > { %v2996_v12 = vsel %vm1034_vm8, %v2992_v5, 0  ;;  %6128 = vmatmul.msk.bf16.vlgmr.msrb.gmra.mxu1 %vm1034_vm8, %v8349_v44 }
 0x7b8   : > { %v3226_v42 = vld.sshfl [vmem:[#allocation1] sm:$0xff pattern:$0x73625140]  ;;  %v8466_v19 = vpop.permute.xlu0 %2940  ;;  %3005 = vmatpush.bf16.xpose.msrb.mxu0 %v2996_v12 }
 0x7b9   : > { %3249 = vst [vmem:[#allocation1] ss:$4 sm:$0xff] %v8455_v21  ;;  %3228 = vrot.lane.b32.xlu0 %v3226_v42, %s6900_s27 }
 0x7be   : > { %v8470_v63 = vpop.permute.xlu1 %2942  ;;  %v3109_v29 = vpop.permute.xlu2 %3108 }
 0x7bf   : > { %v3113_v37 = vsel %vm1034_vm8, %v3109_v29, 0  ;;  %6127 = vmatmul.msk.bf16.vlgmr.msrb.gmra.mxu0 %vm1034_vm8, %v8334_v54 }
 0x7c0   : > { %v3250_v3 = vld.sshfl [vmem:[#allocation1] sm:$0xff pattern:$0x73625140]  ;;  %v8475_v28 = vpop.permute.xlu0 %2928  ;;  %3122 = vmatpush.bf16.xpose.msrb.mxu2 %v3113_v37 }
 0x7c1   : > { %3273 = vst [vmem:[#allocation1] ss:$4 sm:$0xff] %v8439_v9  ;;  %3252 = vrot.lane.b32.xlu2 %v3250_v3, %s6900_s27 }
 0x7c6   : > { %v8479_v48 = vpop.permute.xlu1 %2958 }
 0x7c7   : > { %6132 = vmatmul.msk.bf16.vlgmr.msrb.gmra.mxu2 %vm1034_vm8, %v8389_v33 }
 0x7c8   : > { %v3274_v32 = vld.sshfl [vmem:[#allocation1] sm:$0xff pattern:$0x73625140]  ;;  %v3039_v4 = vpop.permute.xlu0 %3038 }
 0x7c9   : > { %3297 = vst [vmem:[#allocation1] ss:$4 sm:$0xff] %v8475_v28  ;;  %v3043_v17 = vsel %vm1034_vm8, %v3039_v4, 0  ;;  %3276 = vrot.lane.b32.xlu0 %v3274_v32, %s6900_s27 }
 0x7ca   : > { %3052 = vmatpush.bf16.xpose.msrb.mxu3 %v3043_v17 }
 0x7ce   : > { %v8486_v47 = vpop.permute.xlu1 %2930 }
 0x7d0   : > { %v3298_v59 = vld.sshfl [vmem:[#allocation1] sm:$0xff pattern:$0x73625140]  ;;  %v3062_v2 = vpop.permute.xlu0 %3061 }
 0x7d1   : > { %3321 = vst [vmem:[#allocation1] ss:$4 sm:$0xff] %v8486_v47  ;;  %v3066_v43 = vsel %vm1034_vm8, %v3062_v2, 0  ;;  %6129 = vmatmul.msk.bf16.vlgmr.msrb.gmra.mxu3 %vm1034_vm8, %v8360_v8  ;;  %3300 = vrot.lane.b32.xlu2 %v3298_v59, %s6900_s27 }
 0x7d2   : > { %3075 = vmatpush.bf16.xpose.msra.mxu0 %v3066_v43 }
 0x7d6   : > { %v8493_v7 = vpop.permute.xlu1 %2946 }
 0x7d8   : > { %v3322_v36 = vld.sshfl [vmem:[#allocation1] sm:$0xff pattern:$0x73625140]  ;;  %v3133_v55 = vpop.permute.xlu0 %3132 }
 0x7d9   : > { %3345 = vst [vmem:[#allocation1] ss:$4 sm:$0xff] %v8418_v58  ;;  %v3137_v57 = vsel %vm1034_vm8, %v3133_v55, 0  ;;  %6130 = vmatmul.msk.bf16.vlgmr.msra.gmra.mxu0 %vm1034_vm8, %v8370_v27  ;;  %3324 = vrot.lane.b32.xlu0 %v3322_v36, %s6900_s27 }
 0x7da   : > { %3146 = vmatpush.bf16.xpose.msra.mxu3 %v3137_v57 }
 0x7de   : > { %v8500_v1 = vpop.permute.xlu1 %2962 }
 0x7e0   : > { %v3346_v15 = vld.sshfl [vmem:[#allocation1] sm:$0xff pattern:$0x73625140] }
 0x7e1   : > { %3369 = vst [vmem:[#allocation1] ss:$4 sm:$0xff] %v8429_v35  ;;  %6133 = vmatmul.msk.bf16.vlgmr.msra.gmra.mxu3 %vm1034_vm8, %v8399_v11  ;;  %3348 = vrot.lane.b32.xlu0 %v3346_v15, %s6900_s27 }
 0x7e6   : > { %v3086_v53 = vpop.permute.xlu1 %3085 }
 0x7e7   : > { %v3090_v18 = vsel %vm1034_vm8, %v3086_v53, 0 }
 0x7e8   : > { %v3370_v60 = vld.sshfl [vmem:[#allocation1] sm:$0xff pattern:$0x73625140]  ;;  %3099 = vmatpush.bf16.xpose.msra.mxu1 %v3090_v18 }
 0x7e9   : > { %3393 = vst [vmem:[#allocation1] ss:$4 sm:$0xff] %v8441_v61  ;;  %3372 = vrot.lane.b32.xlu1 %v3370_v60, %s6900_s27 }
 0x7ef   : > { %6131 = vmatmul.msk.bf16.vlgmr.msra.gmra.mxu1 %vm1034_vm8, %v8380_v30 }
 0x7f0   : > { %v3394_v41 = vld.sshfl [vmem:[#allocation1] sm:$0xff pattern:$0x73625140] }
 0x7f1   : > { %3417 = vst [vmem:[#allocation1] ss:$4 sm:$0xff] %v8424_v34  ;;  %3396 = vrot.lane.b32.xlu1 %v3394_v41, %s6900_s27 }
 0x7f8   : > { %v3418_v50 = vld.sshfl [vmem:[#allocation1] sm:$0xff pattern:$0x73625140] }
 0x7f9   : > { %3441 = vst [vmem:[#allocation1] ss:$4 sm:$0xff] %v8466_v19  ;;  %3420 = vrot.lane.b32.xlu2 %v3418_v50, %s6900_s27 }
 0x800   : > { %v3442_v46 = vld.sshfl [vmem:[#allocation1] sm:$0xff pattern:$0x73625140] }
 0x801   : > { %3465 = vst [vmem:[#allocation1] ss:$4 sm:$0xff] %v8470_v63  ;;  %v3205_v51 = vpop.permute.xlu2 %3204  ;;  %3444 = vrot.lane.b32.xlu1 %v3442_v46, %s6900_s27 }
 0x802   : > { %v3209_v5 = vsel %vm1034_vm8, %v3205_v51, 0 }
 0x803   : > { %3218 = vmatpush.bf16.xpose.msra.mxu2 %v3209_v5 }
 0x808   : > { %v3466_v12 = vld.sshfl [vmem:[#allocation1] sm:$0xff pattern:$0x73625140] }
 0x809   : > { %3489 = vst [vmem:[#allocation1] ss:$4 sm:$0xff] %v8446_v20  ;;  %v3157_v42 = vpop.permute.xlu0 %3156  ;;  %3468 = vrot.lane.b32.xlu2 %v3466_v12, %s6900_s27 }
 0x80a   : > { %v3161_v29 = vsel %vm1034_vm8, %v3157_v42, 0  ;;  %6136 = vmatmul.msk.bf16.vlgmr.msra.gmra.mxu2 %vm1034_vm8, %v8437_v16 }
 0x80b   : > { %3170 = vmatpush.bf16.xpose.msrb.mxu0 %v3161_v29 }
 0x810   : > { %v3490_v37 = vld.sshfl [vmem:[#allocation1] sm:$0xff pattern:$0x73625140] }
 0x811   : > { %3513 = vst [vmem:[#allocation1] ss:$4 sm:$0xff] %v8493_v7  ;;  %v3181_v3 = vpop.permute.xlu1 %3180  ;;  %3492 = vrot.lane.b32.xlu2 %v3490_v37, %s6900_s27 }
 0x812   : > { %v3185_v32 = vsel %vm1034_vm8, %v3181_v3, 0  ;;  %6134 = vmatmul.msk.bf16.vlgmr.msrb.gmra.mxu0 %vm1034_vm8, %v8426_v45 }
 0x813   : > { %3194 = vmatpush.bf16.xpose.msrb.mxu1 %v3185_v32 }
 0x818   : > { %v3514_v4 = vld.sshfl [vmem:[#allocation1] sm:$0xff pattern:$0x73625140] }
 0x819   : > { %3537 = vst [vmem:[#allocation1] ss:$4 sm:$0xff] %v8420_v23  ;;  %3516 = vrot.lane.b32.xlu0 %v3514_v4, %s6900_s27 }
 0x81a   : > { %6135 = vmatmul.msk.bf16.vlgmr.msrb.gmra.mxu1 %vm1034_vm8, %v8422_v26 }
 0x81b   : > { %v3253_v17 = vpop.permute.xlu2 %3252 }
 0x81c   : > { %v3257_v59 = vsel %vm1034_vm8, %v3253_v17, 0 }
 0x81d   : > { %3266 = vmatpush.bf16.xpose.msra.mxu0 %v3257_v59 }
 0x820   : > { %v3538_v2 = vld.sshfl [vmem:[#allocation1] sm:$0xff pattern:$0x73625140] }
 0x821   : > { %3561 = vst [vmem:[#allocation1] ss:$4 sm:$0xff] %v8433_v14  ;;  %3540 = vrot.lane.b32.xlu2 %v3538_v2, %s6900_s27 }
 0x824   : > { %6138 = vmatmul.msk.bf16.vlgmr.msra.gmra.mxu0 %vm1034_vm8, %v8455_v21 }
 0x828   : > { %v3562_v43 = vld.sshfl [vmem:[#allocation1] sm:$0xff pattern:$0x73625140] }
 0x829   : > { %3585 = vst [vmem:[#allocation1] ss:$4 sm:$0xff] %v8451_v52  ;;  %3564 = vrot.lane.b32.xlu0 %v3562_v43, %s6900_s27 }
 0x82b   : > { %v3229_v36 = vpop.permute.xlu0 %3228  ;;  %v3301_v55 = vpop.permute.xlu2 %3300 }
 0x82c   : > { %v3233_v57 = vsel %vm1034_vm8, %v3229_v36, 0  ;;  %v3305_v15 = vsel %vm1034_vm8, %v3301_v55, 0  ;;  %v8541_v53 = vpop.f32.mrf.mxu3 }
 0x82d   : > { %3242 = vmatpush.bf16.xpose.msrb.mxu3 %v3233_v57  ;;  %3314 = vmatpush.bf16.xpose.msrb.mxu2 %v3305_v15  ;;  %v3729_v18 = vsel %vm3728_vm13, %v8541_v53, -inf }
 0x82e   : > { %3730 = vmax.xlane.f32.xlu1 %v3729_v18 }
 0x830   : > { %v3586_v60 = vld.sshfl [vmem:[#allocation1] sm:$0xff pattern:$0x73625140] }
 0x831   : > { %3609 = vst [vmem:[#allocation1] ss:$4 sm:$0xff] %v8448_v6  ;;  %3588 = vrot.lane.b32.xlu0 %v3586_v60, %s6900_s27 }
 0x834   : > { %v2985_v41 = vpop.f32.mrf.mxu3  ;;  %v8547_v50 = vpop.f32.mrf.mxu1  ;;  %6137 = vmatmul.msk.bf16.vlgmr.msrb.gmra.mxu3 %vm1034_vm8, %v8458_v31  ;;  %6140 = vmatmul.msk.bf16.vlgmr.msrb.gmra.mxu2 %vm1034_vm8, %v8475_v28 }
 0x835   : > { %v3735_v43 = vsel %vm3728_vm13, %v8547_v50, -inf }
 0x838   : > { %v3610_v46 = vld.sshfl [vmem:[#allocation1] sm:$0xff pattern:$0x73625140] }
 0x839   : > { %3633 = vst [vmem:[#allocation1] ss:$4 sm:$0xff] %v8431_v13 }
 0x83b   : > { %v3277_v51 = vpop.permute.xlu0 %3276 }
 0x83c   : > { %v3281_v5 = vsel %vm1034_vm8, %v3277_v51, 0  ;;  %v8555_v12 = vpop.f32.mrf.mxu0  ;;  %v3032_v42 = vpop.f32.mrf.mxu1 }
 0x83d   : > { %3290 = vmatpush.bf16.xpose.msra.mxu1 %v3281_v5  ;;  %v3732_v32 = vsel %vm3728_vm13, %v8555_v12, -inf }
 0x840   : > { %v3634_v29 = vld.sshfl [vmem:[#allocation1] sm:$0xff pattern:$0x73625140] }
 0x841   : > { %3657 = vst [vmem:[#allocation1] ss:$4 sm:$0xff] %v8479_v48  ;;  %3636 = vrot.lane.b32.xlu0 %v3634_v29, %s6900_s27 }
 0x844   : > { %v3009_v37 = vpop.f32.mrf.mxu0  ;;  %6139 = vmatmul.msk.bf16.vlgmr.msra.gmra.mxu1 %vm1034_vm8, %v8439_v9 }
 0x847   : > { %3612 = vrot.lane.b32.xlu1 %v3610_v46, %s6900_s27 }
 0x848   : > { %v8562_v3 = vld.sshfl [vmem:[#allocation1] sm:$0xff pattern:$0x73625140] }
 0x849   : > { %3681 = vst [vmem:[#allocation1] ss:$4 sm:$0xff] %v8461_v62 }
 0x84a   : > { %v8567_v4 = vpop.f32.mrf.mxu2  ;;  %3733 = vmax.xlane.f32.xlu2 %v3732_v32 }
 0x84b   : > { %v3325_v17 = vpop.permute.xlu0 %3324 }
 0x84c   : > { %v3329_v59 = vsel %vm1034_vm8, %v3325_v17, 0 }
 0x84d   : > { %3338 = vmatpush.bf16.xpose.msra.mxu3 %v3329_v59 }
 0x850   : > { %v8570_v2 = vld.sshfl [vmem:[#allocation1] sm:$0xff pattern:$0x73625140] }
 0x851   : > { %3705 = vst [vmem:[#allocation1] ss:$4 sm:$0xff] %v8500_v1 }
 0x852   : > { %v3126_v36 = vpop.f32.mrf.mxu2  ;;  %3736 = vmax.xlane.f32.xlu2 %v3735_v43 }
 0x853   : > { %v3349_v55 = vpop.permute.xlu0 %3348  ;;  %v3421_v57 = vpop.permute.xlu2 %3420 }
 0x854   : > { %v3353_v15 = vsel %vm1034_vm8, %v3349_v55, 0  ;;  %v3425_v18 = vsel %vm1034_vm8, %v3421_v57, 0  ;;  %v8577_v60 = vpop.f32.mrf.mxu3  ;;  %6141 = vmatmul.msk.bf16.vlgmr.msra.gmra.mxu3 %vm1034_vm8, %v8486_v47 }
 0x855   : > { %3362 = vmatpush.bf16.xpose.msrb.mxu0 %v3353_v15  ;;  %3434 = vmatpush.bf16.xpose.msrb.mxu3 %v3425_v18 }
 0x856   : > { %v8581_v41 = vpop.f32.mrf.mxu0 }
 0x858   : > { %v3706_v46 = vld.sshfl [vmem:[#allocation1] sm:$0xff pattern:$0x73625140] }
 0x859   : > { %4113 = vst [vmem:[#allocation1] ss:$4 sm:$0xff] %v8331_v38 }
 0x85b   : > { %v3373_v51 = vpop.permute.xlu1 %3372 }
 0x85c   : > { %v3377_v5 = vsel %vm1034_vm8, %v3373_v51, 0  ;;  %v3056_v42 = vpop.f32.mrf.mxu3  ;;  %6142 = vmatmul.msk.bf16.vlgmr.msrb.gmra.mxu0 %vm1034_vm8, %v8418_v58  ;;  %v3741_v51 = vsel %vm3728_vm13, %v8581_v41, -inf }
 0x85d   : > { %3386 = vmatpush.bf16.xpose.msrb.mxu1 %v3377_v5 }
 0x85e   : > { %v3079_v29 = vpop.f32.mrf.mxu0 }
 0x860   : > { %v4114_v37 = vld.sshfl [vmem:[#allocation1] sm:$0xff pattern:$0x73625140] }
 0x861   : > { %4138 = vst [vmem:[#allocation1] ss:$4 sm:$0xff] %v8334_v54  ;;  %v3738_v54 = vsel %vm3728_vm13, %v8577_v60, -inf }
 0x863   : > { %v3397_v32 = vpop.permute.xlu1 %3396  ;;  %v3469_v17 = vpop.permute.xlu2 %3468 }
 0x864   : > { %v3401_v59 = vsel %vm1034_vm8, %v3397_v32, 0  ;;  %v3473_v43 = vsel %vm1034_vm8, %v3469_v17, 0  ;;  %v8590_v36 = vpop.f32.mrf.mxu3  ;;  %6143 = vmatmul.msk.bf16.vlgmr.msrb.gmra.mxu1 %vm1034_vm8, %v8429_v35  ;;  %6145 = vmatmul.msk.bf16.vlgmr.msrb.gmra.mxu3 %vm1034_vm8, %v8424_v34  ;;  %v3747_v17 = vsel %vm3728_vm13, %v8567_v4, -inf }
 0x865   : > { %3410 = vmatpush.bf16.xpose.msra.mxu2 %v3401_v59  ;;  %3482 = vmatpush.bf16.xpose.msra.mxu1 %v3473_v43 }
 0x868   : > { %v8596_v38 = vld.sshfl [vmem:[#allocation1] sm:$0xff pattern:$0x73625140] }
 0x869   : > { %4162 = vst [vmem:[#allocation1] ss:$4 sm:$0xff] %v8349_v44 }
 0x86a   : > { %3708 = vrot.lane.b32.xlu2 %v3706_v46, %s6900_s27 }
 0x86b   : > { %v3493_v55 = vpop.permute.xlu2 %3492  ;;  %3739 = vmax.xlane.f32.xlu0 %v3738_v54 }
 0x86c   : > { %v3497_v57 = vsel %vm1034_vm8, %v3493_v55, 0  ;;  %v8603_v15 = vpop.f32.mrf.mxu1  ;;  %v3150_v18 = vpop.f32.mrf.mxu3  ;;  %6144 = vmatmul.msk.bf16.vlgmr.msra.gmra.mxu2 %vm1034_vm8, %v8441_v61 }
 0x86d   : > { %3506 = vmatpush.bf16.xpose.msrb.mxu2 %v3497_v57  ;;  %v3744_v46 = vsel %vm3728_vm13, %v8603_v15, -inf }
 0x870   : > { %v8609_v44 = vld.sshfl [vmem:[#allocation1] sm:$0xff pattern:$0x73625140] }
 0x871   : > { %3742 = vmax.xlane.f32.xlu1 %v3741_v51  ;;  %4186 = vst [vmem:[#allocation1] ss:$4 sm:$0xff] %v8360_v8 }
 0x873   : > { %v3445_v5 = vpop.permute.xlu1 %3444  ;;  %3745 = vmax.xlane.f32.xlu0 %v3744_v46 }
 0x874   : > { %v3449_v42 = vsel %vm1034_vm8, %v3445_v5, 0  ;;  %v3103_v29 = vpop.f32.mrf.mxu1  ;;  %6147 = vmatmul.msk.bf16.vlgmr.msra.gmra.mxu1 %vm1034_vm8, %v8470_v63 }
 0x875   : > { %3458 = vmatpush.bf16.xpose.msra.mxu0 %v3449_v42 }
 0x878   : > { %v4187_v32 = vld.sshfl [vmem:[#allocation1] sm:$0xff pattern:$0x73625140] }
 0x879   : > { %4210 = vst [vmem:[#allocation1] ss:$4 sm:$0xff] %v8370_v27 }
 0x87b   : > { %v3541_v59 = vpop.permute.xlu2 %3540  ;;  %3748 = vmax.xlane.f32.xlu0 %v3747_v17 }
 0x87c   : > { %v3545_v8 = vsel %vm1034_vm8, %v3541_v59, 0  ;;  %6146 = vmatmul.msk.bf16.vlgmr.msra.gmra.mxu0 %vm1034_vm8, %v8466_v19  ;;  %6148 = vmatmul.msk.bf16.vlgmr.msrb.gmra.mxu2 %vm1034_vm8, %v8446_v20 }
 0x87d   : > { %3554 = vmatpush.bf16.xpose.msrb.mxu0 %v3545_v8 }
 0x880   : > { %v4211_v43 = vld.sshfl [vmem:[#allocation1] sm:$0xff pattern:$0x73625140] }
 0x881   : > { %4234 = vst [vmem:[#allocation1] ss:$4 sm:$0xff] %v8380_v30 }
 0x888   : > { %v4235_v54 = vld.sshfl [vmem:[#allocation1] sm:$0xff pattern:$0x73625140] }
 0x889   : > { %4258 = vst [vmem:[#allocation1] ss:$4 sm:$0xff] %v8389_v33  ;;  %v3750_v33 = vsel %vm3728_vm13, %v8590_v36, -inf }
 0x88a   : > { %3660 = vrot.lane.b32.xlu1 %v8562_v3, %s6900_s27 }
 0x88b   : > { %v3517_v27 = vpop.permute.xlu0 %3516 }
 0x88c   : > { %v3521_v55 = vsel %vm1034_vm8, %v3517_v27, 0  ;;  %6150 = vmatmul.msk.bf16.vlgmr.msrb.gmra.mxu0 %vm1034_vm8, %v8420_v23 }
 0x88d   : > { %v8632_v57 = vpop.f32.mrf.mxu2  ;;  %3530 = vmatpush.bf16.xpose.msra.mxu3 %v3521_v55 }
 0x88f   : > { %v8634_v18 = vpop.f32.mrf.mxu0  ;;  %4116 = vrot.lane.b32.xlu0 %v4114_v37, %s6903_s17 }
 0x890   : > { %v4259_v30 = vld.sshfl [vmem:[#allocation1] sm:$0xff pattern:$0x73625140] }
 0x891   : > { %4282 = vst [vmem:[#allocation1] ss:$4 sm:$0xff] %v8399_v11 }
 0x892   : > { %3684 = vrot.lane.b32.xlu1 %v8570_v2, %s6900_s27  ;;  %s6831_s27 = scalar_lea.hbm %s9633_s7, 64 }
 0x893   : > { %3751 = vmax.xlane.f32.xlu2 %v3750_v33  ;;  %p6833_p7 = scmp.lt.s32.totalorder %s6831_s27, %s6827_s15 }
 0x894   : > { %6149 = vmatmul.msk.bf16.vlgmr.msra.gmra.mxu3 %vm1034_vm8, %v8493_v7 }
 0x895   : > { %v3222_v3 = vpop.f32.mrf.mxu2  ;;  %p6834_p8 = por %p6833_p7, %p6832_p12 }
 0x897   : > { %v3174_v51 = vpop.f32.mrf.mxu0  ;;  %v8644_v46 = vpop.f32.mrf.mxu1  ;;  %4213 = vrot.lane.b32.xlu0 %v4211_v43, %s6903_s17  ;;  %p6835_p9 = pnand %p6834_p8, %p6830_p5 }
 0x898   : > { %v4283_v37 = vld.sshfl [vmem:[#allocation1] sm:$0xff pattern:$0x73625140] }
 0x899   : > { %4306 = vst [vmem:[#allocation1] ss:$4 sm:$0xff] %v8426_v45 }
 0x89a   : > { %4189 = vrot.lane.b32.xlu1 %v4187_v32, %s6903_s17 }
 0x89b   : > { %v3565_v11 = vpop.permute.xlu0 %3564 }
 0x89c   : > { %v3569_v2 = vsel %vm1034_vm8, %v3565_v11, 0 }
 0x89d   : > { %3578 = vmatpush.bf16.xpose.msrb.mxu1 %v3569_v2 }
 0x89f   : > { %v3198_v5 = vpop.f32.mrf.mxu1 }
 0x8a0   : > { %v4307_v42 = vld.sshfl [vmem:[#allocation1] sm:$0xff pattern:$0x73625140] }
 0x8a1   : > { %v8650_v29 = vpop.f32.mrf.mxu0  ;;  %4330 = vst [vmem:[#allocation1] ss:$4 sm:$0xff] %v8422_v26  ;;  %v3731_v8 = vpop.xlane.xlu1 %3730 }
 0x8a2   : > { %4285 = vrot.lane.b32.xlu1 %v4283_v37, %s6903_s17  ;;  %v3753_v37 = vsel %vm3728_vm13, %v8634_v18, -inf }
 0x8a3   : > { %v3589_v17 = vpop.permute.xlu0 %3588 }
 0x8a4   : > { %v3593_v59 = vsel %vm1034_vm8, %v3589_v17, 0  ;;  %6151 = vmatmul.msk.bf16.vlgmr.msrb.gmra.mxu1 %vm1034_vm8, %v8433_v14 }
 0x8a5   : > { %3602 = vmatpush.bf16.xpose.msra.mxu2 %v3593_v59 }
 0x8a8   : > { %v4331_v45 = vld.sshfl [vmem:[#allocation1] sm:$0xff pattern:$0x73625140] }
 0x8a9   : > { %v3270_v32 = vpop.f32.mrf.mxu0  ;;  %4354 = vst [vmem:[#allocation1] ss:$4 sm:$0xff] %v8437_v16 }
 0x8aa   : > { %4333 = vrot.lane.b32.xlu1 %v4331_v45, %s6903_s17 }
 0x8ab   : > { %4141 = vrot.lane.b32.xlu2 %v8596_v38, %s6903_s17 }
 0x8ac   : > { %6152 = vmatmul.msk.bf16.vlgmr.msra.gmra.mxu2 %vm1034_vm8, %v8451_v52 }
 0x8b0   : > { %v8663_v26 = vld.sshfl [vmem:[#allocation1] sm:$0xff pattern:$0x73625140] }
 0x8b1   : > { %4378 = vst [vmem:[#allocation1] ss:$4 sm:$0xff] %v8458_v31 }
 0x8b3   : > { %v3637_v43 = vpop.permute.xlu0 %3636  ;;  %4165 = vrot.lane.b32.xlu2 %v8609_v44, %s6903_s17 }
 0x8b4   : > { %v3641_v27 = vsel %vm1034_vm8, %v3637_v43, 0 }
 0x8b5   : > { %3650 = vmatpush.bf16.xpose.msra.mxu0 %v3641_v27 }
 0x8b7   : > { %v8669_v16 = vpop.f32.mrf.mxu3  ;;  %v8671_v55 = vpop.f32.mrf.mxu2 }
 0x8b8   : > { %v8673_v38 = vld.sshfl [vmem:[#allocation1] sm:$0xff pattern:$0x73625140] }
 0x8b9   : > { %v3613_v33 = vpop.permute.xlu1 %3612  ;;  %4402 = vst [vmem:[#allocation1] ss:$4 sm:$0xff] %v8455_v21  ;;  %v3825_v21 = vsub.f32 %v8541_v53, %v3731_v8 }
 0x8ba   : > { %v3617_v3 = vsel %vm1034_vm8, %v3613_v33, 0 }
 0x8bb   : > { %3626 = vmatpush.bf16.xpose.msrb.mxu3 %v3617_v3  ;;  %4237 = vrot.lane.b32.xlu2 %v4235_v54, %s6903_s17  ;;  %v3857_v5 = vmul.f32 1.442695, %v3825_v21 }
 0x8bc   : > { %6154 = vmatmul.msk.bf16.vlgmr.msra.gmra.mxu0 %vm1034_vm8, %v8431_v13 }
 0x8bd   : > { %v3734_v31 = vpop.xlane.xlu2 %3733  ;;  %6449 = vpow2.f32 %v3857_v5 }
 0x8bf   : > { %v3246_v44 = vpop.f32.mrf.mxu3  ;;  %v3318_v51 = vpop.f32.mrf.mxu2 }
 0x8c0   : > { %v8682_v11 = vld.sshfl [vmem:[#allocation1] sm:$0xff pattern:$0x73625140] }
 0x8c1   : > { %v8684_v2 = vpop.f32.mrf.mxu1  ;;  %3754 = vmax.xlane.f32.xlu0 %v3753_v37  ;;  %4426 = vst [vmem:[#allocation1] ss:$4 sm:$0xff] %v8439_v9 }
 0x8c2   : > { %6153 = vmatmul.msk.bf16.vlgmr.msrb.gmra.mxu3 %vm1034_vm8, %v8448_v6 }
 0x8c3   : > { %4261 = vrot.lane.b32.xlu2 %v4259_v30, %s6903_s17  ;;  %v8697_v9 = vpop.eup %6449 }
 0x8c4   : > { %v3921_v30 = vsel %vm3728_vm13, %v8697_v9, 0.0 }
 0x8c5   : > { %v8691_v54 = vpop.xlane.xlu2 %3736 }
 0x8c8   : > { %v8693_v17 = vld.sshfl [vmem:[#allocation1] sm:$0xff pattern:$0x73625140] }
 0x8c9   : > { %v3294_v59 = vpop.f32.mrf.mxu1  ;;  %4450 = vst [vmem:[#allocation1] ss:$4 sm:$0xff] %v8475_v28 }
 0x8cd   : > { %v3709_v45 = vpop.permute.xlu2 %3708 }
 0x8ce   : > { %v3713_v32 = vsel %vm1034_vm8, %v3709_v45, 0  ;;  %v3756_v45 = vsel %vm3728_vm13, %v8644_v46, -inf }
 0x8cf   : > { %3722 = vmatpush.bf16.xpose.msra.mxu3 %v3713_v32 }
 0x8d0   : > { %v8699_v53 = vld.sshfl [vmem:[#allocation1] sm:$0xff pattern:$0x73625140] }
 0x8d1   : > { %4474 = vst [vmem:[#allocation1] ss:$4 sm:$0xff] %v8486_v47  ;;  %v3762_v47 = vsel %vm3728_vm13, %v8669_v16, -inf }
 0x8d4   : > { %3922 = vadd.xlane.f32.xlu1 %v3921_v30 }
 0x8d5   : > { %4309 = vrot.lane.b32.xlu0 %v4307_v42, %s6903_s17 }
 0x8d6   : > { %6157 = vmatmul.msk.bf16.vlgmr.msra.gmra.mxu3 %vm1034_vm8, %v8500_v1 }
 0x8d7   : > { %v8707_v28 = vpop.f32.mrf.mxu3 }
 0x8d8   : > { %v8709_v8 = vld.sshfl [vmem:[#allocation1] sm:$0xff pattern:$0x73625140] }
 0x8d9   : > { %v8711_v43 = vpop.f32.mrf.mxu0  ;;  %4498 = vst [vmem:[#allocation1] ss:$4 sm:$0xff] %v8418_v58 }
 0x8dc   : > { %3763 = vmax.xlane.f32.xlu1 %v3762_v47 }
 0x8de   : > { %v3740_v27 = vpop.xlane.xlu0 %3739 }
 0x8df   : > { %v3828_v33 = vsub.f32 %v8577_v60, %v3740_v27  ;;  %v3342_v3 = vpop.f32.mrf.mxu3 }
 0x8e0   : > { %v8717_v42 = vld.sshfl [vmem:[#allocation1] sm:$0xff pattern:$0x73625140] }
 0x8e1   : > { %v3863_v44 = vmul.f32 1.442695, %v3828_v33  ;;  %v3366_v51 = vpop.f32.mrf.mxu0  ;;  %v8719_v37 = vpop.f32.mrf.mxu1  ;;  %4522 = vst [vmem:[#allocation1] ss:$4 sm:$0xff] %v8429_v35  ;;  %v3826_v35 = vsub.f32 %v8555_v12, %v3734_v31 }
 0x8e3   : > { %6451 = vpow2.f32 %v3863_v44  ;;  %v3859_v33 = vmul.f32 1.442695, %v3826_v35 }
 0x8e4   : > { %v8745_v44 = vpop.xlane.xlu1 %3742 }
 0x8e5   : > { %6453 = vpow2.f32 %v3859_v33 }
 0x8e6   : > { %v8734_v32 = vpop.xlane.xlu0 %3745 }
 0x8e7   : > { %v8722_v21 = vpop.f32.mrf.mxu3 }
 0x8e8   : > { %v8724_v58 = vld.sshfl [vmem:[#allocation1] sm:$0xff pattern:$0x73625140] }
 0x8e9   : > { %v8726_v5 = vpop.eup %6451  ;;  %v3390_v59 = vpop.f32.mrf.mxu1  ;;  %4546 = vst [vmem:[#allocation1] ss:$4 sm:$0xff] %v8441_v61  ;;  %v3759_v61 = vsel %vm3728_vm13, %v8632_v57, -inf }
 0x8ea   : > { %v3930_v60 = vsel %vm3728_vm13, %v8726_v5, 0.0 }
 0x8eb   : > { %3931 = vadd.xlane.f32.xlu1 %v3930_v60 }
 0x8ec   : > { %3757 = vmax.xlane.f32.xlu2 %v3756_v45  ;;  %v8754_v45 = vpop.eup %6453 }
 0x8ee   : > { %v8747_v31 = vpop.xlane.xlu0 %3748 }
 0x8ef   : > { %v8736_v30 = vpop.f32.mrf.mxu2  ;;  %v3438_v47 = vpop.f32.mrf.mxu3 }
 0x8f0   : > { %v8738_v27 = vld.sshfl [vmem:[#allocation1] sm:$0xff pattern:$0x73625140]  ;;  %v3924_v47 = vsel %vm3728_vm13, %v8754_v45, 0.0 }
 0x8f1   : > { %v8740_v3 = vpop.f32.mrf.mxu1  ;;  %4570 = vst [vmem:[#allocation1] ss:$4 sm:$0xff] %v8424_v34 }
 0x8f4   : > { %3760 = vmax.xlane.f32.xlu2 %v3759_v61 }
 0x8f7   : > { %v3414_v12 = vpop.f32.mrf.mxu2 }
 0x8f8   : > { %v8749_v51 = vld.sshfl [vmem:[#allocation1] sm:$0xff pattern:$0x73625140] }
 0x8f9   : > { %v8751_v59 = vpop.f32.mrf.mxu0  ;;  %v3486_v60 = vpop.f32.mrf.mxu1  ;;  %4594 = vst [vmem:[#allocation1] ss:$4 sm:$0xff] %v8466_v19 }
 0x8fc   : > { %v3661_v34 = vpop.permute.xlu1 %3660 }
 0x8fd   : > { %v3665_v35 = vsel %vm1034_vm8, %v3661_v34, 0 }
 0x8fe   : > { %3674 = vmatpush.bf16.xpose.msra.mxu1 %v3665_v35 }
 0x8ff   : > { %v8759_v33 = vpop.f32.mrf.mxu2  ;;  %3925 = vadd.xlane.f32.xlu0 %v3924_v47 }
 0x900   : > { %v8761_v61 = vld.sshfl [vmem:[#allocation1] sm:$0xff pattern:$0x73625140] }
 0x901   : > { %v3462_v12 = vpop.f32.mrf.mxu0  ;;  %v4117_v56 = vpop.permute.xlu0 %4116  ;;  %4618 = vst [vmem:[#allocation1] ss:$4 sm:$0xff] %v8470_v63 }
 0x902   : > { %v4123_v19 = vsel %vm2886_vm11, %v4117_v56, 0 }
 0x903   : > { %4132 = vmatpush.bf16.msrb.mxu0 %v4123_v19 }
 0x904   : > { %v3685_v60 = vpop.permute.xlu1 %3684  ;;  %4429 = vrot.lane.b32.xlu1 %v8693_v17, %s6903_s17 }
 0x905   : > { %v3689_v34 = vsel %vm1034_vm8, %v3685_v60, 0  ;;  %6155 = vmatmul.msk.bf16.vlgmr.msra.gmra.mxu1 %vm1034_vm8, %v8479_v48 }
 0x906   : > { %3698 = vmatpush.bf16.xpose.msrb.mxu2 %v3689_v34  ;;  %v8770_v35 = vpop.xlane.xlu2 %3751 }
 0x907   : > { %v3510_v47 = vpop.f32.mrf.mxu2 }
 0x908   : > { %v8772_v12 = vld.sshfl [vmem:[#allocation1] sm:$0xff pattern:$0x73625140] }
 0x909   : > { %v8774_v25 = vpop.f32.mrf.mxu0  ;;  %v4214_v63 = vpop.permute.xlu0 %4213  ;;  %4642 = vst [vmem:[#allocation1] ss:$4 sm:$0xff] %v8446_v20 }
 0x90a   : > { %v4219_v56 = vsel %vm2886_vm11, %v4214_v63, 0 }
 0x90b   : > { %4228 = vmatpush.bf16.msra.mxu0 %v4219_v56 }
 0x90c   : > { %v4190_v17 = vpop.permute.xlu1 %4189  ;;  %4357 = vrot.lane.b32.xlu2 %v8663_v26, %s6903_s17 }
 0x90d   : > { %v4195_v19 = vsel %vm2886_vm11, %v4190_v17, 0  ;;  %6156 = vmatmul.msk.bf16.vlgmr.msrb.gmra.mxu2 %vm1034_vm8, %v8461_v62 }
 0x90e   : > { %v4142_v60 = vpop.permute.xlu2 %4141  ;;  %4204 = vmatpush.bf16.msrb.mxu3 %v4195_v19 }
 0x90f   : > { %v4147_v34 = vsel %vm2886_vm11, %v4142_v60, 0 }
 0x910   : > { %4156 = vmatpush.bf16.msrb.mxu1 %v4147_v34  ;;  %v8784_v47 = vld.sshfl [vmem:[#allocation1] sm:$0xff pattern:$0x73625140] }
 0x911   : > { %v3558_v20 = vpop.f32.mrf.mxu0  ;;  %4666 = vst [vmem:[#allocation1] ss:$4 sm:$0xff] %v8493_v7  ;;  %v3830_v7 = vsub.f32 %v8603_v15, %v8734_v32 }
 0x913   : > { %4381 = vrot.lane.b32.xlu0 %v8673_v38, %s6903_s17  ;;  %v3867_v20 = vmul.f32 1.442695, %v3830_v7 }
 0x914   : > { %v4286_v63 = vpop.permute.xlu1 %4285 }
 0x915   : > { %v4291_v26 = vsel %vm2886_vm11, %v4286_v63, 0  ;;  %6455 = vpow2.f32 %v3867_v20 }
 0x916   : > { %v4166_v56 = vpop.permute.xlu2 %4165  ;;  %4300 = vmatpush.bf16.msra.mxu3 %v4291_v26 }
 0x917   : > { %v4171_v17 = vsel %vm2886_vm11, %v4166_v56, 0  ;;  %v8791_v22 = vpop.f32.mrf.mxu3  ;;  %v3827_v56 = vsub.f32 %v8547_v50, %v8691_v54 }
 0x918   : > { %4180 = vmatpush.bf16.msra.mxu2 %v4171_v17  ;;  %v8793_v19 = vld.sshfl [vmem:[#allocation1] sm:$0xff pattern:$0x73625140] }
 0x919   : > { %4690 = vst [vmem:[#allocation1] ss:$4 sm:$0xff] %v8420_v23  ;;  %v3861_v17 = vmul.f32 1.442695, %v3827_v56 }
 0x91b   : > { %v8810_v7 = vpop.eup %6455  ;;  %6457 = vpow2.f32 %v3861_v17 }
 0x91c   : > { %v3936_v50 = vsel %vm3728_vm13, %v8810_v7, 0.0 }
 0x91e   : > { %v4238_v60 = vpop.permute.xlu2 %4237 }
 0x91f   : > { %v4243_v38 = vsel %vm2886_vm11, %v4238_v60, 0  ;;  %v3534_v34 = vpop.f32.mrf.mxu3 }
 0x920   : > { %4252 = vmatpush.bf16.msra.mxu1 %v4243_v38  ;;  %v8799_v63 = vld.sshfl [vmem:[#allocation1] sm:$0xff pattern:$0x73625140] }
 0x921   : > { %v8801_v26 = vpop.f32.mrf.mxu1  ;;  %4714 = vst [vmem:[#allocation1] ss:$4 sm:$0xff] %v8433_v14  ;;  %v3831_v14 = vsub.f32 %v8567_v4, %v8747_v31  ;;  %v8820_v20 = vpop.eup %6457  ;;  %v3771_v31 = vsel %vm3728_vm13, %v8671_v55, -inf }
 0x922   : > { %v3927_v4 = vsel %vm3728_vm13, %v8820_v20, 0.0 }
 0x923   : > { %v3869_v38 = vmul.f32 1.442695, %v3831_v14  ;;  %v4334_v14 = vpop.permute.xlu1 %4333 }
 0x925   : > { %6459 = vpow2.f32 %v3869_v38 }
 0x926   : > { %v4262_v23 = vpop.permute.xlu2 %4261 }
 0x927   : > { %v4267_v15 = vsel %vm2886_vm11, %v4262_v23, 0 }
 0x928   : > { %4276 = vmatpush.bf16.msrb.mxu2 %v4267_v15  ;;  %v8807_v32 = vld.sshfl [vmem:[#allocation1] sm:$0xff pattern:$0x73625140] }
 0x929   : > { %v3582_v60 = vpop.f32.mrf.mxu1  ;;  %4738 = vst [vmem:[#allocation1] ss:$4 sm:$0xff] %v8451_v52  ;;  %v3829_v52 = vsub.f32 %v8581_v41, %v8745_v44  ;;  %v3768_v41 = vsel %vm3728_vm13, %v8684_v2, -inf  ;;  %v3765_v44 = vsel %vm3728_vm13, %v8650_v29, -inf }
 0x92b   : > { %v3865_v56 = vmul.f32 1.442695, %v3829_v52 }
 0x92d   : > { %6461 = vpow2.f32 %v3865_v56 }
 0x92e   : > { %3937 = vadd.xlane.f32.xlu1 %v3936_v50 }
 0x92f   : > { %v8816_v54 = vpop.f32.mrf.mxu2 }
 0x930   : > { %v8818_v34 = vld.sshfl [vmem:[#allocation1] sm:$0xff pattern:$0x73625140] }
 0x931   : > { %4762 = vst [vmem:[#allocation1] ss:$4 sm:$0xff] %v8448_v6  ;;  %v8834_v6 = vpop.eup %6459 }
 0x932   : > { %v3939_v60 = vsel %vm3728_vm13, %v8834_v6, 0.0 }
 0x933   : > { %v8844_v38 = vpop.eup %6461 }
 0x934   : > { %v3933_v52 = vsel %vm3728_vm13, %v8844_v38, 0.0  ;;  %v8851_v56 = vpop.xlane.xlu0 %3754 }
 0x935   : > { %3928 = vadd.xlane.f32.xlu2 %v3927_v4 }
 0x936   : > { %3772 = vmax.xlane.f32.xlu1 %v3771_v31 }
 0x937   : > { %v3606_v23 = vpop.f32.mrf.mxu2 }
 0x938   : > { %v8829_v17 = vld.sshfl [vmem:[#allocation1] sm:$0xff pattern:$0x73625140] }
 0x939   : > { %v8831_v15 = vpop.f32.mrf.mxu0  ;;  %4786 = vst [vmem:[#allocation1] ss:$4 sm:$0xff] %v8431_v13 }
 0x93d   : > { %3769 = vmax.xlane.f32.xlu2 %v3768_v41  ;;  %3766 = vmax.xlane.f32.xlu0 %v3765_v44 }
 0x93e   : > { %3940 = vadd.xlane.f32.xlu1 %v3939_v60 }
 0x940   : > { %v8842_v50 = vld.sshfl [vmem:[#allocation1] sm:$0xff pattern:$0x73625140] }
 0x941   : > { %v3654_v13 = vpop.f32.mrf.mxu0  ;;  %4810 = vst [vmem:[#allocation1] ss:$4 sm:$0xff] %v8479_v48 }
 0x945   : > { %v8849_v4 = vpop.f32.mrf.mxu3  ;;  %3934 = vadd.xlane.f32.xlu2 %v3933_v52 }
 0x947   : > { %v3923_v31 = vpop.xlane.xlu1 %3922  ;;  %v4310_v13 = vpop.permute.xlu0 %4309 }
 0x948   : > { %6463 = vrcp.f32 %v3923_v31  ;;  %v8853_v23 = vld.sshfl [vmem:[#allocation1] sm:$0xff pattern:$0x73625140]  ;;  %v4315_v52 = vsel %vm2886_vm11, %v4310_v13, 0 }
 0x949   : > { %4834 = vst [vmem:[#allocation1] ss:$4 sm:$0xff] %v8461_v62 }
 0x94d   : > { %v3630_v41 = vpop.f32.mrf.mxu3 }
 0x94e   : > { %v6464_v44 = vpop.eup %6463 }
 0x94f   : > { %v4049_v60 = vmul.f32 %v6464_v44, %v8697_v9  ;;  %v8864_v62 = vpop.xlane.xlu1 %3763 }
 0x950   : > { %v8857_v48 = vld.sshfl [vmem:[#allocation1] sm:$0xff pattern:$0x73625140] }
 0x951   : > { %v4081_v10 = vpack.c.bf16 %v4049_v60, %v4049_v60  ;;  %4405 = vrot.lane.b32.xlu0 %v8682_v11, %s6903_s17  ;;  %4858 = vst [vmem:[#allocation1] ss:$4 sm:$0xff] %v8500_v1 }
 0x953   : > { %6158 = vmatmul.msk.bf16.vlgmr.msrb.gmra.mxu0 %vm4118_vm14, %v4081_v10 }
 0x954   : > { %4324 = vmatpush.bf16.msrb.mxu0 %v4315_v52  ;;  %v4339_v52 = vsel %vm2886_vm11, %v4334_v14, 0 }
 0x957   : > { %4501 = vrot.lane.b32.xlu1 %v8717_v42, %s6903_s17  ;;  %v3832_v42 = vsub.f32 %v8590_v36, %v8770_v35  ;;  %v3774_v36 = vsel %vm3728_vm13, %v8707_v28, -inf }
 0x959   : > { %v8868_v9 = vpop.f32.mrf.mxu3  ;;  %4453 = vrot.lane.b32.xlu0 %v8699_v53, %s6903_s17  ;;  %v3871_v60 = vmul.f32 1.442695, %v3832_v42 }
 0x95d   : > { %4477 = vrot.lane.b32.xlu2 %v8709_v8, %s6903_s17 }
 0x95e   : > { %v3932_v11 = vpop.xlane.xlu1 %3931 }
 0x95f   : > { %6465 = vrcp.f32 %v3932_v11 }
 0x961   : > { %v3726_v1 = vpop.f32.mrf.mxu3 }
 0x965   : > { %v6466_v31 = vpop.eup %6465 }
 0x966   : > { %v4052_v10 = vmul.f32 %v6466_v31, %v8726_v5  ;;  %v3780_v5 = vsel %vm3728_vm13, %v8719_v37, -inf }
 0x968   : > { %v4084_v41 = vpack.c.bf16 %v4052_v10, %v4052_v10  ;;  %v3777_v10 = vsel %vm3728_vm13, %v8711_v43, -inf }
 0x96a   : > { %6161 = vmatmul.msk.bf16.vlgmr.msrb.gmra.mxu3 %vm4118_vm14, %v4084_v41  ;;  %v8894_v41 = vpop.xlane.xlu2 %3757 }
 0x972   : > { %v3926_v44 = vpop.xlane.xlu0 %3925  ;;  %v8898_v42 = vpop.xlane.xlu2 %3760 }
 0x973   : > { %6467 = vrcp.f32 %v3926_v44 }
 0x974   : > { %6469 = vpow2.f32 %v3871_v60 }
 0x979   : > { %v6468_v13 = vpop.eup %6467 }
 0x97a   : > { %v4050_v53 = vmul.f32 %v6468_v13, %v8754_v45  ;;  %v8883_v11 = vpop.eup %6469  ;;  %v4430_v13 = vpop.permute.xlu1 %4429 }
 0x97b   : > { %v3942_v35 = vsel %vm3728_vm13, %v8883_v11, 0.0 }
 0x97c   : > { %v4082_v8 = vpack.c.bf16 %v4050_v53, %v4050_v53  ;;  %v4358_v53 = vpop.permute.xlu2 %4357 }
 0x97e   : > { %6159 = vmatmul.msk.bf16.vlgmr.msrb.gmra.mxu1 %vm4118_vm14, %v4082_v8 }
 0x97f   : > { %4348 = vmatpush.bf16.msrb.mxu1 %v4339_v52 }
 0x981   : > { %3781 = vmax.xlane.f32.xlu1 %v3780_v5 }
 0x982   : > { %v8885_v1 = vpop.f32.mrf.mxu1 }
 0x983   : > { %3775 = vmax.xlane.f32.xlu0 %v3774_v36 }
 0x985   : > { %v4382_v45 = vpop.permute.xlu0 %4381 }
 0x986   : > { %v4387_v14 = vsel %vm2886_vm11, %v4382_v45, 0  ;;  %3943 = vadd.xlane.f32.xlu2 %v3942_v35  ;;  %v4435_v35 = vsel %vm2886_vm11, %v4430_v13, 0 }
 0x987   : > { %4396 = vmatpush.bf16.msrb.mxu3 %v4387_v14 }
 0x98a   : > { %v3678_v31 = vpop.f32.mrf.mxu1 }
 0x98b   : > { %3778 = vmax.xlane.f32.xlu0 %v3777_v10 }
 0x990   : > { %v8896_v44 = vpop.f32.mrf.mxu2 }
 0x998   : > { %v3702_v60 = vpop.f32.mrf.mxu2 }
 0x99a   : > { %4597 = vrot.lane.b32.xlu1 %v8761_v61, %s6903_s17 }
 0x99e   : > { %4573 = vrot.lane.b32.xlu2 %v8749_v51, %s6903_s17 }
 0x99f   : > { %4525 = vrot.lane.b32.xlu0 %v8724_v58, %s6903_s17 }
 0x9a1   : > { %v3938_v8 = vpop.xlane.xlu1 %3937 }
 0x9a2   : > { %6471 = vrcp.f32 %v3938_v8 }
 0x9a6   : > { %4621 = vrot.lane.b32.xlu2 %v8772_v12, %s6903_s17 }
 0x9a8   : > { %v6472_v52 = vpop.eup %6471  ;;  %v3929_v5 = vpop.xlane.xlu2 %3928 }
 0x9a9   : > { %v4054_v36 = vmul.f32 %v6472_v52, %v8810_v7  ;;  %6473 = vrcp.f32 %v3929_v5  ;;  %v8909_v45 = vpop.xlane.xlu1 %3772  ;;  %v4363_v7 = vsel %vm2886_vm11, %v4358_v53, 0  ;;  %v3792_v53 = vsel %vm3728_vm13, %v8740_v3, -inf }
 0x9ab   : > { %v4086_v61 = vpack.c.bf16 %v4054_v36, %v4054_v36 }
 0x9ad   : > { %6163 = vmatmul.msk.bf16.vlgmr.msra.gmra.mxu1 %vm4118_vm14, %v4086_v61 }
 0x9ae   : > { %4444 = vmatpush.bf16.msra.mxu1 %v4435_v35  ;;  %4645 = vrot.lane.b32.xlu2 %v8784_v47, %s6903_s17  ;;  %v3833_v35 = vsub.f32 %v8634_v18, %v8851_v56 }
 0x9af   : > { %v6474_v58 = vpop.eup %6473 }
 0x9b0   : > { %v4051_v51 = vmul.f32 %v6474_v58, %v8820_v20  ;;  %v8916_v12 = vpop.xlane.xlu2 %3769  ;;  %v8920_v13 = vpop.xlane.xlu0 %3766 }
 0x9b1   : > { %v3941_v31 = vpop.xlane.xlu1 %3940 }
 0x9b2   : > { %v4083_v14 = vpack.c.bf16 %v4051_v51, %v4051_v51  ;;  %6475 = vrcp.f32 %v3941_v31 }
 0x9b4   : > { %6160 = vmatmul.msk.bf16.vlgmr.msra.gmra.mxu2 %vm4118_vm14, %v4083_v14  ;;  %v3801_v14 = vsel %vm3728_vm13, %v8774_v25, -inf }
 0x9b5   : > { %4372 = vmatpush.bf16.msra.mxu2 %v4363_v7  ;;  %v8936_v7 = vld.sshfl [vmem:[#allocation1] sm:$0xff pattern:$0x73625140] }
 0x9b8   : > { %v3935_v10 = vpop.xlane.xlu2 %3934  ;;  %v6476_v60 = vpop.eup %6475 }
 0x9b9   : > { %6477 = vrcp.f32 %v3935_v10  ;;  %v4055_v47 = vmul.f32 %v6476_v60, %v8834_v6  ;;  %v3783_v6 = vsel %vm3728_vm13, %v8736_v30, -inf  ;;  %v3804_v60 = vsel %vm3728_vm13, %v8801_v26, -inf }
 0x9bb   : > { %v4087_v52 = vpack.c.bf16 %v4055_v47, %v4055_v47 }
 0x9bf   : > { %v6478_v8 = vpop.eup %6477 }
 0x9c0   : > { %v4053_v20 = vmul.f32 %v6478_v8, %v8844_v38  ;;  %v3873_v38 = vmul.f32 1.442695, %v3833_v35  ;;  %v4478_v8 = vpop.permute.xlu2 %4477 }
 0x9c2   : > { %v4085_v5 = vpack.c.bf16 %v4053_v20, %v4053_v20  ;;  %6479 = vpow2.f32 %v3873_v38 }
 0x9c3   : > { %v4406_v36 = vpop.permute.xlu0 %4405 }
 0x9c4   : > { %v4411_v61 = vsel %vm2886_vm11, %v4406_v36, 0  ;;  %6162 = vmatmul.msk.bf16.vlgmr.msra.gmra.mxu0 %vm4118_vm14, %v4085_v5  ;;  %6164 = vmatmul.msk.bf16.vlgmr.msrb.gmra.mxu2 %vm4118_vm14, %v4087_v52 }
 0x9c5   : > { %3793 = vmax.xlane.f32.xlu1 %v3792_v53  ;;  %4420 = vmatpush.bf16.msra.mxu0 %v4411_v61 }
 0x9c8   : > { %v8938_v18 = vpop.eup %6479 }
 0x9c9   : > { %3784 = vmax.xlane.f32.xlu0 %v3783_v6  ;;  %v3945_v56 = vsel %vm3728_vm13, %v8938_v18, 0.0  ;;  %v4483_v6 = vsel %vm2886_vm11, %v4478_v8, 0  ;;  %v4502_v8 = vpop.permute.xlu1 %4501 }
 0x9cb   : > { %v4454_v58 = vpop.permute.xlu0 %4453 }
 0x9cc   : > { %v4459_v51 = vsel %vm2886_vm11, %v4454_v58, 0 }
 0x9cd   : > { %3802 = vmax.xlane.f32.xlu1 %v3801_v14  ;;  %4468 = vmatpush.bf16.msrb.mxu2 %v4459_v51 }
 0x9d0   : > { %v4134_v31 = vpop.f32.mrf.mxu0 }
 0x9d1   : > { %4890 = vst [vmem:[#allocation1] ss:$2 sm:$0xff] %v4134_v31  ;;  %v3838_v31 = vsub.f32 %v8684_v2, %v8916_v12 }
 0x9d7   : > { %3946 = vadd.xlane.f32.xlu2 %v3945_v56  ;;  %v3798_v56 = vsel %vm3728_vm13, %v8791_v22, -inf }
 0x9d8   : > { %v4136_v10 = vpop.f32.mrf.mxu0 }
 0x9dd   : > { %4549 = vrot.lane.b32.xlu0 %v8738_v27, %s6903_s17  ;;  %v3834_v27 = vsub.f32 %v8644_v46, %v8894_v41  ;;  %v3786_v46 = vsel %vm3728_vm13, %v8722_v21, -inf }
 0x9df   : > { %3805 = vmax.xlane.f32.xlu2 %v3804_v60  ;;  %v3875_v61 = vmul.f32 1.442695, %v3834_v27 }
 0x9e6   : > { %4693 = vrot.lane.b32.xlu1 %v8799_v63, %s6903_s17 }
 0x9ed   : > { %v4206_v47 = vpop.f32.mrf.mxu3 }
 0x9ee   : > { %4896 = vst [vmem:[#allocation1 + $0x11] ss:$2 sm:$0xff] %v4206_v47  ;;  %v3810_v47 = vsel %vm3728_vm13, %v8849_v4, -inf }
 0x9f5   : > { %v4208_v20 = vpop.f32.mrf.mxu3 }
 0x9f6   : > { %v8981_v10 = vpop.xlane.xlu0 %3775 }
 0x9f7   : > { %4717 = vrot.lane.b32.xlu2 %v8807_v32, %s6903_s17  ;;  %v3835_v32 = vsub.f32 %v8632_v57, %v8898_v42  ;;  %v3836_v57 = vsub.f32 %v8669_v16, %v8864_v62  ;;  %v3795_v42 = vsel %vm3728_vm13, %v8759_v33, -inf  ;;  %v3807_v16 = vsel %vm3728_vm13, %v8816_v54, -inf }
 0x9f8   : > { %v3883_v62 = vmul.f32 1.442695, %v3838_v31 }
 0x9f9   : > { %v3944_v52 = vpop.xlane.xlu2 %3943  ;;  %v3879_v14 = vmul.f32 1.442695, %v3836_v57 }
 0x9fa   : > { %6481 = vrcp.f32 %v3944_v52 }
 0x9fb   : > { %v4158_v5 = vpop.f32.mrf.mxu1  ;;  %6483 = vpow2.f32 %v3875_v61 }
 0x9fc   : > { %4892 = vst [vmem:[#allocation1 + $0x1] ss:$2 sm:$0xff] %v4158_v5  ;;  %v3839_v5 = vsub.f32 %v8671_v55, %v8909_v45 }
 0x9fe   : > { %v8991_v52 = vpop.xlane.xlu0 %3778  ;;  %v3885_v61 = vmul.f32 1.442695, %v3839_v5 }
 0x9ff   : > { %4741 = vrot.lane.b32.xlu2 %v8818_v34, %s6903_s17  ;;  %v3877_v34 = vmul.f32 1.442695, %v3835_v32  ;;  %v3819_v32 = vsel %vm3728_vm13, %v8896_v44, -inf }
 0xa00   : > { %v6482_v36 = vpop.eup %6481 }
 0xa01   : > { %v4056_v63 = vmul.f32 %v6482_v36, %v8883_v11  ;;  %v8961_v41 = vpop.eup %6483  ;;  %6485 = vpow2.f32 %v3877_v34  ;;  %v3789_v11 = vsel %vm3728_vm13, %v8751_v59, -inf  ;;  %v8995_v27 = vpop.permute.xlu2 %4573  ;;  %v3813_v36 = vsel %vm3728_vm13, %v8831_v15, -inf }
 0xa02   : > { %v3948_v38 = vsel %vm3728_vm13, %v8961_v41, 0.0  ;;  %6487 = vpow2.f32 %v3879_v14 }
 0xa03   : > { %v4088_v53 = vpack.c.bf16 %v4056_v63, %v4056_v63  ;;  %v4160_v35 = vpop.f32.mrf.mxu1  ;;  %6489 = vpow2.f32 %v3883_v62 }
 0xa04   : > { %v3782_v35 = vpop.xlane.xlu1 %3781  ;;  %6491 = vpow2.f32 %v3885_v61  ;;  %v3837_v61 = vsub.f32 %v8650_v29, %v8920_v13  ;;  %v3841_v29 = vsub.f32 %v8711_v43, %v8991_v52 }
 0xa05   : > { %6165 = vmatmul.msk.bf16.vlgmr.msra.gmra.mxu3 %vm4118_vm14, %v4088_v53  ;;  %v3842_v55 = vsub.f32 %v8719_v37, %v3782_v35  ;;  %v4507_v35 = vsel %vm2886_vm11, %v4502_v8, 0 }
 0xa06   : > { %4492 = vmatpush.bf16.msra.mxu3 %v4483_v6 }
 0xa07   : > { %3787 = vmax.xlane.f32.xlu0 %v3786_v46  ;;  %v8967_v58 = vpop.eup %6485  ;;  %v3816_v46 = vsel %vm3728_vm13, %v8885_v1, -inf }
 0xa08   : > { %v3951_v51 = vsel %vm3728_vm13, %v8967_v58, 0.0  ;;  %v8983_v60 = vpop.eup %6487 }
 0xa09   : > { %v3954_v2 = vsel %vm3728_vm13, %v8983_v60, 0.0  ;;  %v8989_v20 = vpop.eup %6489  ;;  %v9010_v34 = vpop.permute.xlu2 %4621 }
 0xa0a   : > { %v3960_v63 = vsel %vm3728_vm13, %v8989_v20, 0.0 }
 0xa0f   : > { %3790 = vmax.xlane.f32.xlu0 %v3789_v11  ;;  %v3891_v11 = vmul.f32 1.442695, %v3842_v55  ;;  %v3881_v55 = vmul.f32 1.442695, %v3837_v61 }
 0xa10   : > { %3949 = vadd.xlane.f32.xlu1 %v3948_v38 }
 0xa11   : > { %v9003_v6 = vpop.permute.xlu0 %4525  ;;  %6493 = vpow2.f32 %v3891_v11  ;;  %v9021_v31 = vpop.permute.xlu2 %4645 }
 0xa12   : > { %v9040_v11 = vpop.permute.xlu1 %4597 }
 0xa17   : > { %3796 = vmax.xlane.f32.xlu0 %v3795_v42  ;;  %v3822_v42 = vsel %vm3728_vm13, %v8868_v9, -inf }
 0xa18   : > { %3952 = vadd.xlane.f32.xlu1 %v3951_v51 }
 0xa1f   : > { %3799 = vmax.xlane.f32.xlu0 %v3798_v56 }
 0xa20   : > { %3808 = vmax.xlane.f32.xlu1 %v3807_v16 }
 0xa28   : > { %3811 = vmax.xlane.f32.xlu1 %v3810_v47  ;;  %3955 = vadd.xlane.f32.xlu2 %v3954_v2 }
 0xa2a   : > { %v4254_v12 = vpop.f32.mrf.mxu1 }
 0xa2b   : > { %4900 = vst [vmem:[#allocation1 + $0x21] ss:$2 sm:$0xff] %v4254_v12 }
 0xa30   : > { %3814 = vmax.xlane.f32.xlu1 %v3813_v36  ;;  %3961 = vadd.xlane.f32.xlu2 %v3960_v63 }
 0xa32   : > { %v4256_v53 = vpop.f32.mrf.mxu1 }
 0xa33   : > { %4669 = vrot.lane.b32.xlu0 %v8793_v19, %s6903_s17  ;;  %v9014_v19 = vpop.eup %6491 }
 0xa34   : > { %v3963_v51 = vsel %vm3728_vm13, %v9014_v19, 0.0 }
 0xa37   : > { %v4182_v45 = vpop.f32.mrf.mxu2 }
 0xa38   : > { %4894 = vst [vmem:[#allocation1 + $0x10] ss:$2 sm:$0xff] %v4182_v45  ;;  %3820 = vmax.xlane.f32.xlu1 %v3819_v32  ;;  %3817 = vmax.xlane.f32.xlu2 %v3816_v46  ;;  %v3840_v45 = vsub.f32 %v8707_v28, %v8981_v10 }
 0xa3a   : > { %v3887_v32 = vmul.f32 1.442695, %v3840_v45 }
 0xa3b   : > { %4765 = vrot.lane.b32.xlu0 %v8829_v17, %s6903_s17  ;;  %v9023_v17 = vpop.eup %6493 }
 0xa3c   : > { %v3785_v38 = vpop.xlane.xlu0 %3784 }
 0xa3d   : > { %v3843_v37 = vsub.f32 %v8736_v30, %v3785_v38  ;;  %v3972_v30 = vsel %vm3728_vm13, %v9023_v17, 0.0  ;;  %v3794_v38 = vpop.xlane.xlu1 %3793 }
 0xa3f   : > { %v4184_v57 = vpop.f32.mrf.mxu2  ;;  %v3893_v56 = vmul.f32 1.442695, %v3843_v37 }
 0xa40   : > { %3823 = vmax.xlane.f32.xlu1 %v3822_v42  ;;  %3964 = vadd.xlane.f32.xlu2 %v3963_v51 }
 0xa41   : > { %v4230_v14 = vpop.f32.mrf.mxu0  ;;  %6495 = vpow2.f32 %v3893_v56  ;;  %v3846_v56 = vsub.f32 %v8740_v3, %v3794_v38 }
 0xa42   : > { %4898 = vst [vmem:[#allocation1 + $0x20] ss:$2 sm:$0xff] %v4230_v14 }
 0xa45   : > { %v3803_v57 = vpop.xlane.xlu1 %3802 }
 0xa47   : > { %v4278_v16 = vpop.f32.mrf.mxu2  ;;  %v9027_v2 = vpop.eup %6495 }
 0xa48   : > { %4902 = vst [vmem:[#allocation1 + $0x30] ss:$2 sm:$0xff] %v4278_v16  ;;  %3973 = vadd.xlane.f32.xlu2 %v3972_v30  ;;  %v3975_v5 = vsel %vm3728_vm13, %v9027_v2, 0.0  ;;  %v3899_v30 = vmul.f32 1.442695, %v3846_v56 }
 0xa49   : > { %v4232_v62 = vpop.f32.mrf.mxu0 }
 0xa4a   : > { %v3947_v47 = vpop.xlane.xlu2 %3946 }
 0xa4b   : > { %6497 = vrcp.f32 %v3947_v47 }
 0xa4c   : > { %6499 = vpow2.f32 %v3881_v55 }
 0xa4d   : > { %6501 = vpow2.f32 %v3887_v32 }
 0xa4f   : > { %v4280_v12 = vpop.f32.mrf.mxu2  ;;  %v4550_v37 = vpop.permute.xlu0 %4549 }
 0xa50   : > { %3976 = vadd.xlane.f32.xlu2 %v3975_v5 }
 0xa51   : > { %v6498_v36 = vpop.eup %6497 }
 0xa52   : > { %v4057_v63 = vmul.f32 %v6498_v36, %v8938_v18  ;;  %v9038_v46 = vpop.eup %6499  ;;  %v3889_v18 = vmul.f32 1.442695, %v3841_v29  ;;  %v3806_v16 = vpop.xlane.xlu2 %3805  ;;  %v3849_v36 = vsub.f32 %v8774_v25, %v3803_v57  ;;  %v4531_v57 = vsel %vm2886_vm11, %v9003_v6, 0 }
 0xa53   : > { %v3957_v13 = vsel %vm3728_vm13, %v9038_v46, 0.0  ;;  %v9046_v8 = vpop.eup %6501  ;;  %v3850_v38 = vsub.f32 %v8801_v26, %v3806_v16 }
 0xa54   : > { %v4089_v53 = vpack.c.bf16 %v4057_v63, %v4057_v63  ;;  %6503 = vpow2.f32 %v3889_v18  ;;  %v3966_v28 = vsel %vm3728_vm13, %v9046_v8, 0.0  ;;  %v3905_v61 = vmul.f32 1.442695, %v3849_v36 }
 0xa56   : > { %6166 = vmatmul.msk.bf16.vlgmr.msrb.gmra.mxu0 %vm4118_vm14, %v4089_v53 }
 0xa57   : > { %4516 = vmatpush.bf16.msrb.mxu0 %v4507_v35 }
 0xa58   : > { %v9054_v42 = vpop.permute.xlu1 %4693 }
 0xa5a   : > { %v9050_v10 = vpop.eup %6503  ;;  %v9064_v53 = vpop.permute.xlu2 %4717 }
 0xa5b   : > { %v3969_v43 = vsel %vm3728_vm13, %v9050_v10, 0.0 }
 0xa65   : > { %3958 = vadd.xlane.f32.xlu0 %v3957_v13 }
 0xa6d   : > { %3967 = vadd.xlane.f32.xlu0 %v3966_v28 }
 0xa75   : > { %3970 = vadd.xlane.f32.xlu0 %v3969_v43 }
 0xa7a   : > { %v3788_v52 = vpop.xlane.xlu0 %3787 }
 0xa7b   : > { %v3844_v51 = vsub.f32 %v8722_v21, %v3788_v52  ;;  %v3907_v52 = vmul.f32 1.442695, %v3850_v38 }
 0xa7d   : > { %v3895_v14 = vmul.f32 1.442695, %v3844_v51 }
 0xa7f   : > { %6505 = vpow2.f32 %v3895_v14  ;;  %v9082_v14 = vpop.permute.xlu2 %4741 }
 0xa82   : > { %v3791_v62 = vpop.xlane.xlu0 %3790 }
 0xa83   : > { %v3845_v47 = vsub.f32 %v8751_v59, %v3791_v62  ;;  %v3950_v12 = vpop.xlane.xlu1 %3949 }
 0xa84   : > { %6507 = vrcp.f32 %v3950_v12 }
 0xa85   : > { %v9059_v5 = vpop.eup %6505  ;;  %v3897_v63 = vmul.f32 1.442695, %v3845_v47  ;;  %6509 = vpow2.f32 %v3899_v30 }
 0xa86   : > { %v3978_v21 = vsel %vm3728_vm13, %v9059_v5, 0.0 }
 0xa87   : > { %6511 = vpow2.f32 %v3897_v63  ;;  %3979 = vadd.xlane.f32.xlu0 %v3978_v21  ;;  %v4555_v63 = vsel %vm2886_vm11, %v4550_v37, 0 }
 0xa88   : > { %v4302_v3 = vpop.f32.mrf.mxu3 }
 0xa89   : > { %4904 = vst [vmem:[#allocation1 + $0x31] ss:$2 sm:$0xff] %v4302_v3 }
 0xa8a   : > { %v6508_v35 = vpop.eup %6507  ;;  %v3797_v59 = vpop.xlane.xlu0 %3796 }
 0xa8b   : > { %v4058_v55 = vmul.f32 %v6508_v35, %v8961_v41  ;;  %v3847_v45 = vsub.f32 %v8759_v33, %v3797_v59  ;;  %v3953_v32 = vpop.xlane.xlu1 %3952  ;;  %v9068_v25 = vpop.eup %6509 }
 0xa8c   : > { %6513 = vrcp.f32 %v3953_v32  ;;  %v3984_v33 = vsel %vm3728_vm13, %v9068_v25, 0.0 }
 0xa8d   : > { %v9070_v29 = vpop.eup %6511  ;;  %6515 = vpow2.f32 %v3905_v61  ;;  %v4090_v13 = vpack.c.bf16 %v4058_v55, %v4058_v55  ;;  %v3901_v18 = vmul.f32 1.442695, %v3847_v45 }
 0xa8e   : > { %v3981_v28 = vsel %vm3728_vm13, %v9070_v29, 0.0 }
 0xa8f   : > { %6517 = vpow2.f32 %v3901_v18  ;;  %6167 = vmatmul.msk.bf16.vlgmr.msrb.gmra.mxu1 %vm4118_vm14, %v4090_v13  ;;  %3982 = vadd.xlane.f32.xlu1 %v3981_v28 }
 0xa90   : > { %4540 = vmatpush.bf16.msrb.mxu1 %v4531_v57  ;;  %3985 = vadd.xlane.f32.xlu0 %v3984_v33  ;;  %v4304_v41 = vpop.f32.mrf.mxu3  ;;  %6519 = vpow2.f32 %v3907_v52 }
 0xa91   : > { %v4579_v41 = vsel %vm2886_vm11, %v8995_v27, 0 }
 0xa92   : > { %v6514_v43 = vpop.eup %6513  ;;  %v3800_v51 = vpop.xlane.xlu0 %3799 }
 0xa93   : > { %v9080_v26 = vpop.eup %6515  ;;  %v4059_v56 = vmul.f32 %v6514_v43, %v8967_v58  ;;  %v3848_v6 = vsub.f32 %v8791_v22, %v3800_v51  ;;  %v3809_v16 = vpop.xlane.xlu1 %3808 }
 0xa94   : > { %v3993_v12 = vsel %vm3728_vm13, %v9080_v26, 0.0  ;;  %v3851_v21 = vsub.f32 %v8816_v54, %v3809_v16 }
 0xa95   : > { %v9086_v30 = vpop.eup %6517  ;;  %v4091_v62 = vpack.c.bf16 %v4059_v56, %v4059_v56  ;;  %v3903_v47 = vmul.f32 1.442695, %v3848_v6 }
 0xa96   : > { %v3987_v36 = vsel %vm3728_vm13, %v9086_v30, 0.0  ;;  %v3909_v22 = vmul.f32 1.442695, %v3851_v21  ;;  %v9095_v61 = vpop.eup %6519 }
 0xa97   : > { %6521 = vpow2.f32 %v3903_v47  ;;  %6168 = vmatmul.msk.bf16.vlgmr.msra.gmra.mxu2 %vm4118_vm14, %v4091_v62  ;;  %3994 = vadd.xlane.f32.xlu1 %v3993_v12  ;;  %v3996_v54 = vsel %vm3728_vm13, %v9095_v61, 0.0  ;;  %v4627_v47 = vsel %vm2886_vm11, %v9010_v34, 0 }
 0xa98   : > { %4564 = vmatpush.bf16.msra.mxu2 %v4555_v63  ;;  %3988 = vadd.xlane.f32.xlu0 %v3987_v36 }
 0xa9b   : > { %v3812_v58 = vpop.xlane.xlu1 %3811  ;;  %v3956_v3 = vpop.xlane.xlu2 %3955 }
 0xa9c   : > { %v3852_v35 = vsub.f32 %v8849_v4, %v3812_v58  ;;  %6523 = vrcp.f32 %v3956_v3 }
 0xa9d   : > { %v9098_v59 = vpop.eup %6521  ;;  %6525 = vpow2.f32 %v3909_v22 }
 0xa9e   : > { %v3911_v55 = vmul.f32 1.442695, %v3852_v35  ;;  %v3990_v37 = vsel %vm3728_vm13, %v9098_v59, 0.0 }
 0xa9f   : > { %3991 = vadd.xlane.f32.xlu2 %v3990_v37 }
 0xaa0   : > { %6527 = vpow2.f32 %v3911_v55  ;;  %3997 = vadd.xlane.f32.xlu0 %v3996_v54 }
 0xaa2   : > { %v6524_v45 = vpop.eup %6523 }
 0xaa3   : > { %v4060_v32 = vmul.f32 %v6524_v45, %v8983_v60  ;;  %v3815_v13 = vpop.xlane.xlu1 %3814  ;;  %v3962_v18 = vpop.xlane.xlu2 %3961 }
 0xaa4   : > { %v3853_v4 = vsub.f32 %v8831_v15, %v3815_v13  ;;  %6529 = vrcp.f32 %v3962_v18  ;;  %v9106_v38 = vpop.eup %6525 }
 0xaa5   : > { %v4092_v28 = vpack.c.bf16 %v4060_v32, %v4060_v32  ;;  %v3999_v15 = vsel %vm3728_vm13, %v9106_v38, 0.0 }
 0xaa6   : > { %v9108_v57 = vpop.eup %6527  ;;  %v3913_v33 = vmul.f32 1.442695, %v3853_v4 }
 0xaa7   : > { %v4002_v43 = vsel %vm3728_vm13, %v9108_v57, 0.0  ;;  %6169 = vmatmul.msk.bf16.vlgmr.msrb.gmra.mxu3 %vm4118_vm14, %v4092_v28  ;;  %v4670_v28 = vpop.permute.xlu0 %4669 }
 0xaa8   : > { %6531 = vpow2.f32 %v3913_v33  ;;  %4003 = vadd.xlane.f32.xlu2 %v4002_v43  ;;  %4588 = vmatpush.bf16.msrb.mxu3 %v4579_v41 }
 0xaa9   : > { %4000 = vadd.xlane.f32.xlu0 %v3999_v15 }
 0xaaa   : > { %v6530_v60 = vpop.eup %6529 }
 0xaab   : > { %v4062_v52 = vmul.f32 %v6530_v60, %v8989_v20  ;;  %v3821_v51 = vpop.xlane.xlu1 %3820  ;;  %v3818_v56 = vpop.xlane.xlu2 %3817  ;;  %v9154_v60 = vld.sshfl [vmem:[#allocation1] sm:$0xff pattern:$0x75316420] }
 0xaac   : > { %v3854_v6 = vsub.f32 %v8885_v1, %v3818_v56  ;;  %v3855_v12 = vsub.f32 %v8896_v44, %v3821_v51 }
 0xaad   : > { %v4094_v27 = vpack.c.bf16 %v4062_v52, %v4062_v52 }
 0xaae   : > { %v9119_v16 = vpop.eup %6531  ;;  %v3915_v62 = vmul.f32 1.442695, %v3854_v6  ;;  %v3917_v20 = vmul.f32 1.442695, %v3855_v12  ;;  %v4603_v6 = vsel %vm2886_vm11, %v9040_v11, 0  ;;  %v4699_v11 = vsel %vm2886_vm11, %v9054_v42, 0 }
 0xaaf   : > { %v4005_v36 = vsel %vm3728_vm13, %v9119_v16, 0.0  ;;  %6171 = vmatmul.msk.bf16.vlgmr.msra.gmra.mxu1 %vm4118_vm14, %v4094_v27  ;;  %v4766_v15 = vpop.permute.xlu0 %4765 }
 0xab0   : > { %4006 = vadd.xlane.f32.xlu2 %v4005_v36  ;;  %4636 = vmatpush.bf16.msra.mxu1 %v4627_v47  ;;  %6533 = vpow2.f32 %v3915_v62 }
 0xab3   : > { %v3824_v63 = vpop.xlane.xlu1 %3823  ;;  %v3965_v1 = vpop.xlane.xlu2 %3964 }
 0xab4   : > { %v3856_v21 = vsub.f32 %v8868_v9, %v3824_v63  ;;  %6535 = vrcp.f32 %v3965_v1  ;;  %v4651_v9 = vsel %vm2886_vm11, %v9021_v31, 0  ;;  %v4723_v31 = vsel %vm2886_vm11, %v9064_v53, 0 }
 0xab5   : > { %6537 = vpow2.f32 %v3917_v20 }
 0xab6   : > { %v3919_v22 = vmul.f32 1.442695, %v3856_v21  ;;  %v9128_v58 = vpop.eup %6533 }
 0xab7   : > { %v4008_v44 = vsel %vm3728_vm13, %v9128_v58, 0.0 }
 0xab8   : > { %6539 = vpow2.f32 %v3919_v22  ;;  %4009 = vadd.xlane.f32.xlu0 %v4008_v44  ;;  %v4771_v22 = vsel %vm2886_vm11, %v4766_v15, 0 }
 0xaba   : > { %v6536_v34 = vpop.eup %6535 }
 0xabb   : > { %v4063_v3 = vmul.f32 %v6536_v34, %v9014_v19  ;;  %v3974_v35 = vpop.xlane.xlu2 %3973  ;;  %v9133_v55 = vpop.eup %6537 }
 0xabc   : > { %6541 = vrcp.f32 %v3974_v35  ;;  %v4011_v19 = vsel %vm3728_vm13, %v9133_v55, 0.0 }
 0xabd   : > { %v4095_v37 = vpack.c.bf16 %v4063_v3, %v4063_v3 }
 0xabe   : > { %v9135_v54 = vpop.eup %6539 }
 0xabf   : > { %v4014_v45 = vsel %vm3728_vm13, %v9135_v54, 0.0  ;;  %6172 = vmatmul.msk.bf16.vlgmr.msrb.gmra.mxu2 %vm4118_vm14, %v4095_v37 }
 0xac0   : > { %4015 = vadd.xlane.f32.xlu1 %v4014_v45  ;;  %4660 = vmatpush.bf16.msrb.mxu2 %v4651_v9 }
 0xac1   : > { %4012 = vadd.xlane.f32.xlu0 %v4011_v19 }
 0xac2   : > { %v6542_v32 = vpop.eup %6541 }
 0xac3   : > { %v4066_v13 = vmul.f32 %v6542_v32, %v9023_v17  ;;  %v3977_v18 = vpop.xlane.xlu2 %3976  ;;  %v4747_v17 = vsel %vm2886_vm11, %v9082_v14, 0 }
 0xac4   : > { %6543 = vrcp.f32 %v3977_v18 }
 0xac5   : > { %v4098_v4 = vpack.c.bf16 %v4066_v13, %v4066_v13 }
 0xac7   : > { %6175 = vmatmul.msk.bf16.vlgmr.msrb.gmra.mxu1 %vm4118_vm14, %v4098_v4 }
 0xac8   : > { %4732 = vmatpush.bf16.msrb.mxu1 %v4723_v31  ;;  %4861 = vrot.lane.b32.xlu2 %v8936_v7, %s6903_s17 }
 0xaca   : > { %v6544_v33 = vpop.eup %6543 }
 0xacb   : > { %v4067_v41 = vmul.f32 %v6544_v33, %v9027_v2  ;;  %v9183_v33 = vld.sshfl [vmem:[#allocation1 + $0x10] sm:$0xff pattern:$0x75316420] }
 0xacd   : > { %v4099_v43 = vpack.c.bf16 %v4067_v41, %v4067_v41 }
 0xacf   : > { %6176 = vmatmul.msk.bf16.vlgmr.msra.gmra.mxu2 %vm4118_vm14, %v4099_v43 }
 0xad0   : > { %4756 = vmatpush.bf16.msra.mxu2 %v4747_v17 }
 0xad3   : > { %v4326_v53 = vpop.f32.mrf.mxu0 }
 0xad4   : > { %4923 = vst [vmem:[#allocation1] ss:$2 sm:$0xff] %v4326_v53 }
 0xad5   : > { %4789 = vrot.lane.b32.xlu0 %v8842_v50, %s6903_s17 }
 0xad8   : > { %v3959_v52 = vpop.xlane.xlu0 %3958 }
 0xad9   : > { %6545 = vrcp.f32 %v3959_v52  ;;  %4837 = vrot.lane.b32.xlu1 %v8857_v48, %s6903_s17 }
 0xadb   : > { %v4328_v7 = vpop.f32.mrf.mxu0 }
 0xadd   : > { %4813 = vrot.lane.b32.xlu0 %v8853_v23, %s6903_s17  ;;  %v4675_v23 = vsel %vm2886_vm11, %v4670_v28, 0 }
 0xadf   : > { %v6546_v2 = vpop.eup %6545 }
 0xae0   : > { %v4061_v14 = vmul.f32 %v6546_v2, %v9038_v46  ;;  %v3968_v51 = vpop.xlane.xlu0 %3967 }
 0xae1   : > { %6547 = vrcp.f32 %v3968_v51 }
 0xae2   : > { %v4093_v56 = vpack.c.bf16 %v4061_v14, %v4061_v14 }
 0xae4   : > { %6170 = vmatmul.msk.bf16.vlgmr.msra.gmra.mxu0 %vm4118_vm14, %v4093_v56 }
 0xae5   : > { %4612 = vmatpush.bf16.msra.mxu0 %v4603_v6 }
 0xae7   : > { %v6548_v50 = vpop.eup %6547 }
 0xae8   : > { %v4064_v27 = vmul.f32 %v6548_v50, %v9046_v8  ;;  %v3971_v48 = vpop.xlane.xlu0 %3970 }
 0xae9   : > { %6549 = vrcp.f32 %v3971_v48 }
 0xaea   : > { %v4096_v62 = vpack.c.bf16 %v4064_v27, %v4064_v27  ;;  %v9193_v27 = vld.sshfl [vmem:[#allocation1 + $0x20] sm:$0xff pattern:$0x75316420] }
 0xaec   : > { %6173 = vmatmul.msk.bf16.vlgmr.msra.gmra.mxu3 %vm4118_vm14, %v4096_v62 }
 0xaed   : > { %4684 = vmatpush.bf16.msra.mxu3 %v4675_v23 }
 0xaef   : > { %v6550_v46 = vpop.eup %6549 }
 0xaf0   : > { %v4065_v47 = vmul.f32 %v6550_v46, %v9050_v10 }
 0xaf2   : > { %v4097_v12 = vpack.c.bf16 %v4065_v47, %v4065_v47 }
 0xaf4   : > { %6174 = vmatmul.msk.bf16.vlgmr.msrb.gmra.mxu0 %vm4118_vm14, %v4097_v12 }
 0xaf5   : > { %4708 = vmatpush.bf16.msrb.mxu0 %v4699_v11 }
 0xafa   : > { %v3980_v36 = vpop.xlane.xlu0 %3979 }
 0xafb   : > { %6551 = vrcp.f32 %v3980_v36 }
 0xb01   : > { %v6552_v8 = vpop.eup %6551 }
 0xb02   : > { %v4068_v20 = vmul.f32 %v6552_v8, %v9059_v5  ;;  %v3983_v63 = vpop.xlane.xlu1 %3982 }
 0xb03   : > { %6553 = vrcp.f32 %v3983_v63  ;;  %v3986_v1 = vpop.xlane.xlu0 %3985 }
 0xb04   : > { %v4100_v21 = vpack.c.bf16 %v4068_v20, %v4068_v20  ;;  %6555 = vrcp.f32 %v3986_v1  ;;  %v4908_v20 = vld.sshfl [vmem:[#allocation1 + $0x30] sm:$0xff pattern:$0x75316420] }
 0xb06   : > { %6177 = vmatmul.msk.bf16.vlgmr.msrb.gmra.mxu3 %vm4118_vm14, %v4100_v21 }
 0xb07   : > { %4780 = vmatpush.bf16.msrb.mxu3 %v4771_v22  ;;  %v2798_v22 = vld [vmem:[#allocation11 + $0x4] sm:$0xf] }
 0xb09   : > { %v6554_v10 = vpop.eup %6553 }
 0xb0a   : > { %v6556_v42 = vpop.eup %6555  ;;  %v4069_v44 = vmul.f32 %v6554_v10, %v9070_v29  ;;  %v3995_v37 = vpop.xlane.xlu1 %3994 }
 0xb0b   : > { %v4070_v34 = vmul.f32 %v6556_v42, %v9068_v25  ;;  %v3989_v3 = vpop.xlane.xlu0 %3988 }
 0xb0c   : > { %v4101_v35 = vpack.c.bf16 %v4069_v44, %v4069_v44  ;;  %6557 = vrcp.f32 %v3989_v3  ;;  %v4350_v5 = vpop.f32.mrf.mxu1 }
 0xb0d   : > { %v4102_v9 = vpack.c.bf16 %v4070_v34, %v4070_v34  ;;  %4925 = vst [vmem:[#allocation1 + $0x1] ss:$2 sm:$0xff] %v4350_v5  ;;  %6559 = vrcp.f32 %v3995_v37 }
 0xb0e   : > { %6178 = vmatmul.msk.bf16.vlgmr.msra.gmra.mxu0 %vm4118_vm14, %v4101_v35 }
 0xb0f   : > { %6179 = vmatmul.msk.bf16.vlgmr.msra.gmra.mxu1 %vm4118_vm14, %v4102_v9 }
 0xb12   : > { %v6558_v45 = vpop.eup %6557  ;;  %v3992_v19 = vpop.xlane.xlu2 %3991 }
 0xb13   : > { %v4071_v32 = vmul.f32 %v6558_v45, %v9086_v30  ;;  %6561 = vrcp.f32 %v3992_v19  ;;  %v3998_v29 = vpop.xlane.xlu0 %3997  ;;  %v6560_v13 = vpop.eup %6559 }
 0xb14   : > { %6563 = vrcp.f32 %v3998_v29  ;;  %v4352_v25 = vpop.f32.mrf.mxu1  ;;  %v4073_v4 = vmul.f32 %v6560_v13, %v9080_v26  ;;  %v4938_v10 = vld.sshfl [vmem:[#allocation1] sm:$0xff pattern:$0x75316420] }
 0xb15   : > { %v4103_v18 = vpack.c.bf16 %v4071_v32, %v4071_v32 }
 0xb16   : > { %v4105_v15 = vpack.c.bf16 %v4073_v4, %v4073_v4 }
 0xb17   : > { %6180 = vmatmul.msk.bf16.vlgmr.msrb.gmra.mxu2 %vm4118_vm14, %v4103_v18 }
 0xb19   : > { %v6562_v28 = vpop.eup %6561 }
 0xb1a   : > { %v6564_v31 = vpop.eup %6563  ;;  %v4072_v41 = vmul.f32 %v6562_v28, %v9098_v59  ;;  %v4374_v43 = vpop.f32.mrf.mxu2 }
 0xb1b   : > { %v4074_v17 = vmul.f32 %v6564_v31, %v9095_v61  ;;  %4927 = vst [vmem:[#allocation1 + $0x10] ss:$2 sm:$0xff] %v4374_v43  ;;  %v4004_v30 = vpop.xlane.xlu2 %4003 }
 0xb1c   : > { %v4104_v53 = vpack.c.bf16 %v4072_v41, %v4072_v41  ;;  %v4001_v52 = vpop.xlane.xlu0 %4000 }
 0xb1d   : > { %v4106_v7 = vpack.c.bf16 %v4074_v17, %v4074_v17  ;;  %6565 = vrcp.f32 %v4001_v52  ;;  %v4913_v17 = vpack.c.bf16 %v9183_v33, %v9154_v60  ;;  %v4914_v52 = vpack.c.bf16 %v4908_v20, %v9193_v27 }
 0xb1e   : > { %6181 = vmatmul.msk.bf16.vlgmr.msra.gmra.mxu3 %vm4118_vm14, %v4104_v53  ;;  %6182 = vmatmul.msk.bf16.vlgmr.msrb.gmra.mxu0 %vm4118_vm14, %v4105_v15  ;;  %6567 = vrcp.f32 %v4004_v30 }
 0xb1f   : > { %6183 = vmatmul.msk.bf16.vlgmr.msrb.gmra.mxu1 %vm4118_vm14, %v4106_v7  ;;  %v2799_v7 = vld [vmem:[#allocation11 + $0x8] sm:$0xf] }
 0xb22   : > { %v4376_v26 = vpop.f32.mrf.mxu2 }
 0xb23   : > { %v6566_v2 = vpop.eup %6565  ;;  %v4007_v59 = vpop.xlane.xlu2 %4006  ;;  %v5044_v26 = vsel %vm1596_vm9, %v2799_v7, 0 }
 0xb24   : > { %v4075_v14 = vmul.f32 %v6566_v2, %v9106_v38  ;;  %v6568_v61 = vpop.eup %6567 }
 0xb25   : > { %v4076_v56 = vmul.f32 %v6568_v61, %v9108_v57 }
 0xb26   : > { %v4107_v51 = vpack.c.bf16 %v4075_v14, %v4075_v14 }
 0xb27   : > { %v4108_v48 = vpack.c.bf16 %v4076_v56, %v4076_v56 }
 0xb28   : > { %6184 = vmatmul.msk.bf16.vlgmr.msra.gmra.mxu2 %vm4118_vm14, %v4107_v51 }
 0xb2a   : > { %v4398_v6 = vpop.f32.mrf.mxu3 }
 0xb2b   : > { %4929 = vst [vmem:[#allocation1 + $0x11] ss:$2 sm:$0xff] %v4398_v6  ;;  %v4862_v50 = vpop.permute.xlu2 %4861  ;;  %v4010_v47 = vpop.xlane.xlu0 %4009 }
 0xb2c   : > { %v4867_v62 = vsel %vm2886_vm11, %v4862_v50, 0  ;;  %v4446_v23 = vpop.f32.mrf.mxu1 }
 0xb2d   : > { %4933 = vst [vmem:[#allocation1 + $0x21] ss:$2 sm:$0xff] %v4446_v23  ;;  %4876 = vmatpush.bf16.msra.mxu3 %v4867_v62 }
 0xb2e   : > { %6185 = vmatmul.msk.bf16.vlgmr.msrb.gmra.mxu3 %vm4118_vm14, %v4108_v48 }
 0xb32   : > { %v4400_v38 = vpop.f32.mrf.mxu3 }
 0xb33   : > { %v4016_v46 = vpop.xlane.xlu1 %4015  ;;  %v2800_v38 = vld [vmem:[#allocation11 + $0xc] sm:$0xf] }
 0xb34   : > { %6569 = vrcp.f32 %v4016_v46  ;;  %v4448_v57 = vpop.f32.mrf.mxu1  ;;  %v4013_v8 = vpop.xlane.xlu0 %4012 }
 0xb35   : > { %6571 = vrcp.f32 %v4007_v59 }
 0xb36   : > { %6573 = vrcp.f32 %v4013_v8 }
 0xb37   : > { %6575 = vrcp.f32 %v4010_v47  ;;  %v5109_v47 = vsel %vm1596_vm9, %v2800_v38, 0 }
 0xb38   : > { %5118 = vmatpush.bf16.msrb.mxu3 %v5109_v47 }
 0xb3a   : > { %v6570_v12 = vpop.eup %6569 }
 0xb3b   : > { %v4080_v11 = vmul.f32 %v6570_v12, %v9135_v54  ;;  %v6572_v1 = vpop.eup %6571  ;;  %v4955_v54 = vsel %vm1596_vm9, %v2798_v22, 0 }
 0xb3c   : > { %v4077_v42 = vmul.f32 %v6572_v1, %v9119_v16  ;;  %v6574_v44 = vpop.eup %6573  ;;  %v2797_v16 = vld [vmem:[#allocation11] sm:$0xf] }
 0xb3d   : > { %v4112_v36 = vpack.c.bf16 %v4080_v11, %v4080_v11  ;;  %v4079_v37 = vmul.f32 %v6574_v44, %v9133_v55  ;;  %v6576_v9 = vpop.eup %6575  ;;  %v4983_v18 = vsel %vm1596_vm9, %v2797_v16, 0  ;;  %v4939_v55 = vld.sshfl [vmem:[#allocation1 + $0x10] sm:$0xff pattern:$0x75316420] }
 0xb3e   : > { %v4109_v35 = vpack.c.bf16 %v4077_v42, %v4077_v42  ;;  %v4078_v29 = vmul.f32 %v6576_v9, %v9128_v58  ;;  %v4946_v43 = vpack.c.bf16 %v4939_v55, %v4938_v10 }
 0xb3f   : > { %6189 = vmatmul.msk.bf16.vlgmr.msra.gmra.mxu3 %vm4118_vm14, %v4112_v36  ;;  %v4111_v25 = vpack.c.bf16 %v4079_v37, %v4079_v37 }
 0xb40   : > { %v4110_v28 = vpack.c.bf16 %v4078_v29, %v4078_v29 }
 0xb42   : > { %v4470_v63 = vpop.f32.mrf.mxu2 }
 0xb43   : > { %4935 = vst [vmem:[#allocation1 + $0x30] ss:$2 sm:$0xff] %v4470_v63 }
 0xb44   : > { %v4542_v21 = vpop.f32.mrf.mxu1 }
 0xb45   : > { %5014 = vst [vmem:[#allocation1 + $0x1] ss:$2 sm:$0xff] %v4542_v21 }
 0xb47   : > { %v4790_v34 = vpop.permute.xlu0 %4789 }
 0xb48   : > { %v4795_v3 = vsel %vm2886_vm11, %v4790_v34, 0 }
 0xb49   : > { %4804 = vmatpush.bf16.msra.mxu0 %v4795_v3 }
 0xb4a   : > { %v4472_v5 = vpop.f32.mrf.mxu2 }
 0xb4b   : > { %v4838_v45 = vpop.permute.xlu1 %4837 }
 0xb4c   : > { %v4843_v19 = vsel %vm2886_vm11, %v4838_v45, 0  ;;  %6186 = vmatmul.msk.bf16.vlgmr.msra.gmra.mxu0 %vm4118_vm14, %v4109_v35  ;;  %v4544_v32 = vpop.f32.mrf.mxu1 }
 0xb4d   : > { %4964 = vmatpush.bf16.msrb.mxu0 %v4955_v54  ;;  %4852 = vmatpush.bf16.msrb.mxu2 %v4843_v19 }
 0xb4f   : > { %v4814_v13 = vpop.permute.xlu0 %4813 }
 0xb50   : > { %v4819_v4 = vsel %vm2886_vm11, %v4814_v13, 0  ;;  %6188 = vmatmul.msk.bf16.vlgmr.msrb.gmra.mxu2 %vm4118_vm14, %v4111_v25 }
 0xb51   : > { %4828 = vmatpush.bf16.msra.mxu1 %v4819_v4  ;;  %5053 = vmatpush.bf16.msra.mxu2 %v5044_v26 }
 0xb52   : > { %v4566_v31 = vpop.f32.mrf.mxu2 }
 0xb53   : > { %5016 = vst [vmem:[#allocation1 + $0x10] ss:$2 sm:$0xff] %v4566_v31 }
 0xb54   : > { %6187 = vmatmul.msk.bf16.vlgmr.msra.gmra.mxu1 %vm4118_vm14, %v4110_v28 }
 0xb55   : > { %4992 = vmatpush.bf16.msrb.mxu1 %v4983_v18 }
 0xb5a   : > { %v4568_v41 = vpop.f32.mrf.mxu2 }
 0xb5c   : > { %6190 = vmatmul.msk.bf16.vlgmr.msrb.gmra.mxu0 %vm1034_vm8, %v4946_v43  ;;  %v6368_v43 = vld [vmem:[%s9568_s10] ss:$0 sm:$0xff] }
 0xb61   : > { %v4422_v58 = vpop.f32.mrf.mxu0 }
 0xb62   : > { %4931 = vst [vmem:[#allocation1 + $0x20] ss:$2 sm:$0xff] %v4422_v58 }
 0xb64   : > { %6192 = vmatmul.msk.bf16.vlgmr.msrb.gmra.mxu1 %vm1034_vm8, %v4913_v17 }
 0xb69   : > { %v4424_v30 = vpop.f32.mrf.mxu0  ;;  %v4940_v2 = vld.sshfl [vmem:[#allocation1 + $0x20] sm:$0xff pattern:$0x75316420] }
 0xb6f   : > { %v4494_v15 = vpop.f32.mrf.mxu3 }
 0xb70   : > { %4937 = vst [vmem:[#allocation1 + $0x31] ss:$2 sm:$0xff] %v4494_v15 }
 0xb71   : > { %v4518_v53 = vpop.f32.mrf.mxu0 }
 0xb72   : > { %5012 = vst [vmem:[#allocation1] ss:$2 sm:$0xff] %v4518_v53 }
 0xb74   : > { %6193 = vmatmul.msk.bf16.gmra.mxu1 %vm1034_vm8, %v4914_v52  ;;  %v5158_v52 = vrot.slane %v6368_v43, 4 }
 0xb77   : > { %v4941_v59 = vld.sshfl [vmem:[#allocation1 + $0x30] sm:$0xff pattern:$0x75316420]  ;;  %v4496_v14 = vpop.f32.mrf.mxu3 }
 0xb78   : > { %v4947_v61 = vpack.c.bf16 %v4941_v59, %v4940_v2 }
 0xb79   : > { %v4520_v60 = vpop.f32.mrf.mxu0  ;;  %v5027_v27 = vld.sshfl [vmem:[#allocation1] sm:$0xff pattern:$0x75316420] }
 0xb7a   : > { %6191 = vmatmul.msk.bf16.gmra.mxu0 %vm1034_vm8, %v4947_v61 }
 0xb89   : > { %v4590_v33 = vpop.f32.mrf.mxu3 }
 0xb8a   : > { %5018 = vst [vmem:[#allocation1 + $0x11] ss:$2 sm:$0xff] %v4590_v33 }
 0xb8b   : > { %v4614_v51 = vpop.f32.mrf.mxu0 }
 0xb8c   : > { %5020 = vst [vmem:[#allocation1 + $0x20] ss:$2 sm:$0xff] %v4614_v51  ;;  %v4638_v56 = vpop.f32.mrf.mxu1 }
 0xb8d   : > { %5022 = vst [vmem:[#allocation1 + $0x21] ss:$2 sm:$0xff] %v4638_v56 }
 0xb91   : > { %v5028_v6 = vld.sshfl [vmem:[#allocation1 + $0x10] sm:$0xff pattern:$0x75316420]  ;;  %v4592_v50 = vpop.f32.mrf.mxu3 }
 0xb92   : > { %v5035_v48 = vpack.c.bf16 %v5028_v6, %v5027_v27 }
 0xb93   : > { %v4616_v62 = vpop.f32.mrf.mxu0 }
 0xb94   : > { %v4640_v23 = vpop.f32.mrf.mxu1  ;;  %6194 = vmatmul.msk.bf16.vlgmr.msra.gmra.mxu2 %vm1034_vm8, %v5035_v48  ;;  %v5029_v63 = vld.sshfl [vmem:[#allocation1 + $0x20] sm:$0xff pattern:$0x75316420] }
 0xb9a   : > { %v4662_v46 = vpop.f32.mrf.mxu2 }
 0xb9b   : > { %5024 = vst [vmem:[#allocation1 + $0x30] ss:$2 sm:$0xff] %v4662_v46  ;;  %v4710_v57 = vpop.f32.mrf.mxu0 }
 0xb9c   : > { %5077 = vst [vmem:[#allocation1] ss:$2 sm:$0xff] %v4710_v57  ;;  %v4734_v12 = vpop.f32.mrf.mxu1 }
 0xb9d   : > { %5079 = vst [vmem:[#allocation1 + $0x1] ss:$2 sm:$0xff] %v4734_v12 }
 0xba1   : > { %v4686_v11 = vpop.f32.mrf.mxu3 }
 0xba2   : > { %v4664_v36 = vpop.f32.mrf.mxu2  ;;  %5026 = vst [vmem:[#allocation1 + $0x31] ss:$2 sm:$0xff] %v4686_v11 }
 0xba3   : > { %v4712_v8 = vpop.f32.mrf.mxu0 }
 0xba4   : > { %v4736_v20 = vpop.f32.mrf.mxu1  ;;  %v5092_v3 = vld.sshfl [vmem:[#allocation1] sm:$0xff pattern:$0x75316420] }
 0xba9   : > { %v5030_v1 = vld.sshfl [vmem:[#allocation1 + $0x30] sm:$0xff pattern:$0x75316420]  ;;  %v4688_v21 = vpop.f32.mrf.mxu3 }
 0xbaa   : > { %v5036_v22 = vpack.c.bf16 %v5030_v1, %v5029_v63  ;;  %v9626_v21 = vld [vmem:[#allocation25_spill] sm:$0xff] }
 0xbab   : > { %v4758_v10 = vpop.f32.mrf.mxu2 }
 0xbac   : > { %5081 = vst [vmem:[#allocation1 + $0x10] ss:$2 sm:$0xff] %v4758_v10  ;;  %6195 = vmatmul.msk.bf16.gmra.mxu2 %vm1034_vm8, %v5036_v22 }
 0xbb1   : > { %v4782_v42 = vpop.f32.mrf.mxu3 }
 0xbb2   : > { %5083 = vst [vmem:[#allocation1 + $0x11] ss:$2 sm:$0xff] %v4782_v42 }
 0xbb3   : > { %v4760_v44 = vpop.f32.mrf.mxu2 }
 0xbb9   : > { %v5093_v34 = vld.sshfl [vmem:[#allocation1 + $0x10] sm:$0xff pattern:$0x75316420]  ;;  %v4784_v54 = vpop.f32.mrf.mxu3 }
 0xbba   : > { %v5100_v35 = vpack.c.bf16 %v5093_v34, %v5092_v3 }
 0xbbc   : > { %6196 = vmatmul.msk.bf16.vlgmr.msrb.gmra.mxu3 %vm1034_vm8, %v5100_v35  ;;  %v9627_v35 = vld [vmem:[#allocation26_spill] sm:$0xff] }
 0xbc2   : > { %v4878_v37 = vpop.f32.mrf.mxu3 }
 0xbc3   : > { %5091 = vst [vmem:[#allocation1 + $0x31] ss:$2 sm:$0xff] %v4878_v37 }
 0xbc9   : > { %v4806_v5 = vpop.f32.mrf.mxu0 }
 0xbca   : > { %5085 = vst [vmem:[#allocation1 + $0x20] ss:$2 sm:$0xff] %v4806_v5  ;;  %v4880_v9 = vpop.f32.mrf.mxu3  ;;  %v9628_v5 = vld [vmem:[#allocation27_spill] sm:$0xff] }
 0xbd1   : > { %v4808_v45 = vpop.f32.mrf.mxu0  ;;  %v4830_v19 = vpop.f32.mrf.mxu1 }
 0xbd2   : > { %5087 = vst [vmem:[#allocation1 + $0x21] ss:$2 sm:$0xff] %v4830_v19 }
 0xbd3   : > { %v4854_v32 = vpop.f32.mrf.mxu2 }
 0xbd4   : > { %5089 = vst [vmem:[#allocation1 + $0x30] ss:$2 sm:$0xff] %v4854_v32 }
 0xbd9   : > { %v4832_v16 = vpop.f32.mrf.mxu1  ;;  %v5094_v25 = vld.sshfl [vmem:[#allocation1 + $0x20] sm:$0xff pattern:$0x75316420]  ;;  %v4966_v55 = vpop.f32.mrf.mxu0 }
 0xbdb   : > { %v4856_v29 = vpop.f32.mrf.mxu2  ;;  %v5095_v13 = vld.sshfl [vmem:[#allocation1 + $0x30] sm:$0xff pattern:$0x75316420] }
 0xbdc   : > { %v5101_v18 = vpack.c.bf16 %v5095_v13, %v5094_v25  ;;  %v6905_v25 = vmov 839922192  }
 0xbdd   : > { %v5222_v13 = vunpack.c.l.s4 %v6905_v25  ;;  %v9316_v25 = vld [vmem:[%s9570_s12] ss:$0 sm:$0xff] }
 0xbde   : > { %6197 = vmatmul.msk.bf16.gmra.mxu3 %vm1034_vm8, %v5101_v18  ;;  %v6906_v18 = vmov 1985246804  }
 0xbe1   : > { %v4994_v4 = vpop.f32.mrf.mxu1  ;;  %v4968_v7 = vpop.f32.mrf.mxu0 }
 0xbe2   : > { %v4995_v31 = vadd.f32 %v4994_v4, %v4966_v55  ;;  %v5226_v4 = vunpack.c.l.s4 %v6906_v18  ;;  %v9250_v55 = vunpack.c.0.s8 %v5222_v13 }
 0xbe9   : > { %v4996_v30 = vpop.f32.mrf.mxu1 }
 0xbea   : > { %v4997_v2 = vadd.f32 %v4996_v30, %v4968_v7 }
 0xbf7   : > { %v4971_v38 = vpop.f32.mrf.mxu0 }
 0xbff   : > { %v4973_v11 = vpop.f32.mrf.mxu0 }
 0xc17   : > { %v5055_v28 = vpop.f32.mrf.mxu2 }
 0xc18   : > { %v5065_v41 = vadd.f32 %v5055_v28, %v4995_v31  ;;  %v9252_v28 = vunpack.c.0.s8 %v5226_v4 }
 0xc1f   : > { %v5057_v26 = vpop.f32.mrf.mxu2 }
 0xc20   : > { %v5066_v61 = vadd.f32 %v5057_v26, %v4997_v2 }
 0xc2f   : > { %v5060_v46 = vpop.f32.mrf.mxu2 }
 0xc37   : > { %v5062_v63 = vpop.f32.mrf.mxu2 }
 0xc3f   : > { %v5120_v58 = vpop.f32.mrf.mxu3 }
 0xc40   : > { %v5130_v17 = vadd.f32 %v5120_v58, %v5065_v41  ;;  %v9629_v41 = vld [vmem:[#allocation24_spill] sm:$0xff] }
 0xc42   : > { %v5138_v15 = vrot.slane %v5130_v17, 4  ;;  %v5146_v53 = vadd.f32 %v5130_v17, %v8301_v0 }
 0xc44   : > { %v5147_v59 = vadd.f32 %v5138_v15, %v8303_v49  ;;  %v9228_v14 = vadd.f32 %v6368_v43, %v5146_v53 }
 0xc46   : > { %v9230_v60 = vadd.f32 %v5158_v52, %v5147_v59  ;;  %5178 = vst [vmem:[#allocation1] ss:$2 sm:$0xff] %v9228_v14 }
 0xc47   : > { %v5122_v33 = vpop.f32.mrf.mxu3 }
 0xc48   : > { %5180 = vst [vmem:[#allocation1 + $0x1] ss:$2 sm:$0xff] %v9230_v60  ;;  %v5131_v51 = vadd.f32 %v5122_v33, %v5066_v61 }
 0xc4a   : > { %v5139_v56 = vrot.slane %v5131_v51, 4  ;;  %v5148_v0 = vadd.f32 %v5131_v51, %v8306_v24  ;;  %v4999_v24 = vpop.f32.mrf.mxu1 }
 0xc4c   : > { %v5149_v6 = vadd.f32 %v5139_v56, %v8309_v40  ;;  %v9236_v50 = vadd.f32 %v6368_v43, %v5148_v0  ;;  %v5000_v40 = vadd.f32 %v4999_v24, %v4971_v38 }
 0xc4e   : > { %v9238_v27 = vadd.f32 %v5158_v52, %v5149_v6  ;;  %5182 = vst [vmem:[#allocation1 + $0x10] ss:$2 sm:$0xff] %v9236_v50  ;;  %v5067_v47 = vadd.f32 %v5060_v46, %v5000_v40 }
 0xc4f   : > { %v5193_v49 = vld.sshfl [vmem:[#allocation1] sm:$0xff pattern:$0x75316420] }
 0xc50   : > { %5184 = vst [vmem:[#allocation1 + $0x11] ss:$2 sm:$0xff] %v9238_v27  ;;  %v5201_v48 = vsel %vm972_vm7, %v5193_v49, 0.0 }
 0xc51   : > { %5202 = vadd.xlane.f32.xlu1 %v5201_v48 }
 0xc52   : > { %v5001_v20 = vpop.f32.mrf.mxu1 }
 0xc53   : > { %v5002_v1 = vadd.f32 %v5001_v20, %v4973_v11 }
 0xc55   : > { %v5068_v42 = vadd.f32 %v5062_v63, %v5002_v1 }
 0xc57   : > { %v5194_v62 = vld.sshfl [vmem:[#allocation1 + $0x10] sm:$0xff pattern:$0x75316420] }
 0xc58   : > { %v5204_v23 = vsel %vm972_vm7, %v5194_v62, 0.0 }
 0xc59   : > { %5205 = vadd.xlane.f32.xlu2 %v5204_v23 }
 0xc61   : > { %v5125_v57 = vpop.f32.mrf.mxu3 }
 0xc62   : > { %v5132_v12 = vadd.f32 %v5125_v57, %v5067_v47 }
 0xc64   : > { %v5140_v36 = vrot.slane %v5132_v12, 4  ;;  %v5150_v8 = vadd.f32 %v5132_v12, %v8312_v39 }
 0xc66   : > { %v5151_v22 = vadd.f32 %v5140_v36, %v9626_v21  ;;  %v5164_v10 = vadd.f32 %v6368_v43, %v5150_v8 }
 0xc68   : > { %v5165_v44 = vadd.f32 %v5158_v52, %v5151_v22  ;;  %5186 = vst [vmem:[#allocation1 + $0x20] ss:$2 sm:$0xff] %v5164_v10 }
 0xc69   : > { %v5127_v34 = vpop.f32.mrf.mxu3 }
 0xc6a   : > { %5188 = vst [vmem:[#allocation1 + $0x21] ss:$2 sm:$0xff] %v5165_v44  ;;  %v5133_v54 = vadd.f32 %v5127_v34, %v5068_v42 }
 0xc6c   : > { %v5141_v3 = vrot.slane %v5133_v54, 4  ;;  %v5152_v37 = vadd.f32 %v5133_v54, %v9627_v35  ;;  %v6237_v35 = vld [vmem:[#allocation12 + $0x8] sm:$0xff] }
 0xc6d   : > { %5511 = vmatpush.bf16.msra.mxu0 %v6237_v35 }
 0xc6e   : > { %v5153_v9 = vadd.f32 %v5141_v3, %v9628_v5  ;;  %v5166_v45 = vadd.f32 %v6368_v43, %v5152_v37 }
 0xc70   : > { %v5167_v19 = vadd.f32 %v5158_v52, %v5153_v9  ;;  %5190 = vst [vmem:[#allocation1 + $0x30] ss:$2 sm:$0xff] %v5166_v45  ;;  %v6236_v9 = vld [vmem:[#allocation12] sm:$0xff] }
 0xc71   : > { %v5195_v39 = vld.sshfl [vmem:[#allocation1 + $0x20] sm:$0xff pattern:$0x75316420]  ;;  %5512 = vmatpush.bf16.msra.mxu0 %v6236_v9 }
 0xc72   : > { %5192 = vst [vmem:[#allocation1 + $0x31] ss:$2 sm:$0xff] %v5167_v19  ;;  %v5207_v32 = vsel %vm972_vm7, %v5195_v39, 0.0 }
 0xc73   : > { %5208 = vadd.xlane.f32.xlu0 %v5207_v32  ;;  %v9311_v32 = vld [vmem:[%s9569_s11] ss:$0 sm:$0xff] }
 0xc74   : > { %v9319_v4 = vrot.slane %v9311_v32, 4 }
 0xc79   : > { %v5196_v16 = vld.sshfl [vmem:[#allocation1 + $0x30] sm:$0xff pattern:$0x75316420] }
 0xc7a   : > { %v5210_v29 = vsel %vm972_vm7, %v5196_v16, 0.0 }
 0xc7b   : > { %5211 = vadd.xlane.f32.xlu2 %v5210_v29 }
 0xcc4   : > { %v5203_v31 = vpop.xlane.xlu1 %5202 }
 0xcc5   : > { %v5213_v43 = vmul.f32 %v5203_v31, %v9629_v41 }
 0xcc7   : > { %v5224_v58 = vperm.slane %v5213_v43, %v9250_v55  ;;  %v5228_v17 = vperm.slane %v5213_v43, %v9252_v28 }
 0xcc9   : > { %v9258_v30 = vsub.f32 %v9228_v14, %v5224_v58  ;;  %v9261_v15 = vsub.f32 %v9230_v60, %v5228_v17  ;;  %v9324_v17 = vrot.slane %v9316_v25, 4 }
 0xccb   : > { %v5269_v53 = vmul.f32 %v9258_v30, %v9258_v30  ;;  %v5270_v52 = vmul.f32 %v9261_v15, %v9261_v15 }
 0xccc   : > { %v5206_v7 = vpop.xlane.xlu2 %5205 }
 0xccd   : > { %5285 = vst [vmem:[#allocation1] ss:$2 sm:$0xff] %v5269_v53  ;;  %v5214_v26 = vmul.f32 %v5206_v7, %v9629_v41 }
 0xcce   : > { %5287 = vst [vmem:[#allocation1 + $0x1] ss:$2 sm:$0xff] %v5270_v52 }
 0xccf   : > { %v5232_v2 = vperm.slane %v5214_v26, %v9250_v55  ;;  %v5236_v59 = vperm.slane %v5214_v26, %v9252_v28 }
 0xcd1   : > { %v9271_v14 = vsub.f32 %v9236_v50, %v5232_v2  ;;  %v9274_v61 = vsub.f32 %v9238_v27, %v5236_v59 }
 0xcd3   : > { %v5271_v60 = vmul.f32 %v9271_v14, %v9271_v14  ;;  %v5272_v33 = vmul.f32 %v9274_v61, %v9274_v61 }
 0xcd5   : > { %5289 = vst [vmem:[#allocation1 + $0x10] ss:$2 sm:$0xff] %v5271_v60  ;;  %v5300_v51 = vld.sshfl [vmem:[#allocation1] sm:$0xff pattern:$0x75316420] }
 0xcd6   : > { %5291 = vst [vmem:[#allocation1 + $0x11] ss:$2 sm:$0xff] %v5272_v33  ;;  %v5308_v56 = vsel %vm972_vm7, %v5300_v51, 0.0 }
 0xcd7   : > { %5309 = vadd.xlane.f32.xlu1 %v5308_v56 }
 0xcdd   : > { %v5301_v0 = vld.sshfl [vmem:[#allocation1 + $0x10] sm:$0xff pattern:$0x75316420] }
 0xcde   : > { %v5311_v6 = vsel %vm972_vm7, %v5301_v0, 0.0 }
 0xcdf   : > { %5312 = vadd.xlane.f32.xlu0 %v5311_v6 }
 0xce6   : > { %v5209_v50 = vpop.xlane.xlu0 %5208 }
 0xce7   : > { %v5215_v27 = vmul.f32 %v5209_v50, %v9629_v41 }
 0xce9   : > { %v5240_v49 = vperm.slane %v5215_v27, %v9250_v55  ;;  %v5244_v48 = vperm.slane %v5215_v27, %v9252_v28 }
 0xceb   : > { %v9285_v62 = vsub.f32 %v5164_v10, %v5240_v49  ;;  %v9287_v23 = vsub.f32 %v5165_v44, %v5244_v48 }
 0xced   : > { %v5273_v38 = vmul.f32 %v9285_v62, %v9285_v62  ;;  %v5274_v24 = vmul.f32 %v9287_v23, %v9287_v23 }
 0xcee   : > { %v5212_v46 = vpop.xlane.xlu2 %5211 }
 0xcef   : > { %5293 = vst [vmem:[#allocation1 + $0x20] ss:$2 sm:$0xff] %v5273_v38  ;;  %v5216_v40 = vmul.f32 %v5212_v46, %v9629_v41 }
 0xcf0   : > { %5295 = vst [vmem:[#allocation1 + $0x21] ss:$2 sm:$0xff] %v5274_v24 }
 0xcf1   : > { %v5248_v47 = vperm.slane %v5216_v40, %v9250_v55  ;;  %v5252_v57 = vperm.slane %v5216_v40, %v9252_v28 }
 0xcf3   : > { %v9296_v12 = vsub.f32 %v5166_v45, %v5248_v47  ;;  %v9298_v11 = vsub.f32 %v5167_v19, %v5252_v57 }
 0xcf5   : > { %v5275_v36 = vmul.f32 %v9296_v12, %v9296_v12  ;;  %v5276_v8 = vmul.f32 %v9298_v11, %v9298_v11 }
 0xcf7   : > { %5297 = vst [vmem:[#allocation1 + $0x30] ss:$2 sm:$0xff] %v5275_v36  ;;  %v5302_v20 = vld.sshfl [vmem:[#allocation1 + $0x20] sm:$0xff pattern:$0x75316420] }
 0xcf8   : > { %5299 = vst [vmem:[#allocation1 + $0x31] ss:$2 sm:$0xff] %v5276_v8  ;;  %v5314_v63 = vsel %vm972_vm7, %v5302_v20, 0.0 }
 0xcf9   : > { %5315 = vadd.xlane.f32.xlu2 %v5314_v63 }
 0xcff   : > { %v5303_v1 = vld.sshfl [vmem:[#allocation1 + $0x30] sm:$0xff pattern:$0x75316420] }
 0xd00   : > { %v5317_v21 = vsel %vm972_vm7, %v5303_v1, 0.0 }
 0xd01   : > { %5318 = vadd.xlane.f32.xlu1 %v5317_v21 }
 0xd4a   : > { %v5310_v22 = vpop.xlane.xlu1 %5309 }
 0xd4b   : > { %v5320_v10 = vmul.f32 %v5310_v22, %v9629_v41 }
 0xd4d   : > { %v5324_v42 = vadd.f32 1e-05, %v5320_v10 }
 0xd4f   : > { %6577 = vrsqrt.f32 %v5324_v42  ;;  %vm5334_vm9 = vweird.f32 %v5324_v42 }
 0xd52   : > { %v5313_v44 = vpop.xlane.xlu0 %5312 }
 0xd53   : > { %v5321_v34 = vmul.f32 %v5313_v44, %v9629_v41 }
 0xd55   : > { %v6578_v54 = vpop.eup %6577  ;;  %v5325_v3 = vadd.f32 1e-05, %v5321_v34 }
 0xd56   : > { %v5329_v37 = vmul.f32 %v6578_v54, %v5324_v42  ;;  %vm5335_vm8 = vweird.f32 %v6578_v54 }
 0xd57   : > { %6579 = vrsqrt.f32 %v5325_v3  ;;  %vm5336_vm15 = vmor %vm5334_vm9, %vm5335_vm8  ;;  %vm5344_vm1 = vweird.f32 %v5325_v3  ;;  %vm5890_vm9 = vcmask 257024  }
 0xd58   : > { %v5330_v5 = vmul.f32 %v6578_v54, %v5329_v37 }
 0xd5a   : > { %v5331_v45 = vmul.f32 0.5, %v5330_v5 }
 0xd5c   : > { %v5332_v19 = vsub.f32 1.5, %v5331_v45 }
 0xd5d   : > { %v6580_v39 = vpop.eup %6579 }
 0xd5e   : > { %v5333_v16 = vmul.f32 %v6578_v54, %v5332_v19  ;;  %v5339_v29 = vmul.f32 %v6580_v39, %v5325_v3  ;;  %vm5345_vm0 = vweird.f32 %v6580_v39 }
 0xd5f   : > { %vm5346_vm2 = vmor %vm5344_vm1, %vm5345_vm0 }
 0xd60   : > { %v5337_v13 = vsel %vm5336_vm15, %v6578_v54, %v5333_v16  ;;  %v5340_v18 = vmul.f32 %v6580_v39, %v5339_v29 }
 0xd61   : > { %v5375_v31 = vperm.slane %v5337_v13, %v9250_v55  ;;  %v5379_v43 = vperm.slane %v5337_v13, %v9252_v28 }
 0xd62   : > { %v5341_v58 = vmul.f32 0.5, %v5340_v18 }
 0xd63   : > { %v5412_v53 = vmul.f32 %v5375_v31, %v9258_v30  ;;  %v5413_v52 = vmul.f32 %v5379_v43, %v9261_v15 }
 0xd64   : > { %v5342_v7 = vsub.f32 1.5, %v5341_v58 }
 0xd65   : > { %v5425_v26 = vmul.f32 %v9311_v32, %v5412_v53  ;;  %v5426_v2 = vmul.f32 %v9319_v4, %v5413_v52 }
 0xd66   : > { %v5343_v59 = vmul.f32 %v6580_v39, %v5342_v7 }
 0xd67   : > { %v9331_v60 = vadd.f32 %v9316_v25, %v5425_v26  ;;  %v9334_v33 = vadd.f32 %v9324_v17, %v5426_v2 }
 0xd68   : > { %v5347_v51 = vsel %vm5346_vm2, %v6580_v39, %v5343_v59 }
 0xd69   : > { %5454 = vst [vmem:[#allocation1] ss:$2 sm:$0xff] %v9331_v60  ;;  %v5383_v30 = vperm.slane %v5347_v51, %v9250_v55  ;;  %v5387_v15 = vperm.slane %v5347_v51, %v9252_v28 }
 0xd6a   : > { %5456 = vst [vmem:[#allocation1 + $0x1] ss:$2 sm:$0xff] %v9334_v33 }
 0xd6b   : > { %v5414_v56 = vmul.f32 %v5383_v30, %v9271_v14  ;;  %v5415_v0 = vmul.f32 %v5387_v15, %v9274_v61 }
 0xd6c   : > { %v5316_v6 = vpop.xlane.xlu2 %5315 }
 0xd6d   : > { %v5427_v50 = vmul.f32 %v9311_v32, %v5414_v56  ;;  %v5428_v27 = vmul.f32 %v9319_v4, %v5415_v0  ;;  %v5322_v49 = vmul.f32 %v5316_v6, %v9629_v41 }
 0xd6f   : > { %v9346_v48 = vadd.f32 %v9316_v25, %v5427_v50  ;;  %v9349_v38 = vadd.f32 %v9324_v17, %v5428_v27  ;;  %v5326_v24 = vadd.f32 1e-05, %v5322_v49 }
 0xd71   : > { %5458 = vst [vmem:[#allocation1 + $0x10] ss:$2 sm:$0xff] %v9346_v48  ;;  %6581 = vrsqrt.f32 %v5326_v24  ;;  %v5469_v57 = vld.sshfl [vmem:[#allocation1] sm:$0xff pattern:$0x75316420]  ;;  %vm5354_vm4 = vweird.f32 %v5326_v24 }
 0xd72   : > { %5460 = vst [vmem:[#allocation1 + $0x11] ss:$2 sm:$0xff] %v9349_v38 }
 0xd74   : > { %v5319_v14 = vpop.xlane.xlu1 %5318 }
 0xd75   : > { %v5323_v61 = vmul.f32 %v5319_v14, %v9629_v41 }
 0xd77   : > { %v6582_v46 = vpop.eup %6581  ;;  %v5327_v40 = vadd.f32 1e-05, %v5323_v61  ;;  %v6372_v61 = vld [vmem:[%s9630_s13] ss:$0 sm:$0xff]  ;;  %s5900_s13 = scalar_lea.sflag [#allocation5], %s7157_s26 }
 0xd78   : > { %v5349_v47 = vmul.f32 %v6582_v46, %v5326_v24  ;;  %vm5355_vm3 = vweird.f32 %v6582_v46 }
 0xd79   : > { %6583 = vrsqrt.f32 %v5327_v40  ;;  %v5470_v36 = vld.sshfl [vmem:[#allocation1 + $0x10] sm:$0xff pattern:$0x75316420]  ;;  %vm5356_vm5 = vmor %vm5354_vm4, %vm5355_vm3  ;;  %vm5364_vm10 = vweird.f32 %v5327_v40 }
 0xd7a   : > { %v5350_v8 = vmul.f32 %v6582_v46, %v5349_v47  ;;  %v5477_v20 = vpack.c.bf16 %v5470_v36, %v5469_v57 }
 0xd7c   : > { %v5351_v63 = vmul.f32 0.5, %v5350_v8  ;;  %6206 = vmatmul.msk.bf16.vlgmr.msra.gmra.mxu0 %vm972_vm7, %v5477_v20 }
 0xd7e   : > { %v5352_v1 = vsub.f32 1.5, %v5351_v63 }
 0xd7f   : > { %v6584_v21 = vpop.eup %6583 }
 0xd80   : > { %v5353_v22 = vmul.f32 %v6582_v46, %v5352_v1  ;;  %v5359_v10 = vmul.f32 %v6584_v21, %v5327_v40  ;;  %vm5365_vm6 = vweird.f32 %v6584_v21 }
 0xd81   : > { %vm5366_vm11 = vmor %vm5364_vm10, %vm5365_vm6 }
 0xd82   : > { %v5357_v42 = vsel %vm5356_vm5, %v6582_v46, %v5353_v22  ;;  %v5360_v44 = vmul.f32 %v6584_v21, %v5359_v10 }
 0xd83   : > { %v5391_v34 = vperm.slane %v5357_v42, %v9250_v55  ;;  %v5395_v54 = vperm.slane %v5357_v42, %v9252_v28 }
 0xd84   : > { %v5361_v3 = vmul.f32 0.5, %v5360_v44 }
 0xd85   : > { %v5416_v35 = vmul.f32 %v5391_v34, %v9285_v62  ;;  %v5417_v37 = vmul.f32 %v5395_v54, %v9287_v23 }
 0xd86   : > { %v5362_v5 = vsub.f32 1.5, %v5361_v3 }
 0xd87   : > { %v5429_v9 = vmul.f32 %v9311_v32, %v5416_v35  ;;  %v5430_v45 = vmul.f32 %v9319_v4, %v5417_v37 }
 0xd88   : > { %v5363_v19 = vmul.f32 %v6584_v21, %v5362_v5 }
 0xd89   : > { %v9362_v39 = vadd.f32 %v9316_v25, %v5429_v9  ;;  %v9365_v16 = vadd.f32 %v9324_v17, %v5430_v45 }
 0xd8a   : > { %v5367_v29 = vsel %vm5366_vm11, %v6584_v21, %v5363_v19 }
 0xd8b   : > { %5462 = vst [vmem:[#allocation1 + $0x20] ss:$2 sm:$0xff] %v9362_v39  ;;  %v5399_v62 = vperm.slane %v5367_v29, %v9250_v55  ;;  %v5403_v23 = vperm.slane %v5367_v29, %v9252_v28 }
 0xd8c   : > { %5464 = vst [vmem:[#allocation1 + $0x21] ss:$2 sm:$0xff] %v9365_v16 }
 0xd8d   : > { %v5418_v13 = vmul.f32 %v5399_v62, %v9296_v12  ;;  %v5419_v18 = vmul.f32 %v5403_v23, %v9298_v11  ;;  %v6241_v12 = vld [vmem:[#allocation14 + $0x18] sm:$0xff]  ;;  %v6240_v11 = vld [vmem:[#allocation14 + $0x10] sm:$0xff] }
 0xd8e   : > { %5577 = vmatpush.bf16.msra.mxu1 %v6241_v12 }
 0xd8f   : > { %v5431_v31 = vmul.f32 %v9311_v32, %v5418_v13  ;;  %v5432_v43 = vmul.f32 %v9319_v4, %v5419_v18  ;;  %v6239_v32 = vld [vmem:[#allocation14 + $0x8] sm:$0xff] }
 0xd91   : > { %v9376_v58 = vadd.f32 %v9316_v25, %v5431_v31  ;;  %v9379_v53 = vadd.f32 %v9324_v17, %v5432_v43  ;;  %v6238_v25 = vld [vmem:[#allocation14] sm:$0xff]  ;;  %v6371_v17 = vld [vmem:[%s9572_s14] ss:$0 sm:$0xff] }
 0xd92   : > { %5578 = vmatpush.bf16.msra.mxu1 %v6240_v11 }
 0xd93   : > { %5466 = vst [vmem:[#allocation1 + $0x30] ss:$2 sm:$0xff] %v9376_v58  ;;  %v5471_v52 = vld.sshfl [vmem:[#allocation1 + $0x20] sm:$0xff pattern:$0x75316420] }
 0xd94   : > { %5468 = vst [vmem:[#allocation1 + $0x31] ss:$2 sm:$0xff] %v9379_v53 }
 0xd96   : > { %5579 = vmatpush.bf16.msra.mxu1 %v6239_v32 }
 0xd9a   : > { %5580 = vmatpush.bf16.msra.mxu1 %v6238_v25 }
 0xd9b   : > { %v5472_v7 = vld.sshfl [vmem:[#allocation1 + $0x30] sm:$0xff pattern:$0x75316420] }
 0xd9c   : > { %v5478_v26 = vpack.c.bf16 %v5472_v7, %v5471_v52 }
 0xd9e   : > { %6207 = vmatmul.msk.bf16.gmra.mxu0 %vm972_vm7, %v5478_v26 }
 0xdf9   : > { %v5514_v4 = vpop.f32.mrf.mxu0 }
 0xdfa   : > { %v5515_v2 = vadd.f32 %v6371_v17, %v5514_v4 }
 0xdfc   : > { %v5524_v30 = vmax.f32 %v5515_v2, 0.0 }
 0xe01   : > { %v5516_v59 = vpop.f32.mrf.mxu0 }
 0xe02   : > { %v5517_v51 = vadd.f32 %v6371_v17, %v5516_v59 }
 0xe04   : > { %v5525_v15 = vmax.f32 %v5517_v51, 0.0 }
 0xe06   : > { %v5528_v56 = vpack.c.bf16 %v5525_v15, %v5524_v30 }
 0xe08   : > { %6224 = vmatmul.msk.bf16.vlgmr.msra.gmra.mxu1 %vm5566_vm12, %v5528_v56 }
 0xe1b   : > { %v5519_v0 = vpop.f32.mrf.mxu0 }
 0xe1c   : > { %v5520_v6 = vadd.f32 %v6371_v17, %v5519_v0 }
 0xe1e   : > { %v5526_v49 = vmax.f32 %v5520_v6, 0.0 }
 0xe23   : > { %v5521_v50 = vpop.f32.mrf.mxu0 }
 0xe24   : > { %v5522_v27 = vadd.f32 %v6371_v17, %v5521_v50 }
 0xe26   : > { %v5527_v24 = vmax.f32 %v5522_v27, 0.0 }
 0xe28   : > { %v5529_v14 = vpack.c.bf16 %v5527_v24, %v5526_v49 }
 0xe2a   : > { %6225 = vmatmul.msk.bf16.gmra.mxu1 %vm5566_vm12, %v5529_v14 }
 0xe85   : > { %v5582_v46 = vpop.f32.mrf.mxu1 }
 0xe86   : > { %v5583_v40 = vadd.f32 %v6372_v61, %v5582_v46 }
 0xe88   : > { %v5596_v47 = vrot.slane %v5583_v40, 4  ;;  %v5604_v57 = vadd.f32 %v5583_v40, %v9331_v60 }
 0xe8a   : > { %v5605_v36 = vadd.f32 %v5596_v47, %v9334_v33  ;;  %5622 = vst [vmem:[#allocation1] ss:$2 sm:$0xff] %v5604_v57 }
 0xe8c   : > { %5624 = vst [vmem:[#allocation1 + $0x1] ss:$2 sm:$0xff] %v5605_v36 }
 0xe8d   : > { %v5584_v8 = vpop.f32.mrf.mxu1 }
 0xe8e   : > { %v5585_v20 = vadd.f32 %v6372_v61, %v5584_v8 }
 0xe90   : > { %v5597_v63 = vrot.slane %v5585_v20, 4  ;;  %v5606_v1 = vadd.f32 %v5585_v20, %v9346_v48 }
 0xe92   : > { %v5607_v21 = vadd.f32 %v5597_v63, %v9349_v38  ;;  %5626 = vst [vmem:[#allocation1 + $0x10] ss:$2 sm:$0xff] %v5606_v1 }
 0xe93   : > { %v5637_v22 = vld.sshfl [vmem:[#allocation1] sm:$0xff pattern:$0x75316420] }
 0xe94   : > { %5628 = vst [vmem:[#allocation1 + $0x11] ss:$2 sm:$0xff] %v5607_v21  ;;  %v5645_v10 = vsel %vm972_vm7, %v5637_v22, 0.0 }
 0xe95   : > { %5646 = vadd.xlane.f32.xlu0 %v5645_v10 }
 0xe9b   : > { %v5638_v42 = vld.sshfl [vmem:[#allocation1 + $0x10] sm:$0xff pattern:$0x75316420] }
 0xe9c   : > { %v5648_v60 = vsel %vm972_vm7, %v5638_v42, 0.0 }
 0xe9d   : > { %5649 = vadd.xlane.f32.xlu2 %v5648_v60 }
 0xea7   : > { %v5587_v33 = vpop.f32.mrf.mxu1 }
 0xea8   : > { %v5588_v44 = vadd.f32 %v6372_v61, %v5587_v33 }
 0xeaa   : > { %v5598_v34 = vrot.slane %v5588_v44, 4  ;;  %v5608_v54 = vadd.f32 %v5588_v44, %v9362_v39 }
 0xeac   : > { %v5609_v3 = vadd.f32 %v5598_v34, %v9365_v16  ;;  %5630 = vst [vmem:[#allocation1 + $0x20] ss:$2 sm:$0xff] %v5608_v54 }
 0xeae   : > { %5632 = vst [vmem:[#allocation1 + $0x21] ss:$2 sm:$0xff] %v5609_v3 }
 0xeaf   : > { %v5589_v48 = vpop.f32.mrf.mxu1 }
 0xeb0   : > { %v5590_v38 = vadd.f32 %v6372_v61, %v5589_v48  ;;  %v9455_v48 = vld [vmem:[%s9631_s25] ss:$0 sm:$0xff] }
 0xeb2   : > { %v5599_v35 = vrot.slane %v5590_v38, 4  ;;  %v5610_v37 = vadd.f32 %v5590_v38, %v9376_v58 }
 0xeb4   : > { %v5611_v5 = vadd.f32 %v5599_v35, %v9379_v53  ;;  %5634 = vst [vmem:[#allocation1 + $0x30] ss:$2 sm:$0xff] %v5610_v37 }
 0xeb5   : > { %v5639_v9 = vld.sshfl [vmem:[#allocation1 + $0x20] sm:$0xff pattern:$0x75316420] }
 0xeb6   : > { %5636 = vst [vmem:[#allocation1 + $0x31] ss:$2 sm:$0xff] %v5611_v5  ;;  %v5651_v45 = vsel %vm972_vm7, %v5639_v9, 0.0 }
 0xeb7   : > { %5652 = vadd.xlane.f32.xlu1 %v5651_v45  ;;  %v9463_v45 = vrot.slane %v9455_v48, 4 }
 0xebd   : > { %v5640_v19 = vld.sshfl [vmem:[#allocation1 + $0x30] sm:$0xff pattern:$0x75316420] }
 0xebe   : > { %v5654_v39 = vsel %vm972_vm7, %v5640_v19, 0.0 }
 0xebf   : > { %5655 = vadd.xlane.f32.xlu0 %v5654_v39 }
 0xf08   : > { %v5647_v16 = vpop.xlane.xlu0 %5646 }
 0xf09   : > { %v5657_v29 = vmul.f32 %v5647_v16, %v9629_v41 }
 0xf0b   : > { %v5668_v62 = vperm.slane %v5657_v29, %v9250_v55  ;;  %v5672_v23 = vperm.slane %v5657_v29, %v9252_v28 }
 0xf0d   : > { %v9405_v13 = vsub.f32 %v5604_v57, %v5668_v62  ;;  %v9407_v18 = vsub.f32 %v5605_v36, %v5672_v23 }
 0xf0f   : > { %v5713_v31 = vmul.f32 %v9405_v13, %v9405_v13  ;;  %v5714_v43 = vmul.f32 %v9407_v18, %v9407_v18 }
 0xf10   : > { %v5650_v58 = vpop.xlane.xlu2 %5649 }
 0xf11   : > { %5729 = vst [vmem:[#allocation1] ss:$2 sm:$0xff] %v5713_v31  ;;  %v5658_v53 = vmul.f32 %v5650_v58, %v9629_v41 }
 0xf12   : > { %5731 = vst [vmem:[#allocation1 + $0x1] ss:$2 sm:$0xff] %v5714_v43 }
 0xf13   : > { %v5676_v52 = vperm.slane %v5658_v53, %v9250_v55  ;;  %v5680_v7 = vperm.slane %v5658_v53, %v9252_v28 }
 0xf15   : > { %v9416_v26 = vsub.f32 %v5606_v1, %v5676_v52  ;;  %v9418_v12 = vsub.f32 %v5607_v21, %v5680_v7 }
 0xf17   : > { %v5715_v11 = vmul.f32 %v9416_v26, %v9416_v26  ;;  %v5716_v32 = vmul.f32 %v9418_v12, %v9418_v12 }
 0xf19   : > { %5733 = vst [vmem:[#allocation1 + $0x10] ss:$2 sm:$0xff] %v5715_v11  ;;  %v5744_v25 = vld.sshfl [vmem:[#allocation1] sm:$0xff pattern:$0x75316420] }
 0xf1a   : > { %5735 = vst [vmem:[#allocation1 + $0x11] ss:$2 sm:$0xff] %v5716_v32  ;;  %v5752_v4 = vsel %vm972_vm7, %v5744_v25, 0.0 }
 0xf1b   : > { %5753 = vadd.xlane.f32.xlu2 %v5752_v4 }
 0xf21   : > { %v5745_v17 = vld.sshfl [vmem:[#allocation1 + $0x10] sm:$0xff pattern:$0x75316420] }
 0xf22   : > { %v5755_v2 = vsel %vm972_vm7, %v5745_v17, 0.0 }
 0xf23   : > { %5756 = vadd.xlane.f32.xlu1 %v5755_v2 }
 0xf2a   : > { %v5653_v59 = vpop.xlane.xlu1 %5652 }
 0xf2b   : > { %v5659_v51 = vmul.f32 %v5653_v59, %v9629_v41 }
 0xf2d   : > { %v5684_v30 = vperm.slane %v5659_v51, %v9250_v55  ;;  %v5688_v15 = vperm.slane %v5659_v51, %v9252_v28 }
 0xf2f   : > { %v9429_v56 = vsub.f32 %v5608_v54, %v5684_v30  ;;  %v9431_v0 = vsub.f32 %v5609_v3, %v5688_v15 }
 0xf31   : > { %v5717_v6 = vmul.f32 %v9429_v56, %v9429_v56  ;;  %v5718_v50 = vmul.f32 %v9431_v0, %v9431_v0 }
 0xf32   : > { %v5656_v27 = vpop.xlane.xlu0 %5655 }
 0xf33   : > { %5737 = vst [vmem:[#allocation1 + $0x20] ss:$2 sm:$0xff] %v5717_v6  ;;  %v5660_v49 = vmul.f32 %v5656_v27, %v9629_v41 }
 0xf34   : > { %5739 = vst [vmem:[#allocation1 + $0x21] ss:$2 sm:$0xff] %v5718_v50 }
 0xf35   : > { %v5692_v24 = vperm.slane %v5660_v49, %v9250_v55  ;;  %v5696_v14 = vperm.slane %v5660_v49, %v9252_v28 }
 0xf37   : > { %v9440_v61 = vsub.f32 %v5610_v37, %v5692_v24  ;;  %v9442_v46 = vsub.f32 %v5611_v5, %v5696_v14  ;;  %v9460_v37 = vld [vmem:[%s9632_s19] ss:$0 sm:$0xff] }
 0xf38   : > { %v9468_v29 = vrot.slane %v9460_v37, 4 }
 0xf39   : > { %v5719_v40 = vmul.f32 %v9440_v61, %v9440_v61  ;;  %v5720_v47 = vmul.f32 %v9442_v46, %v9442_v46 }
 0xf3b   : > { %5741 = vst [vmem:[#allocation1 + $0x30] ss:$2 sm:$0xff] %v5719_v40  ;;  %v5746_v57 = vld.sshfl [vmem:[#allocation1 + $0x20] sm:$0xff pattern:$0x75316420] }
 0xf3c   : > { %5743 = vst [vmem:[#allocation1 + $0x31] ss:$2 sm:$0xff] %v5720_v47  ;;  %v5758_v36 = vsel %vm972_vm7, %v5746_v57, 0.0 }
 0xf3d   : > { %5759 = vadd.xlane.f32.xlu0 %v5758_v36 }
 0xf43   : > { %v5747_v8 = vld.sshfl [vmem:[#allocation1 + $0x30] sm:$0xff pattern:$0x75316420] }
 0xf44   : > { %v5761_v20 = vsel %vm972_vm7, %v5747_v8, 0.0 }
 0xf45   : > { %5762 = vadd.xlane.f32.xlu2 %v5761_v20 }
 0xf8e   : > { %v5754_v63 = vpop.xlane.xlu2 %5753 }
 0xf8f   : > { %v5764_v1 = vmul.f32 %v5754_v63, %v9629_v41 }
 0xf91   : > { %v5768_v21 = vadd.f32 1e-05, %v5764_v1 }
 0xf93   : > { %6585 = vrsqrt.f32 %v5768_v21  ;;  %vm5778_vm7 = vweird.f32 %v5768_v21 }
 0xf96   : > { %v5757_v22 = vpop.xlane.xlu1 %5756 }
 0xf97   : > { %v5765_v10 = vmul.f32 %v5757_v22, %v9629_v41 }
 0xf99   : > { %v6586_v42 = vpop.eup %6585  ;;  %v5769_v60 = vadd.f32 1e-05, %v5765_v10 }
 0xf9a   : > { %v5773_v33 = vmul.f32 %v6586_v42, %v5768_v21  ;;  %vm5779_vm13 = vweird.f32 %v6586_v42 }
 0xf9b   : > { %6587 = vrsqrt.f32 %v5769_v60  ;;  %vm5780_vm14 = vmor %vm5778_vm7, %vm5779_vm13  ;;  %vm5788_vm15 = vweird.f32 %v5769_v60 }
 0xf9c   : > { %v5774_v44 = vmul.f32 %v6586_v42, %v5773_v33 }
 0xf9e   : > { %v5775_v34 = vmul.f32 0.5, %v5774_v44 }
 0xfa0   : > { %v5776_v54 = vsub.f32 1.5, %v5775_v34 }
 0xfa1   : > { %v6588_v3 = vpop.eup %6587 }
 0xfa2   : > { %v5777_v38 = vmul.f32 %v6586_v42, %v5776_v54  ;;  %v5783_v35 = vmul.f32 %v6588_v3, %v5769_v60  ;;  %vm5789_vm8 = vweird.f32 %v6588_v3 }
 0xfa3   : > { %vm5790_vm0 = vmor %vm5788_vm15, %vm5789_vm8 }
 0xfa4   : > { %v5781_v5 = vsel %vm5780_vm14, %v6586_v42, %v5777_v38  ;;  %v5784_v9 = vmul.f32 %v6588_v3, %v5783_v35 }
 0xfa5   : > { %v5819_v19 = vperm.slane %v5781_v5, %v9250_v55  ;;  %v5823_v39 = vperm.slane %v5781_v5, %v9252_v28 }
 0xfa6   : > { %v5785_v16 = vmul.f32 0.5, %v5784_v9 }
 0xfa7   : > { %v5856_v62 = vmul.f32 %v5819_v19, %v9405_v13  ;;  %v5857_v23 = vmul.f32 %v5823_v39, %v9407_v18 }
 0xfa8   : > { %v5786_v31 = vsub.f32 1.5, %v5785_v16 }
 0xfa9   : > { %v5869_v43 = vmul.f32 %v9455_v48, %v5856_v62  ;;  %v5870_v58 = vmul.f32 %v9463_v45, %v5857_v23 }
 0xfaa   : > { %v5787_v53 = vmul.f32 %v6588_v3, %v5786_v31 }
 0xfab   : > { %v5882_v52 = vadd.f32 %v9460_v37, %v5869_v43  ;;  %v5883_v7 = vadd.f32 %v9468_v29, %v5870_v58 }
 0xfac   : > { %v5791_v11 = vsel %vm5790_vm0, %v6588_v3, %v5787_v53 }
 0xfad   : > { %5891 = vst.msk [vmem:[%s9478_s16] sm:$0xf] %vm5890_vm9, %v5882_v52  ;;  %v5827_v13 = vperm.slane %v5791_v11, %v9250_v55  ;;  %v5831_v18 = vperm.slane %v5791_v11, %v9252_v28 }
 0xfae   : > { %5892 = vst.msk [vmem:[%s9478_s16 + $0x4] sm:$0xf] %vm5890_vm9, %v5883_v7 }
 0xfaf   : > { %v5858_v32 = vmul.f32 %v5827_v13, %v9416_v26  ;;  %v5859_v25 = vmul.f32 %v5831_v18, %v9418_v12 }
 0xfb0   : > { %v5760_v4 = vpop.xlane.xlu0 %5759 }
 0xfb1   : > { %v5871_v17 = vmul.f32 %v9455_v48, %v5858_v32  ;;  %v5872_v2 = vmul.f32 %v9463_v45, %v5859_v25  ;;  %v5766_v59 = vmul.f32 %v5760_v4, %v9629_v41 }
 0xfb3   : > { %v5884_v51 = vadd.f32 %v9460_v37, %v5871_v17  ;;  %v5885_v30 = vadd.f32 %v9468_v29, %v5872_v2  ;;  %v5770_v15 = vadd.f32 1e-05, %v5766_v59 }
 0xfb5   : > { %5893 = vst.msk [vmem:[%s9478_s16 + $0x8] sm:$0xf] %vm5890_vm9, %v5884_v51  ;;  %6589 = vrsqrt.f32 %v5770_v15  ;;  %vm5798_vm2 = vweird.f32 %v5770_v15 }
 0xfb6   : > { %5894 = vst.msk [vmem:[%s9478_s16 + $0xc] sm:$0xf] %vm5890_vm9, %v5885_v30 }
 0xfb8   : > { %v5763_v26 = vpop.xlane.xlu2 %5762 }
 0xfb9   : > { %v5767_v12 = vmul.f32 %v5763_v26, %v9629_v41 }
 0xfbb   : > { %v6590_v6 = vpop.eup %6589  ;;  %v5771_v50 = vadd.f32 1e-05, %v5767_v12 }
 0xfbc   : > { %v5793_v27 = vmul.f32 %v6590_v6, %v5770_v15  ;;  %vm5799_vm1 = vweird.f32 %v6590_v6 }
 0xfbd   : > { %6591 = vrsqrt.f32 %v5771_v50  ;;  %vm5800_vm3 = vmor %vm5798_vm2, %vm5799_vm1  ;;  %vm5808_vm5 = vweird.f32 %v5771_v50 }
 0xfbe   : > { %v5794_v49 = vmul.f32 %v6590_v6, %v5793_v27 }
 0xfc0   : > { %v5795_v24 = vmul.f32 0.5, %v5794_v49 }
 0xfc2   : > { %v5796_v14 = vsub.f32 1.5, %v5795_v24 }
 0xfc3   : > { %v6592_v40 = vpop.eup %6591 }
 0xfc4   : > { %v5797_v47 = vmul.f32 %v6590_v6, %v5796_v14  ;;  %v5803_v57 = vmul.f32 %v6592_v40, %v5771_v50  ;;  %vm5809_vm4 = vweird.f32 %v6592_v40 }
 0xfc5   : > { %vm5810_vm6 = vmor %vm5808_vm5, %vm5809_vm4 }
 0xfc6   : > { %v5801_v36 = vsel %vm5800_vm3, %v6590_v6, %v5797_v47  ;;  %v5804_v8 = vmul.f32 %v6592_v40, %v5803_v57 }
 0xfc7   : > { %v5835_v20 = vperm.slane %v5801_v36, %v9250_v55  ;;  %v5839_v41 = vperm.slane %v5801_v36, %v9252_v28 }
 0xfc8   : > { %v5805_v63 = vmul.f32 0.5, %v5804_v8 }
 0xfc9   : > { %v5860_v1 = vmul.f32 %v5835_v20, %v9429_v56  ;;  %v5861_v21 = vmul.f32 %v5839_v41, %v9431_v0 }
 0xfca   : > { %v5806_v22 = vsub.f32 1.5, %v5805_v63 }
 0xfcb   : > { %v5873_v10 = vmul.f32 %v9455_v48, %v5860_v1  ;;  %v5874_v42 = vmul.f32 %v9463_v45, %v5861_v21 }
 0xfcc   : > { %v5807_v60 = vmul.f32 %v6592_v40, %v5806_v22 }
 0xfcd   : > { %v5886_v33 = vadd.f32 %v9460_v37, %v5873_v10  ;;  %v5887_v44 = vadd.f32 %v9468_v29, %v5874_v42 }
 0xfce   : > { %v5811_v34 = vsel %vm5810_vm6, %v6592_v40, %v5807_v60 }
 0xfcf   : > { %5895 = vst.msk [vmem:[%s9478_s16 + $0x10] sm:$0xf] %vm5890_vm9, %v5886_v33  ;;  %v5843_v56 = vperm.slane %v5811_v34, %v9250_v55  ;;  %v5847_v0 = vperm.slane %v5811_v34, %v9252_v28 }
 0xfd0   : > { %5896 = vst.msk [vmem:[%s9478_s16 + $0x14] sm:$0xf] %vm5890_vm9, %v5887_v44 }
 0xfd1   : > { %v5862_v54 = vmul.f32 %v5843_v56, %v9440_v61  ;;  %v5863_v3 = vmul.f32 %v5847_v0, %v9442_v46 }
 0xfd3   : > { %v5875_v38 = vmul.f32 %v9455_v48, %v5862_v54  ;;  %v5876_v35 = vmul.f32 %v9463_v45, %v5863_v3 }
 0xfd5   : > { %v5888_v55 = vadd.f32 %v9460_v37, %v5875_v38  ;;  %v5889_v28 = vadd.f32 %v9468_v29, %v5876_v35 }
 0xfd7   : > { %5897 = vst.msk [vmem:[%s9478_s16 + $0x18] sm:$0xf] %vm5890_vm9, %v5888_v55 }
 0xfd8   : > { %5898 = vst.msk [vmem:[%s9478_s16 + $0x1c] sm:$0xf] %vm5890_vm9, %v5889_v28 }
 0xfd9   : > { %6838 = shalt.err (!%p6835_p9)
}
 0xfda   : > { %s6907_s26 = smov 4  }
 0xfdb   : > { %6271 = dma.vmem_to_hbm [thread:$0]  (%p7123_p4), %s5913_s24, 512, %s5915_s23, %s5900_s13, %s6903_s17, %s6903_s17, %s6907_s26  }
 0xfdc PF: > { %s5929_s16 = sand.u32 1, %s6877_s0   ;;  %p9634_p10 = scmp.ge.s32.totalorder %s6889_s21, 2 }
 0xfdd   : > { %s5930_s22 = scalar_lea.sflag [#allocation5], %s5929_s16 }
 0xfde   : > { %p6297_p13 = pnand %p9634_p10, %p7127_p6 }
 0xfe0   : > { %p6298_p11 = pneg %p6297_p13 }
 0xfe2   : > { %6872 = dma.done.wait (%p6298_p11), %s5930_s22, 512  }
 0xfe3   : > { %6874 = vsyncadd (%p6298_p11), %s5930_s22, 4294966784  ;;  %s9635_s21 = sld [smem:[#allocation22_spill]]  ;;  %s9638_s0 = smov %s6881_s30 }
 0xfe4   : > { %s9636_s1 = sld [smem:[#allocation21_spill]] }
 0xfe5   : > { %s9637_s20 = sld [smem:[#allocation23_spill]] }
 0xfe9   : > { %p35_p0 = scmp.ge.s32.totalorder %s9635_s21, 4  }
 0xfea   : > { %s9639_s30 = smov %s9636_s1 }
 0xfeb   :  { %37 = sbr.rel (!%p35_p0) target bundleno = 21 (0x15), region = 235 }
 0xff0   :  { %5936 = vsyncpa [#allocation4], 1 }
 0xff1   :  { %5938 = vsyncpa [#allocation4 + $0x1], 1 }
 0xff2   :  { %5939 = vsyncpa [#allocation7], 1 }
 0xff3   :  { %5940 = vsyncpa [#allocation10], 1 }
 0xff4   :  { %5941 = vsyncpa [#allocation13], 1 }
 0xff5   :  { %5942 = vsyncpa [#allocation5], 1 }
 0xff6   :  { %5944 = vsyncpa [#allocation5 + $0x1], 1 }

</bundles_post_ra>
